<compile_context>
chip_gen: v5e
topology: v5e:2x2
jax: 0.10.0
libtpu: 0.0.40
codegen_flags: <defaults>
</compile_context>

<pallas_src>
import jax
import jax.numpy as jnp
from jax import lax
from jax.experimental import pallas as pl
from jax.experimental.pallas import tpu as pltpu


_VMEM_LIMIT = 32 * 1024 * 1024   # explicit: above v5e's 16 MiB default scoped limit,
                                 # comfortably below v7x's 64 MiB physical VMEM.
_MAX_UNROLL = 64                 # cap on bn * th (the per-row loop is fully unrolled)


def _deconv_kernel(x_ref, w_ref, b_ref, o_ref):
    # x_ref: (bn, Cin, th, W)         input rows (NCHW block)
    # w_ref: (4*Cout, Cin)            rows ordered (kj, ki, co)
    # b_ref: (Cout, 1)
    # o_ref: (bn, Cout, 2*th, 2*W)    final NCHW output block (lane-dense stores)
    bn, _, th, w_in = x_ref.shape
    cout = o_ref.shape[1]

    # Constant 0/1 expansion matrices (built once, hoisted):
    #   E0 scatters input column c -> output column 2c, E1 -> 2c+1.
    col = lax.broadcasted_iota(jnp.int32, (w_in, 2 * w_in), 1)
    row2 = 2 * lax.broadcasted_iota(jnp.int32, (w_in, 2 * w_in), 0)
    e0 = (col == row2).astype(jnp.float32)
    e1 = (col == row2 + 1).astype(jnp.float32)

    wm = w_ref[...].astype(jnp.float32)       # (4*Cout, Cin)
    bias = b_ref[...].astype(jnp.float32)     # (Cout, 1) -> broadcasts over lanes

    for b in range(bn):
        for r in range(th):
            x_row = x_ref[b, :, r, :].astype(jnp.float32)               # (Cin, W)
            # Channel contraction for all 4 kernel taps at once (MXU).
            y = jnp.dot(wm, x_row, preferred_element_type=jnp.float32)  # (4*Cout, W)
            # Column (kj) interleave on the MXU; z rows are ordered (ki, co).
            z = (jnp.dot(y[: 2 * cout], e0, preferred_element_type=jnp.float32)
                 + jnp.dot(y[2 * cout:], e1, preferred_element_type=jnp.float32))  # (2*Cout, 2W)
            # f32 epilogue (bias) regardless of I/O dtype, then lane-dense stores.
            o_ref[b, :, 2 * r, :] = (z[:cout] + bias).astype(o_ref.dtype)
            o_ref[b, :, 2 * r + 1, :] = (z[cout:] + bias).astype(o_ref.dtype)


def _pick_tiles(n, cin, h, w, cout, itemsize):
    """Pick (bn, th): batch elements and input rows per grid step (cdiv grid)."""
    # VMEM besides the x/out blocks: E matrices + weights/bias + slack for temporaries.
    aux = 16 * w * w + 4 * (4 * cout * cin + cout) + (2 << 20)
    block_budget = max(1 << 20, (_VMEM_LIMIT - aux) // 3)   # /3: double-buffer + headroom

    # (x-block + out-block) bytes contributed by one input row of one image.
    row_bytes = (cin + 4 * cout) * w * itemsize

    if h <= 8:
        th = h                                  # short image: block dim == array dim
    else:
        th = min(8 * pl.cdiv(h, 8),             # whole image, rounded up to a sublane multiple
                 _MAX_UNROLL,
                 max(8, (block_budget // row_bytes) // 8 * 8))

    # Fold batch elements only once a block already covers a whole image
    # (amortizes the ~0.35us per-step overhead and tiny DMAs of small images).
    bn = 1
    while (th >= h and 2 * bn <= n
           and 2 * bn * th <= _MAX_UNROLL
           and 2 * bn * th * row_bytes <= block_budget):
        bn *= 2

    # Keep >= 2 grid steps when possible so dual-TensorCore chips (v7x) can split
    # the fully-parallel grid; negligible cost on single-core v5e/v6e.
    while pl.cdiv(n, bn) * pl.cdiv(h, th) < 2:
        if bn > 1:
            bn //= 2
        elif th > 8 and h > 8:
            th = max(8, (th // 2) // 8 * 8)
        else:
            break                                # single-tile problem; nothing to split
    return bn, th


@jax.jit
def deconv_block(x, weight, bias):
    """ConvTranspose2d(kernel_size=2, stride=2), PyTorch semantics.

    x:      (N, Cin, H, W)     NCHW, as in PyTorch
    weight: (Cin, Cout, 2, 2)  PyTorch ConvTranspose2d weight layout
    bias:   (Cout,)
    returns (N, Cout, 2H, 2W)
    """
    n, cin, h, w = x.shape
    cout = weight.shape[1]

    # (Cin, Cout, 2, 2) -> (kj, ki, co, ci) -> (4*Cout, Cin); row = (kj*2 + ki)*Cout + co.
    w_mat = jnp.transpose(weight, (3, 2, 1, 0)).reshape(4 * cout, cin)
    b_mat = bias.reshape(cout, 1)

    itemsize = jnp.dtype(x.dtype).itemsize
    bn, th = _pick_tiles(n, cin, h, w, cout, itemsize)
    grid = (pl.cdiv(n, bn), pl.cdiv(h, th))

    # Raise the scoped VMEM limit explicitly if the chosen blocks need it.
    x_blk = bn * cin * th * w * itemsize
    o_blk = bn * cout * (2 * th) * (2 * w) * itemsize
    vmem_limit = int(max(_VMEM_LIMIT, 2 * (x_blk + o_blk) + 16 * w * w + (4 << 20)))

    return pl.pallas_call(
        _deconv_kernel,
        out_shape=jax.ShapeDtypeStruct((n, cout, 2 * h, 2 * w), x.dtype),
        grid_spec=pltpu.PrefetchScalarGridSpec(
            num_scalar_prefetch=0,
            grid=grid,
            in_specs=[
                pl.BlockSpec((bn, cin, th, w), lambda nb, rb: (nb, 0, rb, 0)),
                pl.BlockSpec((4 * cout, cin), lambda nb, rb: (0, 0)),   # grid-invariant
                pl.BlockSpec((cout, 1), lambda nb, rb: (0, 0)),         # grid-invariant
            ],
            out_specs=pl.BlockSpec((bn, cout, 2 * th, 2 * w),
                                   lambda nb, rb: (nb, 0, rb, 0)),
        ),
        compiler_params=pltpu.CompilerParams(
            dimension_semantics=("parallel", "parallel"),
            vmem_limit_bytes=vmem_limit,
        ),
    )(x, w_mat, b_mat)


def _reference(x, weight, bias):
    # out[n, co, 2i+ki, 2j+kj] = sum_ci x[n,ci,i,j] * W[ci,co,ki,kj] + b[co]
    n, _, h, w = x.shape
    cout = weight.shape[1]
    t = jnp.einsum("ncij,cdkl->ndikjl", x, weight)  # (N, Cout, H, 2, W, 2)
    return t.reshape(n, cout, 2 * h, 2 * w) + bias[None, :, None, None]


if __name__ == "__main__":
    key = jax.random.PRNGKey(0)
    k1, k2, k3 = jax.random.split(key, 3)

    N, Cin, Cout, H, W = 2, 4, 8, 16, 16

    x = jax.random.normal(k1, (N, Cin, H, W), dtype=jnp.float32)
    # Deterministic synthetic params (shapes as nn.ConvTranspose2d(Cin, Cout, 2, 2)).
    weight = jax.random.normal(k2, (Cin, Cout, 2, 2), dtype=jnp.float32) * 0.1
    bias = jax.random.normal(k3, (Cout,), dtype=jnp.float32) * 0.1

    out = jax.block_until_ready(deconv_block(x, weight, bias))

    ref = _reference(x, weight, bias)
    assert out.shape == (N, Cout, 2 * H, 2 * W), out.shape
    assert jnp.allclose(out, ref, atol=1e-4, rtol=1e-4), "mismatch vs reference"

    print("KERNEL_OK")
</pallas_src>

<mosaic_0001>
module attributes {stable_mosaic.version = 11 : i64} {
  func.func @_deconv_kernel(%arg0: i32, %arg1: i32, %arg2: memref<1x4x16x16xf32, #tpu.memory_space<vmem>>, %arg3: memref<32x4xf32, #tpu.memory_space<vmem>>, %arg4: memref<8x1xf32, #tpu.memory_space<vmem>>, %arg5: memref<1x8x32x32xf32, #tpu.memory_space<vmem>>) attributes {dimension_semantics = [#tpu.dimension_semantics<parallel>, #tpu.dimension_semantics<parallel>], iteration_bounds = array<i64: 2, 1>, scalar_prefetch = 0 : i64, scratch_operands = 0 : i64, tpu.core_type = #tpu.core_type<tc>, window_params = [{transform_indices = @transform_0, window_bounds = array<i64: 1, 4, 16, 16>}, {pipeline_mode = #tpu.pipeline_mode<synchronous>, transform_indices = @transform_1, window_bounds = array<i64: 32, 4>}, {pipeline_mode = #tpu.pipeline_mode<synchronous>, transform_indices = @transform_2, window_bounds = array<i64: 8, 1>}, {transform_indices = @transform_3, window_bounds = array<i64: 1, 8, 32, 32>}]} {
    %0 = tpu.iota {dimensions = array<i32: 1>} : vector<16x32xi32>
    %1 = tpu.iota {dimensions = array<i32: 0>} : vector<16x32xi32>
    %c2_i32 = arith.constant 2 : i32
    %2 = vector.broadcast %c2_i32 : i32 to vector<16x32xi32>
    %3 = arith.muli %2, %1 : vector<16x32xi32>
    %4 = arith.cmpi eq, %0, %3 : vector<16x32xi32>
    %5 = arith.extui %4 : vector<16x32xi1> to vector<16x32xi32>
    %6 = arith.sitofp %5 : vector<16x32xi32> to vector<16x32xf32>
    %c1_i32 = arith.constant 1 : i32
    %7 = vector.broadcast %c1_i32 : i32 to vector<16x32xi32>
    %8 = arith.addi %3, %7 : vector<16x32xi32>
    %9 = arith.cmpi eq, %0, %8 : vector<16x32xi32>
    %10 = arith.extui %9 : vector<16x32xi1> to vector<16x32xi32>
    %11 = arith.sitofp %10 : vector<16x32xi32> to vector<16x32xf32>
    %c0 = arith.constant 0 : index
    %c0_0 = arith.constant 0 : index
    %12 = vector.load %arg3[%c0, %c0_0] : memref<32x4xf32, #tpu.memory_space<vmem>>, vector<32x4xf32>
    %c0_1 = arith.constant 0 : index
    %c0_2 = arith.constant 0 : index
    %13 = vector.load %arg4[%c0_1, %c0_2] : memref<8x1xf32, #tpu.memory_space<vmem>>, vector<8x1xf32>
    %c0_3 = arith.constant 0 : index
    %c0_4 = arith.constant 0 : index
    %c0_5 = arith.constant 0 : index
    %c0_6 = arith.constant 0 : index
    %14 = vector.load %arg2[%c0_3, %c0_4, %c0_5, %c0_6] : memref<1x4x16x16xf32, #tpu.memory_space<vmem>>, vector<1x4x1x16xf32>
    %15 = vector.shape_cast %14 : vector<1x4x1x16xf32> to vector<4x16xf32>
    %cst = arith.constant dense<0.000000e+00> : vector<32x16xf32>
    %16 = tpu.matmul %12, %15, %cst {dimension_numbers = #tpu.dot_dimension_numbers<[1], [0], [0], [1], [0, 0, 1, 1], [], []>} : vector<32x4xf32>, vector<4x16xf32>, vector<32x16xf32> -> vector<32x16xf32>
    %17 = vector.extract_strided_slice %16 {offsets = [0, 0], sizes = [16, 16], strides = [1, 1]} : vector<32x16xf32> to vector<16x16xf32>
    %cst_7 = arith.constant dense<0.000000e+00> : vector<16x32xf32>
    %18 = tpu.matmul %17, %6, %cst_7 {dimension_numbers = #tpu.dot_dimension_numbers<[1], [0], [0], [1], [0, 0, 1, 1], [], []>} : vector<16x16xf32>, vector<16x32xf32>, vector<16x32xf32> -> vector<16x32xf32>
    %19 = vector.extract_strided_slice %16 {offsets = [16, 0], sizes = [16, 16], strides = [1, 1]} : vector<32x16xf32> to vector<16x16xf32>
    %cst_8 = arith.constant dense<0.000000e+00> : vector<16x32xf32>
    %20 = tpu.matmul %19, %11, %cst_8 {dimension_numbers = #tpu.dot_dimension_numbers<[1], [0], [0], [1], [0, 0, 1, 1], [], []>} : vector<16x16xf32>, vector<16x32xf32>, vector<16x32xf32> -> vector<16x32xf32>
    %21 = arith.addf %18, %20 : vector<16x32xf32>
    %22 = vector.extract_strided_slice %21 {offsets = [0, 0], sizes = [8, 32], strides = [1, 1]} : vector<16x32xf32> to vector<8x32xf32>
    %23 = vector.broadcast %13 : vector<8x1xf32> to vector<8x32xf32>
    %24 = arith.addf %22, %23 : vector<8x32xf32>
    %c0_9 = arith.constant 0 : index
    %c0_10 = arith.constant 0 : index
    %c0_11 = arith.constant 0 : index
    %c0_12 = arith.constant 0 : index
    %25 = vector.load %arg5[%c0_9, %c0_10, %c0_11, %c0_12] : memref<1x8x32x32xf32, #tpu.memory_space<vmem>>, vector<1x8x1x32xf32>
    %26 = vector.shape_cast %25 : vector<1x8x1x32xf32> to vector<8x32xf32>
    %27 = vector.shape_cast %24 : vector<8x32xf32> to vector<1x8x1x32xf32>
    tpu.vector_store %arg5[%c0_9, %c0_10, %c0_11, %c0_12], %27 {strides = array<i32>} : memref<1x8x32x32xf32, #tpu.memory_space<vmem>>, vector<1x8x1x32xf32>,
    %28 = vector.extract_strided_slice %21 {offsets = [8, 0], sizes = [8, 32], strides = [1, 1]} : vector<16x32xf32> to vector<8x32xf32>
    %29 = vector.broadcast %13 : vector<8x1xf32> to vector<8x32xf32>
    %30 = arith.addf %28, %29 : vector<8x32xf32>
    %c0_13 = arith.constant 0 : index
    %c0_14 = arith.constant 0 : index
    %c1 = arith.constant 1 : index
    %c0_15 = arith.constant 0 : index
    %31 = vector.load %arg5[%c0_13, %c0_14, %c1, %c0_15] : memref<1x8x32x32xf32, #tpu.memory_space<vmem>>, vector<1x8x1x32xf32>
    %32 = vector.shape_cast %31 : vector<1x8x1x32xf32> to vector<8x32xf32>
    %33 = vector.shape_cast %30 : vector<8x32xf32> to vector<1x8x1x32xf32>
    tpu.vector_store %arg5[%c0_13, %c0_14, %c1, %c0_15], %33 {strides = array<i32>} : memref<1x8x32x32xf32, #tpu.memory_space<vmem>>, vector<1x8x1x32xf32>,
    %c0_16 = arith.constant 0 : index
    %c0_17 = arith.constant 0 : index
    %c1_18 = arith.constant 1 : index
    %c0_19 = arith.constant 0 : index
    %34 = vector.load %arg2[%c0_16, %c0_17, %c1_18, %c0_19] : memref<1x4x16x16xf32, #tpu.memory_space<vmem>>, vector<1x4x1x16xf32>
    %35 = vector.shape_cast %34 : vector<1x4x1x16xf32> to vector<4x16xf32>
    %cst_20 = arith.constant dense<0.000000e+00> : vector<32x16xf32>
    %36 = tpu.matmul %12, %35, %cst_20 {dimension_numbers = #tpu.dot_dimension_numbers<[1], [0], [0], [1], [0, 0, 1, 1], [], []>} : vector<32x4xf32>, vector<4x16xf32>, vector<32x16xf32> -> vector<32x16xf32>
    %37 = vector.extract_strided_slice %36 {offsets = [0, 0], sizes = [16, 16], strides = [1, 1]} : vector<32x16xf32> to vector<16x16xf32>
    %cst_21 = arith.constant dense<0.000000e+00> : vector<16x32xf32>
    %38 = tpu.matmul %37, %6, %cst_21 {dimension_numbers = #tpu.dot_dimension_numbers<[1], [0], [0], [1], [0, 0, 1, 1], [], []>} : vector<16x16xf32>, vector<16x32xf32>, vector<16x32xf32> -> vector<16x32xf32>
    %39 = vector.extract_strided_slice %36 {offsets = [16, 0], sizes = [16, 16], strides = [1, 1]} : vector<32x16xf32> to vector<16x16xf32>
    %cst_22 = arith.constant dense<0.000000e+00> : vector<16x32xf32>
    %40 = tpu.matmul %39, %11, %cst_22 {dimension_numbers = #tpu.dot_dimension_numbers<[1], [0], [0], [1], [0, 0, 1, 1], [], []>} : vector<16x16xf32>, vector<16x32xf32>, vector<16x32xf32> -> vector<16x32xf32>
    %41 = arith.addf %38, %40 : vector<16x32xf32>
    %42 = vector.extract_strided_slice %41 {offsets = [0, 0], sizes = [8, 32], strides = [1, 1]} : vector<16x32xf32> to vector<8x32xf32>
    %43 = vector.broadcast %13 : vector<8x1xf32> to vector<8x32xf32>
    %44 = arith.addf %42, %43 : vector<8x32xf32>
    %c0_23 = arith.constant 0 : index
    %c0_24 = arith.constant 0 : index
    %c2 = arith.constant 2 : index
    %c0_25 = arith.constant 0 : index
    %45 = vector.load %arg5[%c0_23, %c0_24, %c2, %c0_25] : memref<1x8x32x32xf32, #tpu.memory_space<vmem>>, vector<1x8x1x32xf32>
    %46 = vector.shape_cast %45 : vector<1x8x1x32xf32> to vector<8x32xf32>
    %47 = vector.shape_cast %44 : vector<8x32xf32> to vector<1x8x1x32xf32>
    tpu.vector_store %arg5[%c0_23, %c0_24, %c2, %c0_25], %47 {strides = array<i32>} : memref<1x8x32x32xf32, #tpu.memory_space<vmem>>, vector<1x8x1x32xf32>,
    %48 = vector.extract_strided_slice %41 {offsets = [8, 0], sizes = [8, 32], strides = [1, 1]} : vector<16x32xf32> to vector<8x32xf32>
    %49 = vector.broadcast %13 : vector<8x1xf32> to vector<8x32xf32>
    %50 = arith.addf %48, %49 : vector<8x32xf32>
    %c0_26 = arith.constant 0 : index
    %c0_27 = arith.constant 0 : index
    %c3 = arith.constant 3 : index
    %c0_28 = arith.constant 0 : index
    %51 = vector.load %arg5[%c0_26, %c0_27, %c3, %c0_28] : memref<1x8x32x32xf32, #tpu.memory_space<vmem>>, vector<1x8x1x32xf32>
    %52 = vector.shape_cast %51 : vector<1x8x1x32xf32> to vector<8x32xf32>
    %53 = vector.shape_cast %50 : vector<8x32xf32> to vector<1x8x1x32xf32>
    tpu.vector_store %arg5[%c0_26, %c0_27, %c3, %c0_28], %53 {strides = array<i32>} : memref<1x8x32x32xf32, #tpu.memory_space<vmem>>, vector<1x8x1x32xf32>,
    %c0_29 = arith.constant 0 : index
    %c0_30 = arith.constant 0 : index
    %c2_31 = arith.constant 2 : index
    %c0_32 = arith.constant 0 : index
    %54 = vector.load %arg2[%c0_29, %c0_30, %c2_31, %c0_32] : memref<1x4x16x16xf32, #tpu.memory_space<vmem>>, vector<1x4x1x16xf32>
    %55 = vector.shape_cast %54 : vector<1x4x1x16xf32> to vector<4x16xf32>
    %cst_33 = arith.constant dense<0.000000e+00> : vector<32x16xf32>
    %56 = tpu.matmul %12, %55, %cst_33 {dimension_numbers = #tpu.dot_dimension_numbers<[1], [0], [0], [1], [0, 0, 1, 1], [], []>} : vector<32x4xf32>, vector<4x16xf32>, vector<32x16xf32> -> vector<32x16xf32>
    %57 = vector.extract_strided_slice %56 {offsets = [0, 0], sizes = [16, 16], strides = [1, 1]} : vector<32x16xf32> to vector<16x16xf32>
    %cst_34 = arith.constant dense<0.000000e+00> : vector<16x32xf32>
    %58 = tpu.matmul %57, %6, %cst_34 {dimension_numbers = #tpu.dot_dimension_numbers<[1], [0], [0], [1], [0, 0, 1, 1], [], []>} : vector<16x16xf32>, vector<16x32xf32>, vector<16x32xf32> -> vector<16x32xf32>
    %59 = vector.extract_strided_slice %56 {offsets = [16, 0], sizes = [16, 16], strides = [1, 1]} : vector<32x16xf32> to vector<16x16xf32>
    %cst_35 = arith.constant dense<0.000000e+00> : vector<16x32xf32>
    %60 = tpu.matmul %59, %11, %cst_35 {dimension_numbers = #tpu.dot_dimension_numbers<[1], [0], [0], [1], [0, 0, 1, 1], [], []>} : vector<16x16xf32>, vector<16x32xf32>, vector<16x32xf32> -> vector<16x32xf32>
    %61 = arith.addf %58, %60 : vector<16x32xf32>
    %62 = vector.extract_strided_slice %61 {offsets = [0, 0], sizes = [8, 32], strides = [1, 1]} : vector<16x32xf32> to vector<8x32xf32>
    %63 = vector.broadcast %13 : vector<8x1xf32> to vector<8x32xf32>
    %64 = arith.addf %62, %63 : vector<8x32xf32>
    %c0_36 = arith.constant 0 : index
    %c0_37 = arith.constant 0 : index
    %c4 = arith.constant 4 : index
    %c0_38 = arith.constant 0 : index
    %65 = vector.load %arg5[%c0_36, %c0_37, %c4, %c0_38] : memref<1x8x32x32xf32, #tpu.memory_space<vmem>>, vector<1x8x1x32xf32>
    %66 = vector.shape_cast %65 : vector<1x8x1x32xf32> to vector<8x32xf32>
    %67 = vector.shape_cast %64 : vector<8x32xf32> to vector<1x8x1x32xf32>
    tpu.vector_store %arg5[%c0_36, %c0_37, %c4, %c0_38], %67 {strides = array<i32>} : memref<1x8x32x32xf32, #tpu.memory_space<vmem>>, vector<1x8x1x32xf32>,
    %68 = vector.extract_strided_slice %61 {offsets = [8, 0], sizes = [8, 32], strides = [1, 1]} : vector<16x32xf32> to vector<8x32xf32>
    %69 = vector.broadcast %13 : vector<8x1xf32> to vector<8x32xf32>
    %70 = arith.addf %68, %69 : vector<8x32xf32>
    %c0_39 = arith.constant 0 : index
    %c0_40 = arith.constant 0 : index
    %c5 = arith.constant 5 : index
    %c0_41 = arith.constant 0 : index
    %71 = vector.load %arg5[%c0_39, %c0_40, %c5, %c0_41] : memref<1x8x32x32xf32, #tpu.memory_space<vmem>>, vector<1x8x1x32xf32>
    %72 = vector.shape_cast %71 : vector<1x8x1x32xf32> to vector<8x32xf32>
    %73 = vector.shape_cast %70 : vector<8x32xf32> to vector<1x8x1x32xf32>
    tpu.vector_store %arg5[%c0_39, %c0_40, %c5, %c0_41], %73 {strides = array<i32>} : memref<1x8x32x32xf32, #tpu.memory_space<vmem>>, vector<1x8x1x32xf32>,
    %c0_42 = arith.constant 0 : index
    %c0_43 = arith.constant 0 : index
    %c3_44 = arith.constant 3 : index
    %c0_45 = arith.constant 0 : index
    %74 = vector.load %arg2[%c0_42, %c0_43, %c3_44, %c0_45] : memref<1x4x16x16xf32, #tpu.memory_space<vmem>>, vector<1x4x1x16xf32>
    %75 = vector.shape_cast %74 : vector<1x4x1x16xf32> to vector<4x16xf32>
    %cst_46 = arith.constant dense<0.000000e+00> : vector<32x16xf32>
    %76 = tpu.matmul %12, %75, %cst_46 {dimension_numbers = #tpu.dot_dimension_numbers<[1], [0], [0], [1], [0, 0, 1, 1], [], []>} : vector<32x4xf32>, vector<4x16xf32>, vector<32x16xf32> -> vector<32x16xf32>
    %77 = vector.extract_strided_slice %76 {offsets = [0, 0], sizes = [16, 16], strides = [1, 1]} : vector<32x16xf32> to vector<16x16xf32>
    %cst_47 = arith.constant dense<0.000000e+00> : vector<16x32xf32>
    %78 = tpu.matmul %77, %6, %cst_47 {dimension_numbers = #tpu.dot_dimension_numbers<[1], [0], [0], [1], [0, 0, 1, 1], [], []>} : vector<16x16xf32>, vector<16x32xf32>, vector<16x32xf32> -> vector<16x32xf32>
    %79 = vector.extract_strided_slice %76 {offsets = [16, 0], sizes = [16, 16], strides = [1, 1]} : vector<32x16xf32> to vector<16x16xf32>
    %cst_48 = arith.constant dense<0.000000e+00> : vector<16x32xf32>
    %80 = tpu.matmul %79, %11, %cst_48 {dimension_numbers = #tpu.dot_dimension_numbers<[1], [0], [0], [1], [0, 0, 1, 1], [], []>} : vector<16x16xf32>, vector<16x32xf32>, vector<16x32xf32> -> vector<16x32xf32>
    %81 = arith.addf %78, %80 : vector<16x32xf32>
    %82 = vector.extract_strided_slice %81 {offsets = [0, 0], sizes = [8, 32], strides = [1, 1]} : vector<16x32xf32> to vector<8x32xf32>
    %83 = vector.broadcast %13 : vector<8x1xf32> to vector<8x32xf32>
    %84 = arith.addf %82, %83 : vector<8x32xf32>
    %c0_49 = arith.constant 0 : index
    %c0_50 = arith.constant 0 : index
    %c6 = arith.constant 6 : index
    %c0_51 = arith.constant 0 : index
    %85 = vector.load %arg5[%c0_49, %c0_50, %c6, %c0_51] : memref<1x8x32x32xf32, #tpu.memory_space<vmem>>, vector<1x8x1x32xf32>
    %86 = vector.shape_cast %85 : vector<1x8x1x32xf32> to vector<8x32xf32>
    %87 = vector.shape_cast %84 : vector<8x32xf32> to vector<1x8x1x32xf32>
    tpu.vector_store %arg5[%c0_49, %c0_50, %c6, %c0_51], %87 {strides = array<i32>} : memref<1x8x32x32xf32, #tpu.memory_space<vmem>>, vector<1x8x1x32xf32>,
    %88 = vector.extract_strided_slice %81 {offsets = [8, 0], sizes = [8, 32], strides = [1, 1]} : vector<16x32xf32> to vector<8x32xf32>
    %89 = vector.broadcast %13 : vector<8x1xf32> to vector<8x32xf32>
    %90 = arith.addf %88, %89 : vector<8x32xf32>
    %c0_52 = arith.constant 0 : index
    %c0_53 = arith.constant 0 : index
    %c7 = arith.constant 7 : index
    %c0_54 = arith.constant 0 : index
    %91 = vector.load %arg5[%c0_52, %c0_53, %c7, %c0_54] : memref<1x8x32x32xf32, #tpu.memory_space<vmem>>, vector<1x8x1x32xf32>
    %92 = vector.shape_cast %91 : vector<1x8x1x32xf32> to vector<8x32xf32>
    %93 = vector.shape_cast %90 : vector<8x32xf32> to vector<1x8x1x32xf32>
    tpu.vector_store %arg5[%c0_52, %c0_53, %c7, %c0_54], %93 {strides = array<i32>} : memref<1x8x32x32xf32, #tpu.memory_space<vmem>>, vector<1x8x1x32xf32>,
    %c0_55 = arith.constant 0 : index
    %c0_56 = arith.constant 0 : index
    %c4_57 = arith.constant 4 : index
    %c0_58 = arith.constant 0 : index
    %94 = vector.load %arg2[%c0_55, %c0_56, %c4_57, %c0_58] : memref<1x4x16x16xf32, #tpu.memory_space<vmem>>, vector<1x4x1x16xf32>
    %95 = vector.shape_cast %94 : vector<1x4x1x16xf32> to vector<4x16xf32>
    %cst_59 = arith.constant dense<0.000000e+00> : vector<32x16xf32>
    %96 = tpu.matmul %12, %95, %cst_59 {dimension_numbers = #tpu.dot_dimension_numbers<[1], [0], [0], [1], [0, 0, 1, 1], [], []>} : vector<32x4xf32>, vector<4x16xf32>, vector<32x16xf32> -> vector<32x16xf32>
    %97 = vector.extract_strided_slice %96 {offsets = [0, 0], sizes = [16, 16], strides = [1, 1]} : vector<32x16xf32> to vector<16x16xf32>
    %cst_60 = arith.constant dense<0.000000e+00> : vector<16x32xf32>
    %98 = tpu.matmul %97, %6, %cst_60 {dimension_numbers = #tpu.dot_dimension_numbers<[1], [0], [0], [1], [0, 0, 1, 1], [], []>} : vector<16x16xf32>, vector<16x32xf32>, vector<16x32xf32> -> vector<16x32xf32>
    %99 = vector.extract_strided_slice %96 {offsets = [16, 0], sizes = [16, 16], strides = [1, 1]} : vector<32x16xf32> to vector<16x16xf32>
    %cst_61 = arith.constant dense<0.000000e+00> : vector<16x32xf32>
    %100 = tpu.matmul %99, %11, %cst_61 {dimension_numbers = #tpu.dot_dimension_numbers<[1], [0], [0], [1], [0, 0, 1, 1], [], []>} : vector<16x16xf32>, vector<16x32xf32>, vector<16x32xf32> -> vector<16x32xf32>
    %101 = arith.addf %98, %100 : vector<16x32xf32>
    %102 = vector.extract_strided_slice %101 {offsets = [0, 0], sizes = [8, 32], strides = [1, 1]} : vector<16x32xf32> to vector<8x32xf32>
    %103 = vector.broadcast %13 : vector<8x1xf32> to vector<8x32xf32>
    %104 = arith.addf %102, %103 : vector<8x32xf32>
    %c0_62 = arith.constant 0 : index
    %c0_63 = arith.constant 0 : index
    %c8 = arith.constant 8 : index
    %c0_64 = arith.constant 0 : index
    %105 = vector.load %arg5[%c0_62, %c0_63, %c8, %c0_64] : memref<1x8x32x32xf32, #tpu.memory_space<vmem>>, vector<1x8x1x32xf32>
    %106 = vector.shape_cast %105 : vector<1x8x1x32xf32> to vector<8x32xf32>
    %107 = vector.shape_cast %104 : vector<8x32xf32> to vector<1x8x1x32xf32>
    tpu.vector_store %arg5[%c0_62, %c0_63, %c8, %c0_64], %107 {strides = array<i32>} : memref<1x8x32x32xf32, #tpu.memory_space<vmem>>, vector<1x8x1x32xf32>,
    %108 = vector.extract_strided_slice %101 {offsets = [8, 0], sizes = [8, 32], strides = [1, 1]} : vector<16x32xf32> to vector<8x32xf32>
    %109 = vector.broadcast %13 : vector<8x1xf32> to vector<8x32xf32>
    %110 = arith.addf %108, %109 : vector<8x32xf32>
    %c0_65 = arith.constant 0 : index
    %c0_66 = arith.constant 0 : index
    %c9 = arith.constant 9 : index
    %c0_67 = arith.constant 0 : index
    %111 = vector.load %arg5[%c0_65, %c0_66, %c9, %c0_67] : memref<1x8x32x32xf32, #tpu.memory_space<vmem>>, vector<1x8x1x32xf32>
    %112 = vector.shape_cast %111 : vector<1x8x1x32xf32> to vector<8x32xf32>
    %113 = vector.shape_cast %110 : vector<8x32xf32> to vector<1x8x1x32xf32>
    tpu.vector_store %arg5[%c0_65, %c0_66, %c9, %c0_67], %113 {strides = array<i32>} : memref<1x8x32x32xf32, #tpu.memory_space<vmem>>, vector<1x8x1x32xf32>,
    %c0_68 = arith.constant 0 : index
    %c0_69 = arith.constant 0 : index
    %c5_70 = arith.constant 5 : index
    %c0_71 = arith.constant 0 : index
    %114 = vector.load %arg2[%c0_68, %c0_69, %c5_70, %c0_71] : memref<1x4x16x16xf32, #tpu.memory_space<vmem>>, vector<1x4x1x16xf32>
    %115 = vector.shape_cast %114 : vector<1x4x1x16xf32> to vector<4x16xf32>
    %cst_72 = arith.constant dense<0.000000e+00> : vector<32x16xf32>
    %116 = tpu.matmul %12, %115, %cst_72 {dimension_numbers = #tpu.dot_dimension_numbers<[1], [0], [0], [1], [0, 0, 1, 1], [], []>} : vector<32x4xf32>, vector<4x16xf32>, vector<32x16xf32> -> vector<32x16xf32>
    %117 = vector.extract_strided_slice %116 {offsets = [0, 0], sizes = [16, 16], strides = [1, 1]} : vector<32x16xf32> to vector<16x16xf32>
    %cst_73 = arith.constant dense<0.000000e+00> : vector<16x32xf32>
    %118 = tpu.matmul %117, %6, %cst_73 {dimension_numbers = #tpu.dot_dimension_numbers<[1], [0], [0], [1], [0, 0, 1, 1], [], []>} : vector<16x16xf32>, vector<16x32xf32>, vector<16x32xf32> -> vector<16x32xf32>
    %119 = vector.extract_strided_slice %116 {offsets = [16, 0], sizes = [16, 16], strides = [1, 1]} : vector<32x16xf32> to vector<16x16xf32>
    %cst_74 = arith.constant dense<0.000000e+00> : vector<16x32xf32>
    %120 = tpu.matmul %119, %11, %cst_74 {dimension_numbers = #tpu.dot_dimension_numbers<[1], [0], [0], [1], [0, 0, 1, 1], [], []>} : vector<16x16xf32>, vector<16x32xf32>, vector<16x32xf32> -> vector<16x32xf32>
    %121 = arith.addf %118, %120 : vector<16x32xf32>
    %122 = vector.extract_strided_slice %121 {offsets = [0, 0], sizes = [8, 32], strides = [1, 1]} : vector<16x32xf32> to vector<8x32xf32>
    %123 = vector.broadcast %13 : vector<8x1xf32> to vector<8x32xf32>
    %124 = arith.addf %122, %123 : vector<8x32xf32>
    %c0_75 = arith.constant 0 : index
    %c0_76 = arith.constant 0 : index
    %c10 = arith.constant 10 : index
    %c0_77 = arith.constant 0 : index
    %125 = vector.load %arg5[%c0_75, %c0_76, %c10, %c0_77] : memref<1x8x32x32xf32, #tpu.memory_space<vmem>>, vector<1x8x1x32xf32>
    %126 = vector.shape_cast %125 : vector<1x8x1x32xf32> to vector<8x32xf32>
    %127 = vector.shape_cast %124 : vector<8x32xf32> to vector<1x8x1x32xf32>
    tpu.vector_store %arg5[%c0_75, %c0_76, %c10, %c0_77], %127 {strides = array<i32>} : memref<1x8x32x32xf32, #tpu.memory_space<vmem>>, vector<1x8x1x32xf32>,
    %128 = vector.extract_strided_slice %121 {offsets = [8, 0], sizes = [8, 32], strides = [1, 1]} : vector<16x32xf32> to vector<8x32xf32>
    %129 = vector.broadcast %13 : vector<8x1xf32> to vector<8x32xf32>
    %130 = arith.addf %128, %129 : vector<8x32xf32>
    %c0_78 = arith.constant 0 : index
    %c0_79 = arith.constant 0 : index
    %c11 = arith.constant 11 : index
    %c0_80 = arith.constant 0 : index
    %131 = vector.load %arg5[%c0_78, %c0_79, %c11, %c0_80] : memref<1x8x32x32xf32, #tpu.memory_space<vmem>>, vector<1x8x1x32xf32>
    %132 = vector.shape_cast %131 : vector<1x8x1x32xf32> to vector<8x32xf32>
    %133 = vector.shape_cast %130 : vector<8x32xf32> to vector<1x8x1x32xf32>
    tpu.vector_store %arg5[%c0_78, %c0_79, %c11, %c0_80], %133 {strides = array<i32>} : memref<1x8x32x32xf32, #tpu.memory_space<vmem>>, vector<1x8x1x32xf32>,
    %c0_81 = arith.constant 0 : index
    %c0_82 = arith.constant 0 : index
    %c6_83 = arith.constant 6 : index
    %c0_84 = arith.constant 0 : index
    %134 = vector.load %arg2[%c0_81, %c0_82, %c6_83, %c0_84] : memref<1x4x16x16xf32, #tpu.memory_space<vmem>>, vector<1x4x1x16xf32>
    %135 = vector.shape_cast %134 : vector<1x4x1x16xf32> to vector<4x16xf32>
    %cst_85 = arith.constant dense<0.000000e+00> : vector<32x16xf32>
    %136 = tpu.matmul %12, %135, %cst_85 {dimension_numbers = #tpu.dot_dimension_numbers<[1], [0], [0], [1], [0, 0, 1, 1], [], []>} : vector<32x4xf32>, vector<4x16xf32>, vector<32x16xf32> -> vector<32x16xf32>
    %137 = vector.extract_strided_slice %136 {offsets = [0, 0], sizes = [16, 16], strides = [1, 1]} : vector<32x16xf32> to vector<16x16xf32>
    %cst_86 = arith.constant dense<0.000000e+00> : vector<16x32xf32>
    %138 = tpu.matmul %137, %6, %cst_86 {dimension_numbers = #tpu.dot_dimension_numbers<[1], [0], [0], [1], [0, 0, 1, 1], [], []>} : vector<16x16xf32>, vector<16x32xf32>, vector<16x32xf32> -> vector<16x32xf32>
    %139 = vector.extract_strided_slice %136 {offsets = [16, 0], sizes = [16, 16], strides = [1, 1]} : vector<32x16xf32> to vector<16x16xf32>
    %cst_87 = arith.constant dense<0.000000e+00> : vector<16x32xf32>
    %140 = tpu.matmul %139, %11, %cst_87 {dimension_numbers = #tpu.dot_dimension_numbers<[1], [0], [0], [1], [0, 0, 1, 1], [], []>} : vector<16x16xf32>, vector<16x32xf32>, vector<16x32xf32> -> vector<16x32xf32>
    %141 = arith.addf %138, %140 : vector<16x32xf32>
    %142 = vector.extract_strided_slice %141 {offsets = [0, 0], sizes = [8, 32], strides = [1, 1]} : vector<16x32xf32> to vector<8x32xf32>
    %143 = vector.broadcast %13 : vector<8x1xf32> to vector<8x32xf32>
    %144 = arith.addf %142, %143 : vector<8x32xf32>
    %c0_88 = arith.constant 0 : index
    %c0_89 = arith.constant 0 : index
    %c12 = arith.constant 12 : index
    %c0_90 = arith.constant 0 : index
    %145 = vector.load %arg5[%c0_88, %c0_89, %c12, %c0_90] : memref<1x8x32x32xf32, #tpu.memory_space<vmem>>, vector<1x8x1x32xf32>
    %146 = vector.shape_cast %145 : vector<1x8x1x32xf32> to vector<8x32xf32>
    %147 = vector.shape_cast %144 : vector<8x32xf32> to vector<1x8x1x32xf32>
    tpu.vector_store %arg5[%c0_88, %c0_89, %c12, %c0_90], %147 {strides = array<i32>} : memref<1x8x32x32xf32, #tpu.memory_space<vmem>>, vector<1x8x1x32xf32>,
    %148 = vector.extract_strided_slice %141 {offsets = [8, 0], sizes = [8, 32], strides = [1, 1]} : vector<16x32xf32> to vector<8x32xf32>
    %149 = vector.broadcast %13 : vector<8x1xf32> to vector<8x32xf32>
    %150 = arith.addf %148, %149 : vector<8x32xf32>
    %c0_91 = arith.constant 0 : index
    %c0_92 = arith.constant 0 : index
    %c13 = arith.constant 13 : index
    %c0_93 = arith.constant 0 : index
    %151 = vector.load %arg5[%c0_91, %c0_92, %c13, %c0_93] : memref<1x8x32x32xf32, #tpu.memory_space<vmem>>, vector<1x8x1x32xf32>
    %152 = vector.shape_cast %151 : vector<1x8x1x32xf32> to vector<8x32xf32>
    %153 = vector.shape_cast %150 : vector<8x32xf32> to vector<1x8x1x32xf32>
    tpu.vector_store %arg5[%c0_91, %c0_92, %c13, %c0_93], %153 {strides = array<i32>} : memref<1x8x32x32xf32, #tpu.memory_space<vmem>>, vector<1x8x1x32xf32>,
    %c0_94 = arith.constant 0 : index
    %c0_95 = arith.constant 0 : index
    %c7_96 = arith.constant 7 : index
    %c0_97 = arith.constant 0 : index
    %154 = vector.load %arg2[%c0_94, %c0_95, %c7_96, %c0_97] : memref<1x4x16x16xf32, #tpu.memory_space<vmem>>, vector<1x4x1x16xf32>
    %155 = vector.shape_cast %154 : vector<1x4x1x16xf32> to vector<4x16xf32>
    %cst_98 = arith.constant dense<0.000000e+00> : vector<32x16xf32>
    %156 = tpu.matmul %12, %155, %cst_98 {dimension_numbers = #tpu.dot_dimension_numbers<[1], [0], [0], [1], [0, 0, 1, 1], [], []>} : vector<32x4xf32>, vector<4x16xf32>, vector<32x16xf32> -> vector<32x16xf32>
    %157 = vector.extract_strided_slice %156 {offsets = [0, 0], sizes = [16, 16], strides = [1, 1]} : vector<32x16xf32> to vector<16x16xf32>
    %cst_99 = arith.constant dense<0.000000e+00> : vector<16x32xf32>
    %158 = tpu.matmul %157, %6, %cst_99 {dimension_numbers = #tpu.dot_dimension_numbers<[1], [0], [0], [1], [0, 0, 1, 1], [], []>} : vector<16x16xf32>, vector<16x32xf32>, vector<16x32xf32> -> vector<16x32xf32>
    %159 = vector.extract_strided_slice %156 {offsets = [16, 0], sizes = [16, 16], strides = [1, 1]} : vector<32x16xf32> to vector<16x16xf32>
    %cst_100 = arith.constant dense<0.000000e+00> : vector<16x32xf32>
    %160 = tpu.matmul %159, %11, %cst_100 {dimension_numbers = #tpu.dot_dimension_numbers<[1], [0], [0], [1], [0, 0, 1, 1], [], []>} : vector<16x16xf32>, vector<16x32xf32>, vector<16x32xf32> -> vector<16x32xf32>
    %161 = arith.addf %158, %160 : vector<16x32xf32>
    %162 = vector.extract_strided_slice %161 {offsets = [0, 0], sizes = [8, 32], strides = [1, 1]} : vector<16x32xf32> to vector<8x32xf32>
    %163 = vector.broadcast %13 : vector<8x1xf32> to vector<8x32xf32>
    %164 = arith.addf %162, %163 : vector<8x32xf32>
    %c0_101 = arith.constant 0 : index
    %c0_102 = arith.constant 0 : index
    %c14 = arith.constant 14 : index
    %c0_103 = arith.constant 0 : index
    %165 = vector.load %arg5[%c0_101, %c0_102, %c14, %c0_103] : memref<1x8x32x32xf32, #tpu.memory_space<vmem>>, vector<1x8x1x32xf32>
    %166 = vector.shape_cast %165 : vector<1x8x1x32xf32> to vector<8x32xf32>
    %167 = vector.shape_cast %164 : vector<8x32xf32> to vector<1x8x1x32xf32>
    tpu.vector_store %arg5[%c0_101, %c0_102, %c14, %c0_103], %167 {strides = array<i32>} : memref<1x8x32x32xf32, #tpu.memory_space<vmem>>, vector<1x8x1x32xf32>,
    %168 = vector.extract_strided_slice %161 {offsets = [8, 0], sizes = [8, 32], strides = [1, 1]} : vector<16x32xf32> to vector<8x32xf32>
    %169 = vector.broadcast %13 : vector<8x1xf32> to vector<8x32xf32>
    %170 = arith.addf %168, %169 : vector<8x32xf32>
    %c0_104 = arith.constant 0 : index
    %c0_105 = arith.constant 0 : index
    %c15 = arith.constant 15 : index
    %c0_106 = arith.constant 0 : index
    %171 = vector.load %arg5[%c0_104, %c0_105, %c15, %c0_106] : memref<1x8x32x32xf32, #tpu.memory_space<vmem>>, vector<1x8x1x32xf32>
    %172 = vector.shape_cast %171 : vector<1x8x1x32xf32> to vector<8x32xf32>
    %173 = vector.shape_cast %170 : vector<8x32xf32> to vector<1x8x1x32xf32>
    tpu.vector_store %arg5[%c0_104, %c0_105, %c15, %c0_106], %173 {strides = array<i32>} : memref<1x8x32x32xf32, #tpu.memory_space<vmem>>, vector<1x8x1x32xf32>,
    %c0_107 = arith.constant 0 : index
    %c0_108 = arith.constant 0 : index
    %c8_109 = arith.constant 8 : index
    %c0_110 = arith.constant 0 : index
    %174 = vector.load %arg2[%c0_107, %c0_108, %c8_109, %c0_110] : memref<1x4x16x16xf32, #tpu.memory_space<vmem>>, vector<1x4x1x16xf32>
    %175 = vector.shape_cast %174 : vector<1x4x1x16xf32> to vector<4x16xf32>
    %cst_111 = arith.constant dense<0.000000e+00> : vector<32x16xf32>
    %176 = tpu.matmul %12, %175, %cst_111 {dimension_numbers = #tpu.dot_dimension_numbers<[1], [0], [0], [1], [0, 0, 1, 1], [], []>} : vector<32x4xf32>, vector<4x16xf32>, vector<32x16xf32> -> vector<32x16xf32>
    %177 = vector.extract_strided_slice %176 {offsets = [0, 0], sizes = [16, 16], strides = [1, 1]} : vector<32x16xf32> to vector<16x16xf32>
    %cst_112 = arith.constant dense<0.000000e+00> : vector<16x32xf32>
    %178 = tpu.matmul %177, %6, %cst_112 {dimension_numbers = #tpu.dot_dimension_numbers<[1], [0], [0], [1], [0, 0, 1, 1], [], []>} : vector<16x16xf32>, vector<16x32xf32>, vector<16x32xf32> -> vector<16x32xf32>
    %179 = vector.extract_strided_slice %176 {offsets = [16, 0], sizes = [16, 16], strides = [1, 1]} : vector<32x16xf32> to vector<16x16xf32>
    %cst_113 = arith.constant dense<0.000000e+00> : vector<16x32xf32>
    %180 = tpu.matmul %179, %11, %cst_113 {dimension_numbers = #tpu.dot_dimension_numbers<[1], [0], [0], [1], [0, 0, 1, 1], [], []>} : vector<16x16xf32>, vector<16x32xf32>, vector<16x32xf32> -> vector<16x32xf32>
    %181 = arith.addf %178, %180 : vector<16x32xf32>
    %182 = vector.extract_strided_slice %181 {offsets = [0, 0], sizes = [8, 32], strides = [1, 1]} : vector<16x32xf32> to vector<8x32xf32>
    %183 = vector.broadcast %13 : vector<8x1xf32> to vector<8x32xf32>
    %184 = arith.addf %182, %183 : vector<8x32xf32>
    %c0_114 = arith.constant 0 : index
    %c0_115 = arith.constant 0 : index
    %c16 = arith.constant 16 : index
    %c0_116 = arith.constant 0 : index
    %185 = vector.load %arg5[%c0_114, %c0_115, %c16, %c0_116] : memref<1x8x32x32xf32, #tpu.memory_space<vmem>>, vector<1x8x1x32xf32>
    %186 = vector.shape_cast %185 : vector<1x8x1x32xf32> to vector<8x32xf32>
    %187 = vector.shape_cast %184 : vector<8x32xf32> to vector<1x8x1x32xf32>
    tpu.vector_store %arg5[%c0_114, %c0_115, %c16, %c0_116], %187 {strides = array<i32>} : memref<1x8x32x32xf32, #tpu.memory_space<vmem>>, vector<1x8x1x32xf32>,
    %188 = vector.extract_strided_slice %181 {offsets = [8, 0], sizes = [8, 32], strides = [1, 1]} : vector<16x32xf32> to vector<8x32xf32>
    %189 = vector.broadcast %13 : vector<8x1xf32> to vector<8x32xf32>
    %190 = arith.addf %188, %189 : vector<8x32xf32>
    %c0_117 = arith.constant 0 : index
    %c0_118 = arith.constant 0 : index
    %c17 = arith.constant 17 : index
    %c0_119 = arith.constant 0 : index
    %191 = vector.load %arg5[%c0_117, %c0_118, %c17, %c0_119] : memref<1x8x32x32xf32, #tpu.memory_space<vmem>>, vector<1x8x1x32xf32>
    %192 = vector.shape_cast %191 : vector<1x8x1x32xf32> to vector<8x32xf32>
    %193 = vector.shape_cast %190 : vector<8x32xf32> to vector<1x8x1x32xf32>
    tpu.vector_store %arg5[%c0_117, %c0_118, %c17, %c0_119], %193 {strides = array<i32>} : memref<1x8x32x32xf32, #tpu.memory_space<vmem>>, vector<1x8x1x32xf32>,
    %c0_120 = arith.constant 0 : index
    %c0_121 = arith.constant 0 : index
    %c9_122 = arith.constant 9 : index
    %c0_123 = arith.constant 0 : index
    %194 = vector.load %arg2[%c0_120, %c0_121, %c9_122, %c0_123] : memref<1x4x16x16xf32, #tpu.memory_space<vmem>>, vector<1x4x1x16xf32>
    %195 = vector.shape_cast %194 : vector<1x4x1x16xf32> to vector<4x16xf32>
    %cst_124 = arith.constant dense<0.000000e+00> : vector<32x16xf32>
    %196 = tpu.matmul %12, %195, %cst_124 {dimension_numbers = #tpu.dot_dimension_numbers<[1], [0], [0], [1], [0, 0, 1, 1], [], []>} : vector<32x4xf32>, vector<4x16xf32>, vector<32x16xf32> -> vector<32x16xf32>
    %197 = vector.extract_strided_slice %196 {offsets = [0, 0], sizes = [16, 16], strides = [1, 1]} : vector<32x16xf32> to vector<16x16xf32>
    %cst_125 = arith.constant dense<0.000000e+00> : vector<16x32xf32>
    %198 = tpu.matmul %197, %6, %cst_125 {dimension_numbers = #tpu.dot_dimension_numbers<[1], [0], [0], [1], [0, 0, 1, 1], [], []>} : vector<16x16xf32>, vector<16x32xf32>, vector<16x32xf32> -> vector<16x32xf32>
    %199 = vector.extract_strided_slice %196 {offsets = [16, 0], sizes = [16, 16], strides = [1, 1]} : vector<32x16xf32> to vector<16x16xf32>
    %cst_126 = arith.constant dense<0.000000e+00> : vector<16x32xf32>
    %200 = tpu.matmul %199, %11, %cst_126 {dimension_numbers = #tpu.dot_dimension_numbers<[1], [0], [0], [1], [0, 0, 1, 1], [], []>} : vector<16x16xf32>, vector<16x32xf32>, vector<16x32xf32> -> vector<16x32xf32>
    %201 = arith.addf %198, %200 : vector<16x32xf32>
    %202 = vector.extract_strided_slice %201 {offsets = [0, 0], sizes = [8, 32], strides = [1, 1]} : vector<16x32xf32> to vector<8x32xf32>
    %203 = vector.broadcast %13 : vector<8x1xf32> to vector<8x32xf32>
    %204 = arith.addf %202, %203 : vector<8x32xf32>
    %c0_127 = arith.constant 0 : index
    %c0_128 = arith.constant 0 : index
    %c18 = arith.constant 18 : index
    %c0_129 = arith.constant 0 : index
    %205 = vector.load %arg5[%c0_127, %c0_128, %c18, %c0_129] : memref<1x8x32x32xf32, #tpu.memory_space<vmem>>, vector<1x8x1x32xf32>
    %206 = vector.shape_cast %205 : vector<1x8x1x32xf32> to vector<8x32xf32>
    %207 = vector.shape_cast %204 : vector<8x32xf32> to vector<1x8x1x32xf32>
    tpu.vector_store %arg5[%c0_127, %c0_128, %c18, %c0_129], %207 {strides = array<i32>} : memref<1x8x32x32xf32, #tpu.memory_space<vmem>>, vector<1x8x1x32xf32>,
    %208 = vector.extract_strided_slice %201 {offsets = [8, 0], sizes = [8, 32], strides = [1, 1]} : vector<16x32xf32> to vector<8x32xf32>
    %209 = vector.broadcast %13 : vector<8x1xf32> to vector<8x32xf32>
    %210 = arith.addf %208, %209 : vector<8x32xf32>
    %c0_130 = arith.constant 0 : index
    %c0_131 = arith.constant 0 : index
    %c19 = arith.constant 19 : index
    %c0_132 = arith.constant 0 : index
    %211 = vector.load %arg5[%c0_130, %c0_131, %c19, %c0_132] : memref<1x8x32x32xf32, #tpu.memory_space<vmem>>, vector<1x8x1x32xf32>
    %212 = vector.shape_cast %211 : vector<1x8x1x32xf32> to vector<8x32xf32>
    %213 = vector.shape_cast %210 : vector<8x32xf32> to vector<1x8x1x32xf32>
    tpu.vector_store %arg5[%c0_130, %c0_131, %c19, %c0_132], %213 {strides = array<i32>} : memref<1x8x32x32xf32, #tpu.memory_space<vmem>>, vector<1x8x1x32xf32>,
    %c0_133 = arith.constant 0 : index
    %c0_134 = arith.constant 0 : index
    %c10_135 = arith.constant 10 : index
    %c0_136 = arith.constant 0 : index
    %214 = vector.load %arg2[%c0_133, %c0_134, %c10_135, %c0_136] : memref<1x4x16x16xf32, #tpu.memory_space<vmem>>, vector<1x4x1x16xf32>
    %215 = vector.shape_cast %214 : vector<1x4x1x16xf32> to vector<4x16xf32>
    %cst_137 = arith.constant dense<0.000000e+00> : vector<32x16xf32>
    %216 = tpu.matmul %12, %215, %cst_137 {dimension_numbers = #tpu.dot_dimension_numbers<[1], [0], [0], [1], [0, 0, 1, 1], [], []>} : vector<32x4xf32>, vector<4x16xf32>, vector<32x16xf32> -> vector<32x16xf32>
    %217 = vector.extract_strided_slice %216 {offsets = [0, 0], sizes = [16, 16], strides = [1, 1]} : vector<32x16xf32> to vector<16x16xf32>
    %cst_138 = arith.constant dense<0.000000e+00> : vector<16x32xf32>
    %218 = tpu.matmul %217, %6, %cst_138 {dimension_numbers = #tpu.dot_dimension_numbers<[1], [0], [0], [1], [0, 0, 1, 1], [], []>} : vector<16x16xf32>, vector<16x32xf32>, vector<16x32xf32> -> vector<16x32xf32>
    %219 = vector.extract_strided_slice %216 {offsets = [16, 0], sizes = [16, 16], strides = [1, 1]} : vector<32x16xf32> to vector<16x16xf32>
    %cst_139 = arith.constant dense<0.000000e+00> : vector<16x32xf32>
    %220 = tpu.matmul %219, %11, %cst_139 {dimension_numbers = #tpu.dot_dimension_numbers<[1], [0], [0], [1], [0, 0, 1, 1], [], []>} : vector<16x16xf32>, vector<16x32xf32>, vector<16x32xf32> -> vector<16x32xf32>
    %221 = arith.addf %218, %220 : vector<16x32xf32>
    %222 = vector.extract_strided_slice %221 {offsets = [0, 0], sizes = [8, 32], strides = [1, 1]} : vector<16x32xf32> to vector<8x32xf32>
    %223 = vector.broadcast %13 : vector<8x1xf32> to vector<8x32xf32>
    %224 = arith.addf %222, %223 : vector<8x32xf32>
    %c0_140 = arith.constant 0 : index
    %c0_141 = arith.constant 0 : index
    %c20 = arith.constant 20 : index
    %c0_142 = arith.constant 0 : index
    %225 = vector.load %arg5[%c0_140, %c0_141, %c20, %c0_142] : memref<1x8x32x32xf32, #tpu.memory_space<vmem>>, vector<1x8x1x32xf32>
    %226 = vector.shape_cast %225 : vector<1x8x1x32xf32> to vector<8x32xf32>
    %227 = vector.shape_cast %224 : vector<8x32xf32> to vector<1x8x1x32xf32>
    tpu.vector_store %arg5[%c0_140, %c0_141, %c20, %c0_142], %227 {strides = array<i32>} : memref<1x8x32x32xf32, #tpu.memory_space<vmem>>, vector<1x8x1x32xf32>,
    %228 = vector.extract_strided_slice %221 {offsets = [8, 0], sizes = [8, 32], strides = [1, 1]} : vector<16x32xf32> to vector<8x32xf32>
    %229 = vector.broadcast %13 : vector<8x1xf32> to vector<8x32xf32>
    %230 = arith.addf %228, %229 : vector<8x32xf32>
    %c0_143 = arith.constant 0 : index
    %c0_144 = arith.constant 0 : index
    %c21 = arith.constant 21 : index
    %c0_145 = arith.constant 0 : index
    %231 = vector.load %arg5[%c0_143, %c0_144, %c21, %c0_145] : memref<1x8x32x32xf32, #tpu.memory_space<vmem>>, vector<1x8x1x32xf32>
    %232 = vector.shape_cast %231 : vector<1x8x1x32xf32> to vector<8x32xf32>
    %233 = vector.shape_cast %230 : vector<8x32xf32> to vector<1x8x1x32xf32>
    tpu.vector_store %arg5[%c0_143, %c0_144, %c21, %c0_145], %233 {strides = array<i32>} : memref<1x8x32x32xf32, #tpu.memory_space<vmem>>, vector<1x8x1x32xf32>,
    %c0_146 = arith.constant 0 : index
    %c0_147 = arith.constant 0 : index
    %c11_148 = arith.constant 11 : index
    %c0_149 = arith.constant 0 : index
    %234 = vector.load %arg2[%c0_146, %c0_147, %c11_148, %c0_149] : memref<1x4x16x16xf32, #tpu.memory_space<vmem>>, vector<1x4x1x16xf32>
    %235 = vector.shape_cast %234 : vector<1x4x1x16xf32> to vector<4x16xf32>
    %cst_150 = arith.constant dense<0.000000e+00> : vector<32x16xf32>
    %236 = tpu.matmul %12, %235, %cst_150 {dimension_numbers = #tpu.dot_dimension_numbers<[1], [0], [0], [1], [0, 0, 1, 1], [], []>} : vector<32x4xf32>, vector<4x16xf32>, vector<32x16xf32> -> vector<32x16xf32>
    %237 = vector.extract_strided_slice %236 {offsets = [0, 0], sizes = [16, 16], strides = [1, 1]} : vector<32x16xf32> to vector<16x16xf32>
    %cst_151 = arith.constant dense<0.000000e+00> : vector<16x32xf32>
    %238 = tpu.matmul %237, %6, %cst_151 {dimension_numbers = #tpu.dot_dimension_numbers<[1], [0], [0], [1], [0, 0, 1, 1], [], []>} : vector<16x16xf32>, vector<16x32xf32>, vector<16x32xf32> -> vector<16x32xf32>
    %239 = vector.extract_strided_slice %236 {offsets = [16, 0], sizes = [16, 16], strides = [1, 1]} : vector<32x16xf32> to vector<16x16xf32>
    %cst_152 = arith.constant dense<0.000000e+00> : vector<16x32xf32>
    %240 = tpu.matmul %239, %11, %cst_152 {dimension_numbers = #tpu.dot_dimension_numbers<[1], [0], [0], [1], [0, 0, 1, 1], [], []>} : vector<16x16xf32>, vector<16x32xf32>, vector<16x32xf32> -> vector<16x32xf32>
    %241 = arith.addf %238, %240 : vector<16x32xf32>
    %242 = vector.extract_strided_slice %241 {offsets = [0, 0], sizes = [8, 32], strides = [1, 1]} : vector<16x32xf32> to vector<8x32xf32>
    %243 = vector.broadcast %13 : vector<8x1xf32> to vector<8x32xf32>
    %244 = arith.addf %242, %243 : vector<8x32xf32>
    %c0_153 = arith.constant 0 : index
    %c0_154 = arith.constant 0 : index
    %c22 = arith.constant 22 : index
    %c0_155 = arith.constant 0 : index
    %245 = vector.load %arg5[%c0_153, %c0_154, %c22, %c0_155] : memref<1x8x32x32xf32, #tpu.memory_space<vmem>>, vector<1x8x1x32xf32>
    %246 = vector.shape_cast %245 : vector<1x8x1x32xf32> to vector<8x32xf32>
    %247 = vector.shape_cast %244 : vector<8x32xf32> to vector<1x8x1x32xf32>
    tpu.vector_store %arg5[%c0_153, %c0_154, %c22, %c0_155], %247 {strides = array<i32>} : memref<1x8x32x32xf32, #tpu.memory_space<vmem>>, vector<1x8x1x32xf32>,
    %248 = vector.extract_strided_slice %241 {offsets = [8, 0], sizes = [8, 32], strides = [1, 1]} : vector<16x32xf32> to vector<8x32xf32>
    %249 = vector.broadcast %13 : vector<8x1xf32> to vector<8x32xf32>
    %250 = arith.addf %248, %249 : vector<8x32xf32>
    %c0_156 = arith.constant 0 : index
    %c0_157 = arith.constant 0 : index
    %c23 = arith.constant 23 : index
    %c0_158 = arith.constant 0 : index
    %251 = vector.load %arg5[%c0_156, %c0_157, %c23, %c0_158] : memref<1x8x32x32xf32, #tpu.memory_space<vmem>>, vector<1x8x1x32xf32>
    %252 = vector.shape_cast %251 : vector<1x8x1x32xf32> to vector<8x32xf32>
    %253 = vector.shape_cast %250 : vector<8x32xf32> to vector<1x8x1x32xf32>
    tpu.vector_store %arg5[%c0_156, %c0_157, %c23, %c0_158], %253 {strides = array<i32>} : memref<1x8x32x32xf32, #tpu.memory_space<vmem>>, vector<1x8x1x32xf32>,
    %c0_159 = arith.constant 0 : index
    %c0_160 = arith.constant 0 : index
    %c12_161 = arith.constant 12 : index
    %c0_162 = arith.constant 0 : index
    %254 = vector.load %arg2[%c0_159, %c0_160, %c12_161, %c0_162] : memref<1x4x16x16xf32, #tpu.memory_space<vmem>>, vector<1x4x1x16xf32>
    %255 = vector.shape_cast %254 : vector<1x4x1x16xf32> to vector<4x16xf32>
    %cst_163 = arith.constant dense<0.000000e+00> : vector<32x16xf32>
    %256 = tpu.matmul %12, %255, %cst_163 {dimension_numbers = #tpu.dot_dimension_numbers<[1], [0], [0], [1], [0, 0, 1, 1], [], []>} : vector<32x4xf32>, vector<4x16xf32>, vector<32x16xf32> -> vector<32x16xf32>
    %257 = vector.extract_strided_slice %256 {offsets = [0, 0], sizes = [16, 16], strides = [1, 1]} : vector<32x16xf32> to vector<16x16xf32>
    %cst_164 = arith.constant dense<0.000000e+00> : vector<16x32xf32>
    %258 = tpu.matmul %257, %6, %cst_164 {dimension_numbers = #tpu.dot_dimension_numbers<[1], [0], [0], [1], [0, 0, 1, 1], [], []>} : vector<16x16xf32>, vector<16x32xf32>, vector<16x32xf32> -> vector<16x32xf32>
    %259 = vector.extract_strided_slice %256 {offsets = [16, 0], sizes = [16, 16], strides = [1, 1]} : vector<32x16xf32> to vector<16x16xf32>
    %cst_165 = arith.constant dense<0.000000e+00> : vector<16x32xf32>
    %260 = tpu.matmul %259, %11, %cst_165 {dimension_numbers = #tpu.dot_dimension_numbers<[1], [0], [0], [1], [0, 0, 1, 1], [], []>} : vector<16x16xf32>, vector<16x32xf32>, vector<16x32xf32> -> vector<16x32xf32>
    %261 = arith.addf %258, %260 : vector<16x32xf32>
    %262 = vector.extract_strided_slice %261 {offsets = [0, 0], sizes = [8, 32], strides = [1, 1]} : vector<16x32xf32> to vector<8x32xf32>
    %263 = vector.broadcast %13 : vector<8x1xf32> to vector<8x32xf32>
    %264 = arith.addf %262, %263 : vector<8x32xf32>
    %c0_166 = arith.constant 0 : index
    %c0_167 = arith.constant 0 : index
    %c24 = arith.constant 24 : index
    %c0_168 = arith.constant 0 : index
    %265 = vector.load %arg5[%c0_166, %c0_167, %c24, %c0_168] : memref<1x8x32x32xf32, #tpu.memory_space<vmem>>, vector<1x8x1x32xf32>
    %266 = vector.shape_cast %265 : vector<1x8x1x32xf32> to vector<8x32xf32>
    %267 = vector.shape_cast %264 : vector<8x32xf32> to vector<1x8x1x32xf32>
    tpu.vector_store %arg5[%c0_166, %c0_167, %c24, %c0_168], %267 {strides = array<i32>} : memref<1x8x32x32xf32, #tpu.memory_space<vmem>>, vector<1x8x1x32xf32>,
    %268 = vector.extract_strided_slice %261 {offsets = [8, 0], sizes = [8, 32], strides = [1, 1]} : vector<16x32xf32> to vector<8x32xf32>
    %269 = vector.broadcast %13 : vector<8x1xf32> to vector<8x32xf32>
    %270 = arith.addf %268, %269 : vector<8x32xf32>
    %c0_169 = arith.constant 0 : index
    %c0_170 = arith.constant 0 : index
    %c25 = arith.constant 25 : index
    %c0_171 = arith.constant 0 : index
    %271 = vector.load %arg5[%c0_169, %c0_170, %c25, %c0_171] : memref<1x8x32x32xf32, #tpu.memory_space<vmem>>, vector<1x8x1x32xf32>
    %272 = vector.shape_cast %271 : vector<1x8x1x32xf32> to vector<8x32xf32>
    %273 = vector.shape_cast %270 : vector<8x32xf32> to vector<1x8x1x32xf32>
    tpu.vector_store %arg5[%c0_169, %c0_170, %c25, %c0_171], %273 {strides = array<i32>} : memref<1x8x32x32xf32, #tpu.memory_space<vmem>>, vector<1x8x1x32xf32>,
    %c0_172 = arith.constant 0 : index
    %c0_173 = arith.constant 0 : index
    %c13_174 = arith.constant 13 : index
    %c0_175 = arith.constant 0 : index
    %274 = vector.load %arg2[%c0_172, %c0_173, %c13_174, %c0_175] : memref<1x4x16x16xf32, #tpu.memory_space<vmem>>, vector<1x4x1x16xf32>
    %275 = vector.shape_cast %274 : vector<1x4x1x16xf32> to vector<4x16xf32>
    %cst_176 = arith.constant dense<0.000000e+00> : vector<32x16xf32>
    %276 = tpu.matmul %12, %275, %cst_176 {dimension_numbers = #tpu.dot_dimension_numbers<[1], [0], [0], [1], [0, 0, 1, 1], [], []>} : vector<32x4xf32>, vector<4x16xf32>, vector<32x16xf32> -> vector<32x16xf32>
    %277 = vector.extract_strided_slice %276 {offsets = [0, 0], sizes = [16, 16], strides = [1, 1]} : vector<32x16xf32> to vector<16x16xf32>
    %cst_177 = arith.constant dense<0.000000e+00> : vector<16x32xf32>
    %278 = tpu.matmul %277, %6, %cst_177 {dimension_numbers = #tpu.dot_dimension_numbers<[1], [0], [0], [1], [0, 0, 1, 1], [], []>} : vector<16x16xf32>, vector<16x32xf32>, vector<16x32xf32> -> vector<16x32xf32>
    %279 = vector.extract_strided_slice %276 {offsets = [16, 0], sizes = [16, 16], strides = [1, 1]} : vector<32x16xf32> to vector<16x16xf32>
    %cst_178 = arith.constant dense<0.000000e+00> : vector<16x32xf32>
    %280 = tpu.matmul %279, %11, %cst_178 {dimension_numbers = #tpu.dot_dimension_numbers<[1], [0], [0], [1], [0, 0, 1, 1], [], []>} : vector<16x16xf32>, vector<16x32xf32>, vector<16x32xf32> -> vector<16x32xf32>
    %281 = arith.addf %278, %280 : vector<16x32xf32>
    %282 = vector.extract_strided_slice %281 {offsets = [0, 0], sizes = [8, 32], strides = [1, 1]} : vector<16x32xf32> to vector<8x32xf32>
    %283 = vector.broadcast %13 : vector<8x1xf32> to vector<8x32xf32>
    %284 = arith.addf %282, %283 : vector<8x32xf32>
    %c0_179 = arith.constant 0 : index
    %c0_180 = arith.constant 0 : index
    %c26 = arith.constant 26 : index
    %c0_181 = arith.constant 0 : index
    %285 = vector.load %arg5[%c0_179, %c0_180, %c26, %c0_181] : memref<1x8x32x32xf32, #tpu.memory_space<vmem>>, vector<1x8x1x32xf32>
    %286 = vector.shape_cast %285 : vector<1x8x1x32xf32> to vector<8x32xf32>
    %287 = vector.shape_cast %284 : vector<8x32xf32> to vector<1x8x1x32xf32>
    tpu.vector_store %arg5[%c0_179, %c0_180, %c26, %c0_181], %287 {strides = array<i32>} : memref<1x8x32x32xf32, #tpu.memory_space<vmem>>, vector<1x8x1x32xf32>,
    %288 = vector.extract_strided_slice %281 {offsets = [8, 0], sizes = [8, 32], strides = [1, 1]} : vector<16x32xf32> to vector<8x32xf32>
    %289 = vector.broadcast %13 : vector<8x1xf32> to vector<8x32xf32>
    %290 = arith.addf %288, %289 : vector<8x32xf32>
    %c0_182 = arith.constant 0 : index
    %c0_183 = arith.constant 0 : index
    %c27 = arith.constant 27 : index
    %c0_184 = arith.constant 0 : index
    %291 = vector.load %arg5[%c0_182, %c0_183, %c27, %c0_184] : memref<1x8x32x32xf32, #tpu.memory_space<vmem>>, vector<1x8x1x32xf32>
    %292 = vector.shape_cast %291 : vector<1x8x1x32xf32> to vector<8x32xf32>
    %293 = vector.shape_cast %290 : vector<8x32xf32> to vector<1x8x1x32xf32>
    tpu.vector_store %arg5[%c0_182, %c0_183, %c27, %c0_184], %293 {strides = array<i32>} : memref<1x8x32x32xf32, #tpu.memory_space<vmem>>, vector<1x8x1x32xf32>,
    %c0_185 = arith.constant 0 : index
    %c0_186 = arith.constant 0 : index
    %c14_187 = arith.constant 14 : index
    %c0_188 = arith.constant 0 : index
    %294 = vector.load %arg2[%c0_185, %c0_186, %c14_187, %c0_188] : memref<1x4x16x16xf32, #tpu.memory_space<vmem>>, vector<1x4x1x16xf32>
    %295 = vector.shape_cast %294 : vector<1x4x1x16xf32> to vector<4x16xf32>
    %cst_189 = arith.constant dense<0.000000e+00> : vector<32x16xf32>
    %296 = tpu.matmul %12, %295, %cst_189 {dimension_numbers = #tpu.dot_dimension_numbers<[1], [0], [0], [1], [0, 0, 1, 1], [], []>} : vector<32x4xf32>, vector<4x16xf32>, vector<32x16xf32> -> vector<32x16xf32>
    %297 = vector.extract_strided_slice %296 {offsets = [0, 0], sizes = [16, 16], strides = [1, 1]} : vector<32x16xf32> to vector<16x16xf32>
    %cst_190 = arith.constant dense<0.000000e+00> : vector<16x32xf32>
    %298 = tpu.matmul %297, %6, %cst_190 {dimension_numbers = #tpu.dot_dimension_numbers<[1], [0], [0], [1], [0, 0, 1, 1], [], []>} : vector<16x16xf32>, vector<16x32xf32>, vector<16x32xf32> -> vector<16x32xf32>
    %299 = vector.extract_strided_slice %296 {offsets = [16, 0], sizes = [16, 16], strides = [1, 1]} : vector<32x16xf32> to vector<16x16xf32>
    %cst_191 = arith.constant dense<0.000000e+00> : vector<16x32xf32>
    %300 = tpu.matmul %299, %11, %cst_191 {dimension_numbers = #tpu.dot_dimension_numbers<[1], [0], [0], [1], [0, 0, 1, 1], [], []>} : vector<16x16xf32>, vector<16x32xf32>, vector<16x32xf32> -> vector<16x32xf32>
    %301 = arith.addf %298, %300 : vector<16x32xf32>
    %302 = vector.extract_strided_slice %301 {offsets = [0, 0], sizes = [8, 32], strides = [1, 1]} : vector<16x32xf32> to vector<8x32xf32>
    %303 = vector.broadcast %13 : vector<8x1xf32> to vector<8x32xf32>
    %304 = arith.addf %302, %303 : vector<8x32xf32>
    %c0_192 = arith.constant 0 : index
    %c0_193 = arith.constant 0 : index
    %c28 = arith.constant 28 : index
    %c0_194 = arith.constant 0 : index
    %305 = vector.load %arg5[%c0_192, %c0_193, %c28, %c0_194] : memref<1x8x32x32xf32, #tpu.memory_space<vmem>>, vector<1x8x1x32xf32>
    %306 = vector.shape_cast %305 : vector<1x8x1x32xf32> to vector<8x32xf32>
    %307 = vector.shape_cast %304 : vector<8x32xf32> to vector<1x8x1x32xf32>
    tpu.vector_store %arg5[%c0_192, %c0_193, %c28, %c0_194], %307 {strides = array<i32>} : memref<1x8x32x32xf32, #tpu.memory_space<vmem>>, vector<1x8x1x32xf32>,
    %308 = vector.extract_strided_slice %301 {offsets = [8, 0], sizes = [8, 32], strides = [1, 1]} : vector<16x32xf32> to vector<8x32xf32>
    %309 = vector.broadcast %13 : vector<8x1xf32> to vector<8x32xf32>
    %310 = arith.addf %308, %309 : vector<8x32xf32>
    %c0_195 = arith.constant 0 : index
    %c0_196 = arith.constant 0 : index
    %c29 = arith.constant 29 : index
    %c0_197 = arith.constant 0 : index
    %311 = vector.load %arg5[%c0_195, %c0_196, %c29, %c0_197] : memref<1x8x32x32xf32, #tpu.memory_space<vmem>>, vector<1x8x1x32xf32>
    %312 = vector.shape_cast %311 : vector<1x8x1x32xf32> to vector<8x32xf32>
    %313 = vector.shape_cast %310 : vector<8x32xf32> to vector<1x8x1x32xf32>
    tpu.vector_store %arg5[%c0_195, %c0_196, %c29, %c0_197], %313 {strides = array<i32>} : memref<1x8x32x32xf32, #tpu.memory_space<vmem>>, vector<1x8x1x32xf32>,
    %c0_198 = arith.constant 0 : index
    %c0_199 = arith.constant 0 : index
    %c15_200 = arith.constant 15 : index
    %c0_201 = arith.constant 0 : index
    %314 = vector.load %arg2[%c0_198, %c0_199, %c15_200, %c0_201] : memref<1x4x16x16xf32, #tpu.memory_space<vmem>>, vector<1x4x1x16xf32>
    %315 = vector.shape_cast %314 : vector<1x4x1x16xf32> to vector<4x16xf32>
    %cst_202 = arith.constant dense<0.000000e+00> : vector<32x16xf32>
    %316 = tpu.matmul %12, %315, %cst_202 {dimension_numbers = #tpu.dot_dimension_numbers<[1], [0], [0], [1], [0, 0, 1, 1], [], []>} : vector<32x4xf32>, vector<4x16xf32>, vector<32x16xf32> -> vector<32x16xf32>
    %317 = vector.extract_strided_slice %316 {offsets = [0, 0], sizes = [16, 16], strides = [1, 1]} : vector<32x16xf32> to vector<16x16xf32>
    %cst_203 = arith.constant dense<0.000000e+00> : vector<16x32xf32>
    %318 = tpu.matmul %317, %6, %cst_203 {dimension_numbers = #tpu.dot_dimension_numbers<[1], [0], [0], [1], [0, 0, 1, 1], [], []>} : vector<16x16xf32>, vector<16x32xf32>, vector<16x32xf32> -> vector<16x32xf32>
    %319 = vector.extract_strided_slice %316 {offsets = [16, 0], sizes = [16, 16], strides = [1, 1]} : vector<32x16xf32> to vector<16x16xf32>
    %cst_204 = arith.constant dense<0.000000e+00> : vector<16x32xf32>
    %320 = tpu.matmul %319, %11, %cst_204 {dimension_numbers = #tpu.dot_dimension_numbers<[1], [0], [0], [1], [0, 0, 1, 1], [], []>} : vector<16x16xf32>, vector<16x32xf32>, vector<16x32xf32> -> vector<16x32xf32>
    %321 = arith.addf %318, %320 : vector<16x32xf32>
    %322 = vector.extract_strided_slice %321 {offsets = [0, 0], sizes = [8, 32], strides = [1, 1]} : vector<16x32xf32> to vector<8x32xf32>
    %323 = vector.broadcast %13 : vector<8x1xf32> to vector<8x32xf32>
    %324 = arith.addf %322, %323 : vector<8x32xf32>
    %c0_205 = arith.constant 0 : index
    %c0_206 = arith.constant 0 : index
    %c30 = arith.constant 30 : index
    %c0_207 = arith.constant 0 : index
    %325 = vector.load %arg5[%c0_205, %c0_206, %c30, %c0_207] : memref<1x8x32x32xf32, #tpu.memory_space<vmem>>, vector<1x8x1x32xf32>
    %326 = vector.shape_cast %325 : vector<1x8x1x32xf32> to vector<8x32xf32>
    %327 = vector.shape_cast %324 : vector<8x32xf32> to vector<1x8x1x32xf32>
    tpu.vector_store %arg5[%c0_205, %c0_206, %c30, %c0_207], %327 {strides = array<i32>} : memref<1x8x32x32xf32, #tpu.memory_space<vmem>>, vector<1x8x1x32xf32>,
    %328 = vector.extract_strided_slice %321 {offsets = [8, 0], sizes = [8, 32], strides = [1, 1]} : vector<16x32xf32> to vector<8x32xf32>
    %329 = vector.broadcast %13 : vector<8x1xf32> to vector<8x32xf32>
    %330 = arith.addf %328, %329 : vector<8x32xf32>
    %c0_208 = arith.constant 0 : index
    %c0_209 = arith.constant 0 : index
    %c31 = arith.constant 31 : index
    %c0_210 = arith.constant 0 : index
    %331 = vector.load %arg5[%c0_208, %c0_209, %c31, %c0_210] : memref<1x8x32x32xf32, #tpu.memory_space<vmem>>, vector<1x8x1x32xf32>
    %332 = vector.shape_cast %331 : vector<1x8x1x32xf32> to vector<8x32xf32>
    %333 = vector.shape_cast %330 : vector<8x32xf32> to vector<1x8x1x32xf32>
    tpu.vector_store %arg5[%c0_208, %c0_209, %c31, %c0_210], %333 {strides = array<i32>} : memref<1x8x32x32xf32, #tpu.memory_space<vmem>>, vector<1x8x1x32xf32>,
    return
  }
  func.func @transform_0(%arg0: i32, %arg1: i32) -> (i32, i32, i32, i32) {
    %c0_i32 = arith.constant 0 : i32
    %c0_i32_0 = arith.constant 0 : i32
    %c0_i32_1 = arith.constant 0 : i32
    return %arg0, %c0_i32, %arg1, %c0_i32_0 : i32, i32, i32, i32
  }
  func.func @transform_1(%arg0: i32, %arg1: i32) -> (i32, i32) {
    %c0_i32 = arith.constant 0 : i32
    %c0_i32_0 = arith.constant 0 : i32
    %c0_i32_1 = arith.constant 0 : i32
    return %c0_i32, %c0_i32_0 : i32, i32
  }
  func.func @transform_2(%arg0: i32, %arg1: i32) -> (i32, i32) {
    %c0_i32 = arith.constant 0 : i32
    %c0_i32_0 = arith.constant 0 : i32
    %c0_i32_1 = arith.constant 0 : i32
    return %c0_i32, %c0_i32_0 : i32, i32
  }
  func.func @transform_3(%arg0: i32, %arg1: i32) -> (i32, i32, i32, i32) {
    %c0_i32 = arith.constant 0 : i32
    %c0_i32_0 = arith.constant 0 : i32
    %c0_i32_1 = arith.constant 0 : i32
    return %arg0, %c0_i32, %arg1, %c0_i32_0 : i32, i32, i32, i32
  }
}

</mosaic_0001>

<bundles_post_ra>
// kernel: deconv_block.1
= control target key start
LH: loop header
LB: loop body
LE: loop exit
PB: predicated region body
PF: predicated region fallthrough
CT: control target
= control target key end

     0   :  { %8 = vsyncpa [#allocation3], 0  ;;  %s4473_s0 = inlined_call_operand.hbm [shape: f32[2,4,16,16], index: 0, kind: input, shape index: {}]   ;;  %s4474_s1 = inlined_call_operand.vmem [shape: f32[32,4], index: 1, kind: input, shape index: {}]   ;;  %s4475_s2 = inlined_call_operand.vmem [shape: f32[8,1], index: 2, kind: input, shape index: {}]   ;;  %s4476_s3 = inlined_call_operand.hbm [shape: f32[2,8,32,32], index: 3, kind: output, shape index: {}]  }
   0x1   :  { %10 = vsyncpa [#allocation3 + $0x1], 0 }
   0x2   :  { %11 = vsyncpa [#allocation4], 0 }
   0x3   :  { %13 = vsyncpa [#allocation4 + $0x1], 0  ;;  %s3220_s12 = smov 0   ;;  %s3222_s13 = smov 0  }
   0x4   :  { %s3224_s14 = smov 0   ;;  %s3226_s15 = smov 0  }
   0x5   :  { %s3228_s16 = smov 0   ;;  %s3230_s17 = smov 0  }
   0x6 LB: > { %s2782_s18 = sadd.s32 4294967295, %s3192_s17   ;;  %s2783_s19 = sadd.s32 4294967294, %s3192_s17   ;;  %s3192_s17 = sphi %s3230_s17, %s19_s17   ;;  %s3188_s16 = sphi %s3228_s16, %s4493_s16   ;;  %s3184_s15 = sphi %s3226_s15, %s4492_s15   ;;  %s3180_s14 = sphi %s3224_s14, %s4491_s14   ;;  %s3176_s13 = sphi %s3222_s13, %s4490_s13   ;;  %s3172_s12 = sphi %s3220_s12, %s4489_s12  }
   0x7   : > { %s31_s20 = sadd.s32 1, %s3188_s16  ;;  %s40_s21 = sadd.s32 1, %s3180_s14 }
   0x8   : > { %p33_p0 = scmp.ge.s32.totalorder %s31_s20, 2  ;;  %p47_p1 = scmp.ne.s32.totalorder %s3180_s14, %s3176_s13 }
   0x9   : > { %p48_p2 = scmp.eq.s32.totalorder %s3192_s17, 0  ;;  %p53_p3 = scmp.ne.s32.totalorder %s3176_s13, %s3172_s12 }
   0xa   : > { %s4495_s20 = smov (%p33_p0, %s31_s20), 0  ;;  %p54_p5 = scmp.eq.s32.totalorder %s2782_s18, 0 }
   0xb   : > { %p3261_p4 = por %p48_p2, %p47_p1  ;;  %s35_s23 = ssub.s32 %s3188_s16, %s4495_s20 }
   0xc   : > { %p121_p6 = scmp.eq.s32.totalorder %s2782_s18, 1  ;;  %p38_p7 = scmp.eq.s32.totalorder %s35_s23, 0 }
   0xd   : > { %p3267_p8 = por %p54_p5, %p53_p3  ;;  %p127_p10 = scmp.eq.s32.totalorder %s2783_s19, 1 }
   0xe   : > { %p3271_p9 = por %p121_p6, %p47_p1  ;;  %p2785_p12 = scmp.ge.s32.totalorder %s3192_s17, 2 }
   0xf   : > { %s3276_s26 = scalar_select %p38_p7, %s3180_s14, %s40_s21  }
  0x10   : > { %p3278_p11 = por %p127_p10, %p53_p3  ;;  %p3023_p13 = scmp.lt.s32.totalorder %s3192_s17, 2 }
  0x11   : > { %s153_s28 = sand.u32 1, %s3180_s14   ;;  %s3009_s30 = sshll.u32 %s3188_s16, 6 }
  0x12   : > { %s2786_s29 = sshll.u32 %s153_s28, 6  ;;  %s164_s6 = scalar_lea.hbm %s4473_s0, %s3009_s30 }
  0x13   : > { %s157_s7 = scalar_lea.vmem [#allocation2], %s2786_s29  ;;  %s165_s9 = sshll.u32 %s164_s6, 4  ;;  %s166_s9 = int_to_ptr.hbm [resolvable:$true] %s165_s9 }
  0x14   : > { %s167_s8 = sshll.u32 %s157_s7, 4  ;;  %p3016_p0 = pnand %p3023_p13, %p3261_p4  ;;  %s168_s8 = int_to_ptr.vmem [resolvable:$true] %s167_s8 }
  0x15   : > { %p2789_p1 = scmp.ge.s32.totalorder %s3192_s17, 1  ;;  %s154_s10 = scalar_lea.sflag [#allocation3], %s153_s28 }
  0x16   : > { %s3194_s11 = smov 128   ;;  %s3195_s18 = smov 8  }
  0x17   : > { %3018 = dma.hbm_to_vmem [thread:$0]  (!%p3016_p0), %s166_s9, 1024, %s168_s8, %s154_s10, %s3194_s11, %s3194_s11, %s3195_s18  }
  0x18   : > { %p175_p2 = scmp.lt.s32.totalorder %s3192_s17, 3 }
  0x1a   : > { %p176_p3 = pnand %p2789_p1, %p175_p2 }
  0x1b   : > { %s3294_s19 = sand.u32 (!%p176_p3), 1, %s3176_s13  }
  0x1c   : > { %179 = sbr.rel (%p176_p3) target bundleno = 696 (0x2b8), region = 32  ;;  %s2790_s21 = sshll.u32 (!%p176_p3), %s3294_s19, 6 }
  0x1d   : > { %s182_s23 = scalar_lea.sflag (!%p176_p3), [#allocation3], %s3294_s19  ;;  %s3298_s29 = scalar_lea.vmem (!%p176_p3), [#allocation2], %s2790_s21 }
  0x21   : > { %3163 = dma.done.wait (%p3267_p8), %s182_s23, 1024  }
  0x22   : > { %3165 = vsyncadd (%p3267_p8), %s182_s23, 4294966272  ;;  %vm246_vm0 = vcmask 1041409   ;;  %vm249_vm1 = vcmask 1042434   ;;  %v237_v0 = vld [vmem:[%s3298_s29] sm:$0x1]  ;;  %vm252_vm2 = vcmask 1043459   ;;  %v211_v9 = vlaneseq }
  0x23   : > { %v238_v1 = vld [vmem:[%s3298_s29 + $0x10] sm:$0x1]  ;;  %v239_v2 = vld [vmem:[%s3298_s29 + $0x20] sm:$0x1]  ;;  %vm267_vm3 = vcmask 1043456   ;;  %vm254_vm4 = vcmask 31744  }
  0x24   : > { %v240_v3 = vld [vmem:[%s3298_s29 + $0x30] sm:$0x1]  ;;  %v245_v4 = vrot.slane %v238_v1, 7  ;;  %v248_v5 = vrot.slane %v239_v2, 6  ;;  %v412_v7 = vld [vmem:[%s3298_s29 + $0x1] sm:$0x1] }
  0x25   : > { %v251_v6 = vrot.slane %v240_v3, 5  ;;  %v413_v8 = vld [vmem:[%s3298_s29 + $0x11] sm:$0x1]  ;;  %v3314_v11 = vld [vmem:[%s4474_s1] sm:$0xff]  ;;  %v564_v19 = vld [vmem:[%s3298_s29 + $0x12] sm:$0x1] }
  0x26   : > { %v247_v10 = vsel %vm246_vm0, %v245_v4, %v237_v0  ;;  %v414_v12 = vld [vmem:[%s3298_s29 + $0x21] sm:$0x1]  ;;  %v415_v13 = vld [vmem:[%s3298_s29 + $0x31] sm:$0x1]  ;;  %v420_v14 = vrot.slane %v413_v8, 7  ;;  %v571_v24 = vrot.slane %v564_v19, 7 }
  0x27   : > { %v250_v15 = vsel %vm249_vm1, %v248_v5, %v247_v10  ;;  %v422_v16 = vrot.slane %v414_v12, 6  ;;  %v424_v17 = vrot.slane %v415_v13, 5  ;;  %v563_v18 = vld [vmem:[%s3298_s29 + $0x2] sm:$0x1]  ;;  %v566_v23 = vld [vmem:[%s3298_s29 + $0x32] sm:$0x1] }
  0x28   : > { %v253_v20 = vsel %vm252_vm2, %v251_v6, %v250_v15  ;;  %v421_v21 = vsel %vm246_vm0, %v420_v14, %v412_v7  ;;  %v565_v22 = vld [vmem:[%s3298_s29 + $0x22] sm:$0x1]  ;;  %v575_v27 = vrot.slane %v566_v23, 5  ;;  %v214_v28 = vshrl.u32 %v211_v9, 7  ;;  %v3340_v36 = vld [vmem:[%s4474_s1 + $0x8] sm:$0xff]  ;;  %v3356_v39 = vld [vmem:[%s4474_s1 + $0x10] sm:$0xff] }
  0x29   : > { %2796 = vmatpush.msk.msra.mxu0 %vm267_vm3, %v253_v20  ;;  %v423_v25 = vsel %vm249_vm1, %v422_v16, %v421_v21  ;;  %v573_v26 = vrot.slane %v565_v22, 6  ;;  %v572_v30 = vsel %vm246_vm0, %v571_v24, %v563_v18  ;;  %v212_v32 = vand.u32 127, %v211_v9  ;;  %v3365_v40 = vld [vmem:[%s4474_s1 + $0x18] sm:$0xff]  ;;  %v715_v47 = vld [vmem:[%s3298_s29 + $0x13] sm:$0x1]  ;;  %v236_v0 = vld [vmem:[%s4475_s2] sm:$0xff] }
  0x2a   : > { %2797 = vmatmul.msk.f32.vlgmr.msra.gmra.mxu0 %vm254_vm4, %v3314_v11  ;;  %v425_v29 = vsel %vm252_vm2, %v424_v17, %v423_v25  ;;  %v215_v33 = vadd.s32 8, %v214_v28  ;;  %v3196_v38 = vmov 1.0   ;;  %v216_v41 = vmul.u32 2, %v214_v28  ;;  %v865_v48 = vld [vmem:[%s3298_s29 + $0x4] sm:$0x1]  ;;  %s2791_s10 = sshll.u32 %s3294_s19, 8 }
  0x2b   : > { %2809 = vmatpush.msk.msra.mxu3 %vm267_vm3, %v425_v29  ;;  %v574_v31 = vsel %vm249_vm1, %v573_v26, %v572_v30  ;;  %v866_v49 = vld [vmem:[%s3298_s29 + $0x14] sm:$0x1]  ;;  %v867_v50 = vld [vmem:[%s3298_s29 + $0x24] sm:$0x1]  ;;  %v716_v54 = vld [vmem:[%s3298_s29 + $0x23] sm:$0x1] }
  0x2c   : > { %2810 = vmatmul.msk.f32.vlgmr.msra.gmra.mxu3 %vm254_vm4, %v3314_v11  ;;  %v576_v34 = vsel %vm252_vm2, %v575_v27, %v574_v31  ;;  %v217_v35 = vmul.u32 2, %v215_v33  ;;  %vm3379_vm6 = vcmp.eq.s32.totalorder %v212_v32, %v216_v41  ;;  %v224_v45 = vadd.s32 1, %v216_v41  ;;  %v868_v51 = vld [vmem:[%s3298_s29 + $0x34] sm:$0x1]  ;;  %v714_v57 = vld [vmem:[%s3298_s29 + $0x3] sm:$0x1] }
  0x2d   : > { %2822 = vmatpush.msk.msrb.mxu0 %vm267_vm3, %v576_v34  ;;  %v873_v52 = vrot.slane %v866_v49, 7  ;;  %v875_v53 = vrot.slane %v867_v50, 6  ;;  %v722_v55 = vrot.slane %v715_v47, 7  ;;  %v877_v56 = vrot.slane %v868_v51, 5  ;;  %v717_v60 = vld [vmem:[%s3298_s29 + $0x33] sm:$0x1] }
  0x2e   : > { %vm3342_vm5 = vcmp.eq.s32.totalorder %v212_v32, %v217_v35  ;;  %v225_v43 = vadd.s32 1, %v217_v35  ;;  %vm3402_vm8 = vcmp.eq.s32.totalorder %v212_v32, %v224_v45  ;;  %v724_v61 = vrot.slane %v716_v54, 6  ;;  %v1017_v6 = vld [vmem:[%s3298_s29 + $0x15] sm:$0x1]  ;;  %v1018_v7 = vld [vmem:[%s3298_s29 + $0x25] sm:$0x1] }
  0x2f   : > { %2805 = vmatpush.msk.msra.mxu2 %vm3342_vm5, %v3196_v38  ;;  %v874_v58 = vsel %vm246_vm0, %v873_v52, %v865_v48  ;;  %v723_v63 = vsel %vm246_vm0, %v722_v55, %v714_v57  ;;  %v3197_v1 = vmov 0   ;;  %v726_v2 = vrot.slane %v717_v60, 5  ;;  %v1016_v9 = vld [vmem:[%s3298_s29 + $0x5] sm:$0x1]  ;;  %v1019_v13 = vld [vmem:[%s3298_s29 + $0x35] sm:$0x1] }
  0x30   : > { %vm3392_vm7 = vcmp.eq.s32.totalorder %v212_v32, %v225_v43  ;;  %v876_v59 = vsel %vm249_vm1, %v875_v53, %v874_v58  ;;  %3079 = vset.pattern.permute.xlu0 %v3197_v1  ;;  %v725_v3 = vsel %vm249_vm1, %v724_v61, %v723_v63  ;;  %vm299_vm9 = vcmask 130048   ;;  %v1167_v20 = vld [vmem:[%s3298_s29 + $0x6] sm:$0x1]  ;;  %v1168_v21 = vld [vmem:[%s3298_s29 + $0x16] sm:$0x1]  ;;  %s3621_s11 = scalar_lea.vmem [#allocation5], %s2791_s10 }
  0x31   : > { %2806 = vmatpush.msk.msra.mxu2 %vm3379_vm6, %v3196_v38  ;;  %2801 = vmatpush.msk.msra.mxu1 %vm3392_vm7, %v3196_v38  ;;  %v878_v62 = vsel %vm252_vm2, %v877_v56, %v876_v59  ;;  %v727_v4 = vsel %vm252_vm2, %v726_v2, %v725_v3  ;;  %v1024_v8 = vrot.slane %v1017_v6, 7  ;;  %v1026_v14 = vrot.slane %v1018_v7, 6  ;;  %v1169_v22 = vld [vmem:[%s3298_s29 + $0x26] sm:$0x1]  ;;  %v1170_v24 = vld [vmem:[%s3298_s29 + $0x36] sm:$0x1] }
  0x32   : > { %2798 = vmatmul.msk.f32.gmra.mxu0 %vm254_vm4, %v3340_v36  ;;  %2827 = vmatpush.msk.msrb.mxu3 %vm3392_vm7, %v3196_v38  ;;  %v1028_v16 = vrot.slane %v1019_v13, 5  ;;  %v1175_v25 = vrot.slane %v1168_v21, 7  ;;  %v1177_v26 = vrot.slane %v1169_v22, 6  ;;  %v1179_v27 = vrot.slane %v1170_v24, 5  ;;  %v1318_v33 = vld [vmem:[%s3298_s29 + $0x7] sm:$0x1] }
  0x33   : > { %2818 = vmatpush.msk.msrb.mxu2 %vm3342_vm5, %v3196_v38  ;;  %2802 = vmatpush.msk.msra.mxu1 %vm3402_vm8, %v3196_v38  ;;  %v1025_v15 = vsel %vm246_vm0, %v1024_v8, %v1016_v9  ;;  %v1319_v34 = vld [vmem:[%s3298_s29 + $0x17] sm:$0x1]  ;;  %v1320_v35 = vld [vmem:[%s3298_s29 + $0x27] sm:$0x1]  ;;  %v1469_v52 = vld [vmem:[%s3298_s29 + $0x8] sm:$0x1] }
  0x34   : > { %2811 = vmatmul.msk.f32.gmra.mxu3 %vm254_vm4, %v3340_v36  ;;  %2848 = vmatpush.msk.msra.mxu0 %vm267_vm3, %v878_v62  ;;  %v1027_v17 = vsel %vm249_vm1, %v1026_v14, %v1025_v15  ;;  %v1176_v28 = vsel %vm246_vm0, %v1175_v25, %v1167_v20  ;;  %v1321_v41 = vld [vmem:[%s3298_s29 + $0x37] sm:$0x1]  ;;  %v1326_v43 = vrot.slane %v1319_v34, 7  ;;  %v1328_v45 = vrot.slane %v1320_v35, 6  ;;  %v1470_v53 = vld [vmem:[%s3298_s29 + $0x18] sm:$0x1] }
  0x35   : > { %2819 = vmatpush.msk.msrb.mxu2 %vm3379_vm6, %v3196_v38  ;;  %2828 = vmatpush.msk.msrb.mxu3 %vm3402_vm8, %v3196_v38  ;;  %v1029_v18 = vsel %vm252_vm2, %v1028_v16, %v1027_v17  ;;  %v1178_v29 = vsel %vm249_vm1, %v1177_v26, %v1176_v28  ;;  %v1330_v47 = vrot.slane %v1321_v41, 5  ;;  %v1471_v54 = vld [vmem:[%s3298_s29 + $0x28] sm:$0x1]  ;;  %v1472_v55 = vld [vmem:[%s3298_s29 + $0x38] sm:$0x1]  ;;  %v1477_v56 = vrot.slane %v1470_v53, 7 }
  0x36   : > { %2814 = vmatpush.msk.msrb.mxu1 %vm3392_vm7, %v3196_v38  ;;  %360 = vperm.xlu0 %3079, %v236_v0   ;;  %v1180_v30 = vsel %vm252_vm2, %v1179_v27, %v1178_v29  ;;  %v1327_v48 = vsel %vm246_vm0, %v1326_v43, %v1318_v33  ;;  %v1479_v57 = vrot.slane %v1471_v54, 6  ;;  %v1481_v58 = vrot.slane %v1472_v55, 5  ;;  %v1620_v62 = vld [vmem:[%s3298_s29 + $0x9] sm:$0x1]  ;;  %v1621_v63 = vld [vmem:[%s3298_s29 + $0x19] sm:$0x1] }
  0x37   : > { %2840 = vmatpush.msk.msra.mxu3 %vm3392_vm7, %v3196_v38  ;;  %v1329_v49 = vsel %vm249_vm1, %v1328_v45, %v1327_v48  ;;  %v1478_v59 = vsel %vm246_vm0, %v1477_v56, %v1469_v52  ;;  %v1622_v0 = vld [vmem:[%s3298_s29 + $0x29] sm:$0x1]  ;;  %v1623_v1 = vld [vmem:[%s3298_s29 + $0x39] sm:$0x1]  ;;  %v1628_v2 = vrot.slane %v1621_v63, 7  ;;  %vm379_vm10 = vcmask 253952  }
  0x38   : > { %2815 = vmatpush.msk.msrb.mxu1 %vm3402_vm8, %v3196_v38  ;;  %v1331_v51 = vsel %vm252_vm2, %v1330_v47, %v1329_v49  ;;  %v1480_v60 = vsel %vm249_vm1, %v1479_v57, %v1478_v59  ;;  %v1630_v3 = vrot.slane %v1622_v0, 6  ;;  %v1771_v8 = vld [vmem:[%s3298_s29 + $0xa] sm:$0x1]  ;;  %v1772_v9 = vld [vmem:[%s3298_s29 + $0x1a] sm:$0x1]  ;;  %s3010_s18 = sshll.u32 %s3184_s15, 8 }
  0x39   : > { %2841 = vmatpush.msk.msra.mxu3 %vm3402_vm8, %v3196_v38  ;;  %v1482_v61 = vsel %vm252_vm2, %v1481_v58, %v1480_v60  ;;  %v1779_v13 = vrot.slane %v1772_v9, 7  ;;  %v1922_v20 = vld [vmem:[%s3298_s29 + $0xb] sm:$0x1]  ;;  %v1923_v21 = vld [vmem:[%s3298_s29 + $0x1b] sm:$0x1]  ;;  %s2692_s15 = sshll.u32 %s3621_s11, 4  ;;  %s2693_s15 = int_to_ptr.vmem [resolvable:$true] %s2692_s15 }
  0x3a   : > { %2799 = vmatmul.msk.f32.gmra.mxu0 %vm254_vm4, %v3356_v39  ;;  %v1924_v22 = vld [vmem:[%s3298_s29 + $0x2b] sm:$0x1]  ;;  %v1930_v24 = vrot.slane %v1923_v21, 7  ;;  %v2073_v33 = vld [vmem:[%s3298_s29 + $0xc] sm:$0x1]  ;;  %s2678_s24 = scalar_lea.sflag [#allocation4], %s3294_s19 }
  0x3b   : > { %v1780_v16 = vsel %vm246_vm0, %v1779_v13, %v1771_v8  ;;  %v1932_v25 = vrot.slane %v1924_v22, 6  ;;  %v2074_v34 = vld [vmem:[%s3298_s29 + $0x1c] sm:$0x1]  ;;  %v2075_v35 = vld [vmem:[%s3298_s29 + $0x2c] sm:$0x1]  ;;  %s3130_s6 = scalar_lea.hbm %s4476_s3, 512 }
  0x3c   : > { %2812 = vmatmul.msk.f32.gmra.mxu3 %vm254_vm4, %v3356_v39  ;;  %v1931_v27 = vsel %vm246_vm0, %v1930_v24, %v1922_v20  ;;  %v2076_v43 = vld [vmem:[%s3298_s29 + $0x3c] sm:$0x1]  ;;  %v2081_v45 = vrot.slane %v2074_v34, 7  ;;  %v2083_v47 = vrot.slane %v2075_v35, 6  ;;  %v2224_v52 = vld [vmem:[%s3298_s29 + $0xd] sm:$0x1] }
  0x3d   : > { %v1933_v29 = vsel %vm249_vm1, %v1932_v25, %v1931_v27  ;;  %v2085_v48 = vrot.slane %v2076_v43, 5  ;;  %v2225_v53 = vld [vmem:[%s3298_s29 + $0x1d] sm:$0x1]  ;;  %v2226_v54 = vld [vmem:[%s3298_s29 + $0x2d] sm:$0x1] }
  0x3e   : > { %v2082_v49 = vsel %vm246_vm0, %v2081_v45, %v2073_v33  ;;  %v2227_v56 = vld [vmem:[%s3298_s29 + $0x3d] sm:$0x1]  ;;  %v2232_v57 = vrot.slane %v2225_v53, 7  ;;  %v2234_v58 = vrot.slane %v2226_v54, 6  ;;  %v2376_v13 = vld [vmem:[%s3298_s29 + $0x1e] sm:$0x1] }
  0x3f   : > { %v2236_v59 = vrot.slane %v2227_v56, 5  ;;  %v2526_v45 = vld [vmem:[%s3298_s29 + $0xf] sm:$0x1] }
  0x42   : > { %2800 = vmatmul.msk.f32.gmra.mxu0 %vm254_vm4, %v3365_v40 }
  0x44   : > { %2813 = vmatmul.msk.f32.gmra.mxu3 %vm254_vm4, %v3365_v40 }
  0x4a   : > { %2823 = vmatmul.msk.f32.vlgmr.msrb.gmra.mxu0 %vm254_vm4, %v3314_v11 }
  0x4b   : > { %2874 = vmatpush.msk.msrb.mxu0 %vm267_vm3, %v1180_v30 }
  0x52   : > { %2824 = vmatmul.msk.f32.gmra.mxu0 %vm254_vm4, %v3340_v36 }
  0x5a   : > { %2825 = vmatmul.msk.f32.gmra.mxu0 %vm254_vm4, %v3356_v39 }
  0x62   : > { %2826 = vmatmul.msk.f32.gmra.mxu0 %vm254_vm4, %v3365_v40 }
  0x6a   : > { %2849 = vmatmul.msk.f32.vlgmr.msra.gmra.mxu0 %vm254_vm4, %v3314_v11 }
  0x6b   : > { %2900 = vmatpush.msk.msra.mxu0 %vm267_vm3, %v1482_v61 }
  0x72   : > { %2850 = vmatmul.msk.f32.gmra.mxu0 %vm254_vm4, %v3340_v36 }
  0x7a   : > { %2851 = vmatmul.msk.f32.gmra.mxu0 %vm254_vm4, %v3356_v39 }
  0x82   : > { %2852 = vmatmul.msk.f32.gmra.mxu0 %vm254_vm4, %v3365_v40 }
  0x8a   : > { %2875 = vmatmul.msk.f32.vlgmr.msrb.gmra.mxu0 %vm254_vm4, %v3314_v11 }
  0x92   : > { %2876 = vmatmul.msk.f32.gmra.mxu0 %vm254_vm4, %v3340_v36 }
  0x9a   : > { %2877 = vmatmul.msk.f32.gmra.mxu0 %vm254_vm4, %v3356_v39 }
  0xa2   : > { %2878 = vmatmul.msk.f32.gmra.mxu0 %vm254_vm4, %v3365_v40 }
  0xa7   : > { %v287_v5 = vpop.f32.mrf.mxu0 }
  0xa8   : > { %2807 = vmatmul.msk.f32.vlgmr.msra.gmra.mxu2 %vm299_vm9, %v287_v5  ;;  %v1629_v5 = vsel %vm246_vm0, %v1628_v2, %v1620_v62  ;;  %v3610_v61 = vpop.permute.xlu0 %360  ;;  %v2233_v62 = vsel %vm246_vm0, %v2232_v57, %v2224_v52 }
  0xa9   : > { %2835 = vmatpush.msk.msra.mxu2 %vm267_vm3, %v727_v4  ;;  %v1632_v4 = vrot.slane %v1623_v1, 5  ;;  %v1631_v6 = vsel %vm249_vm1, %v1630_v3, %v1629_v5  ;;  %v2235_v0 = vsel %vm249_vm1, %v2234_v58, %v2233_v62 }
  0xaa   : > { %2901 = vmatmul.msk.f32.vlgmr.msra.gmra.mxu0 %vm254_vm4, %v3314_v11  ;;  %v2237_v1 = vsel %vm252_vm2, %v2236_v59, %v2235_v0 }
  0xab   : > { %v1633_v7 = vsel %vm252_vm2, %v1632_v4, %v1631_v6 }
  0xaf   : > { %v290_v10 = vpop.f32.mrf.mxu0  ;;  %v445_v12 = vpop.f32.mrf.mxu3 }
  0xb0   : > { %2808 = vmatmul.msk.f32.gmra.mxu2 %vm299_vm9, %v290_v10  ;;  %v1773_v10 = vld [vmem:[%s3298_s29 + $0x2a] sm:$0x1] }
  0xb1   : > { %v1781_v14 = vrot.slane %v1773_v10, 6 }
  0xb2   : > { %2902 = vmatmul.msk.f32.gmra.mxu0 %vm254_vm4, %v3340_v36 }
  0xb3   : > { %v1782_v17 = vsel %vm249_vm1, %v1781_v14, %v1780_v16  ;;  %v2378_v16 = vld [vmem:[%s3298_s29 + $0x3e] sm:$0x1] }
  0xb4   : > { %v2387_v21 = vrot.slane %v2378_v16, 5 }
  0xb7   : > { %v293_v19 = vpop.f32.mrf.mxu0  ;;  %v448_v23 = vpop.f32.mrf.mxu3 }
  0xb8   : > { %2803 = vmatmul.msk.f32.vlgmr.msra.gmra.mxu1 %vm299_vm9, %v293_v19  ;;  %2820 = vmatmul.msk.f32.vlgmr.msrb.gmra.mxu2 %vm299_vm9, %v445_v12  ;;  %v1774_v12 = vld [vmem:[%s3298_s29 + $0x3a] sm:$0x1] }
  0xb9   : > { %2861 = vmatpush.msk.msrb.mxu2 %vm267_vm3, %v1029_v18  ;;  %2831 = vmatpush.msk.msra.mxu1 %vm3342_vm5, %v3196_v38  ;;  %v1783_v15 = vrot.slane %v1774_v12, 5  ;;  %v2375_v12 = vld [vmem:[%s3298_s29 + $0xe] sm:$0x1] }
  0xba   : > { %2903 = vmatmul.msk.f32.gmra.mxu0 %vm254_vm4, %v3356_v39 }
  0xbb   : > { %2832 = vmatpush.msk.msra.mxu1 %vm3379_vm6, %v3196_v38  ;;  %v1784_v18 = vsel %vm252_vm2, %v1783_v15, %v1782_v17  ;;  %v2377_v15 = vld [vmem:[%s3298_s29 + $0x2e] sm:$0x1] }
  0xbc   : > { %2926 = vmatpush.msk.msrb.mxu0 %vm267_vm3, %v1784_v18  ;;  %v2385_v20 = vrot.slane %v2377_v15, 6 }
  0xbf   : > { %v296_v31 = vpop.f32.mrf.mxu0  ;;  %v451_v32 = vpop.f32.mrf.mxu3 }
  0xc0   : > { %2804 = vmatmul.msk.f32.gmra.mxu1 %vm299_vm9, %v296_v31  ;;  %2821 = vmatmul.msk.f32.gmra.mxu2 %vm299_vm9, %v448_v23  ;;  %v1925_v23 = vld [vmem:[%s3298_s29 + $0x3b] sm:$0x1] }
  0xc1   : > { %v1934_v26 = vrot.slane %v1925_v23, 5 }
  0xc2   : > { %2904 = vmatmul.msk.f32.gmra.mxu0 %vm254_vm4, %v3365_v40 }
  0xc3   : > { %v1935_v30 = vsel %vm252_vm2, %v1934_v26, %v1933_v29 }
  0xc7   : > { %v454_v50 = vpop.f32.mrf.mxu3  ;;  %v596_v19 = vpop.f32.mrf.mxu0 }
  0xc8   : > { %2816 = vmatmul.msk.f32.vlgmr.msrb.gmra.mxu1 %vm299_vm9, %v451_v32  ;;  %2836 = vmatmul.msk.f32.vlgmr.msra.gmra.mxu2 %vm254_vm4, %v3314_v11 }
  0xc9   : > { %2844 = vmatpush.msk.msrb.mxu1 %vm3342_vm5, %v3196_v38  ;;  %2887 = vmatpush.msk.msra.mxu2 %vm267_vm3, %v1331_v51 }
  0xca   : > { %2927 = vmatmul.msk.f32.vlgmr.msrb.gmra.mxu0 %vm254_vm4, %v3314_v11 }
  0xcb   : > { %2845 = vmatpush.msk.msrb.mxu1 %vm3379_vm6, %v3196_v38 }
  0xcf   : > { %v599_v28 = vpop.f32.mrf.mxu0 }
  0xd0   : > { %2817 = vmatmul.msk.f32.gmra.mxu1 %vm299_vm9, %v454_v50  ;;  %2837 = vmatmul.msk.f32.gmra.mxu2 %vm254_vm4, %v3340_v36  ;;  %v2084_v50 = vsel %vm249_vm1, %v2083_v47, %v2082_v49  ;;  %v2527_v47 = vld [vmem:[%s3298_s29 + $0x1f] sm:$0x1] }
  0xd1   : > { %v2086_v51 = vsel %vm252_vm2, %v2085_v48, %v2084_v50  ;;  %v2528_v48 = vld [vmem:[%s3298_s29 + $0x2f] sm:$0x1]  ;;  %v2529_v49 = vld [vmem:[%s3298_s29 + $0x3f] sm:$0x1]  ;;  %s2691_s29 = scalar_lea.hbm %s4476_s3, %s3010_s18 }
  0xd2   : > { %2928 = vmatmul.msk.f32.gmra.mxu0 %vm254_vm4, %v3340_v36  ;;  %v2536_v58 = vrot.slane %v2528_v48, 6  ;;  %v2538_v59 = vrot.slane %v2529_v49, 5  ;;  %s2694_s22 = sshll.u32 %s2691_s29, 4  ;;  %s2695_s22 = int_to_ptr.hbm [resolvable:$true] %s2694_s22 }
  0xd3   : > { %2952 = vmatpush.msk.msra.mxu0 %vm267_vm3, %v2086_v51  ;;  %s3124_s28 = sshra.s32 %s2695_s22, 4  ;;  %s3125_s28 = int_to_ptr.hbm [resolvable:$true] %s3124_s28 }
  0xd4   : > { %s3126_s30 = scalar_lea.hbm %s3125_s28, 256  ;;  %p3131_p7 = scmp.lt.s32.totalorder %s3125_s28, %s4476_s3 }
  0xd5   : > { %p3127_p4 = scmp.ne.s32.totalorder %s3125_s28, %s3126_s30  ;;  %p3132_p8 = scmp.lt.s32.totalorder %s3130_s6, %s3126_s30 }
  0xd7   : > { %v602_v31 = vpop.f32.mrf.mxu0  ;;  %p3128_p5 = pnand %p3127_p4, %p3271_p9  ;;  %p3133_p10 = por %p3132_p8, %p3131_p7 }
  0xd8   : > { %2838 = vmatmul.msk.f32.gmra.mxu2 %vm254_vm4, %v3356_v39  ;;  %2833 = vmatmul.msk.f32.vlgmr.msra.gmra.mxu1 %vm299_vm9, %v596_v19  ;;  %v2383_v19 = vrot.slane %v2376_v13, 7 }
  0xd9   : > { %2857 = vmatpush.msk.msra.mxu1 %vm3342_vm5, %v3196_v38  ;;  %2829 = vmatmul.msk.f32.vlgmr.msrb.gmra.mxu3 %vm299_vm9, %v602_v31  ;;  %p3129_p6 = pneg %p3128_p5 }
  0xda   : > { %2929 = vmatmul.msk.f32.gmra.mxu0 %vm254_vm4, %v3356_v39  ;;  %2853 = vmatpush.msk.msrb.mxu3 %vm3392_vm7, %v3196_v38  ;;  %v2384_v23 = vsel %vm246_vm0, %v2383_v19, %v2375_v12 }
  0xdb   : > { %2858 = vmatpush.msk.msra.mxu1 %vm3379_vm6, %v3196_v38  ;;  %v2386_v24 = vsel %vm249_vm1, %v2385_v20, %v2384_v23  ;;  %p3134_p13 = pnand %p3133_p10, %p3129_p6 }
  0xdc   : > { %2854 = vmatpush.msk.msrb.mxu3 %vm3402_vm8, %v3196_v38 }
  0xdf   : > { %v605_v32 = vpop.f32.mrf.mxu0 }
  0xe0   : > { %2839 = vmatmul.msk.f32.gmra.mxu2 %vm254_vm4, %v3365_v40  ;;  %2834 = vmatmul.msk.f32.gmra.mxu1 %vm299_vm9, %v599_v28 }
  0xe1   : > { %2830 = vmatmul.msk.f32.gmra.mxu3 %vm299_vm9, %v605_v32 }
  0xe2   : > { %2930 = vmatmul.msk.f32.gmra.mxu0 %vm254_vm4, %v3365_v40 }
  0xe7   : > { %v3625_v10 = vpop.f32.mrf.mxu0 }
  0xe8   : > { %2862 = vmatmul.msk.f32.vlgmr.msrb.gmra.mxu2 %vm254_vm4, %v3314_v11 }
  0xe9   : > { %2913 = vmatpush.msk.msrb.mxu2 %vm267_vm3, %v1633_v7 }
  0xea   : > { %2953 = vmatmul.msk.f32.vlgmr.msra.gmra.mxu0 %vm254_vm4, %v3314_v11 }
  0xef   : > { %v3655_v31 = vpop.f32.mrf.mxu0 }
  0xf0   : > { %2863 = vmatmul.msk.f32.gmra.mxu2 %vm254_vm4, %v3340_v36 }
  0xf2   : > { %2954 = vmatmul.msk.f32.gmra.mxu0 %vm254_vm4, %v3340_v36 }
  0xf7   : > { %v3683_v56 = vpop.f32.mrf.mxu0 }
  0xf8   : > { %2864 = vmatmul.msk.f32.gmra.mxu2 %vm254_vm4, %v3356_v39 }
  0xfa   : > { %2955 = vmatmul.msk.f32.gmra.mxu0 %vm254_vm4, %v3356_v39 }
  0xff   : > { %v907_v12 = vpop.f32.mrf.mxu0 }
 0x100   : > { %2865 = vmatmul.msk.f32.gmra.mxu2 %vm254_vm4, %v3365_v40 }
 0x102   : > { %2956 = vmatmul.msk.f32.gmra.mxu0 %vm254_vm4, %v3365_v40 }
 0x108   : > { %2888 = vmatmul.msk.f32.vlgmr.msra.gmra.mxu2 %vm254_vm4, %v3314_v11 }
 0x109   : > { %2939 = vmatpush.msk.msra.mxu2 %vm267_vm3, %v1935_v30  ;;  %v2388_v30 = vsel %vm252_vm2, %v2387_v21, %v2386_v24 }
 0x10a   : > { %2978 = vmatpush.msk.msrb.mxu0 %vm267_vm3, %v2388_v30 }
 0x10b   : > { %2979 = vmatmul.msk.f32.vlgmr.msrb.gmra.mxu0 %vm254_vm4, %v3314_v11 }
 0x110   : > { %2889 = vmatmul.msk.f32.gmra.mxu2 %vm254_vm4, %v3340_v36 }
 0x113   : > { %2980 = vmatmul.msk.f32.gmra.mxu0 %vm254_vm4, %v3340_v36 }
 0x118   : > { %2890 = vmatmul.msk.f32.gmra.mxu2 %vm254_vm4, %v3356_v39 }
 0x11b   : > { %2981 = vmatmul.msk.f32.gmra.mxu0 %vm254_vm4, %v3356_v39 }
 0x120   : > { %2891 = vmatmul.msk.f32.gmra.mxu2 %vm254_vm4, %v3365_v40 }
 0x123   : > { %2982 = vmatmul.msk.f32.gmra.mxu0 %vm254_vm4, %v3365_v40 }
 0x128   : > { %2914 = vmatmul.msk.f32.vlgmr.msrb.gmra.mxu2 %vm254_vm4, %v3314_v11 }
 0x129   : > { %2965 = vmatpush.msk.msrb.mxu2 %vm267_vm3, %v2237_v1 }
 0x12b   : > { %v352_v41 = vpop.f32.mrf.mxu2 }
 0x130   : > { %2915 = vmatmul.msk.f32.gmra.mxu2 %vm254_vm4, %v3340_v36 }
 0x133   : > { %v355_v55 = vpop.f32.mrf.mxu2 }
 0x135   : > { %v323_v60 = vpop.f32.mrf.mxu1 }
 0x136   : > { %v353_v63 = vadd.f32 %v352_v41, %v323_v60 }
 0x138   : > { %v363_v2 = vadd.f32 %v3610_v61, %v353_v63  ;;  %2916 = vmatmul.msk.f32.gmra.mxu2 %vm254_vm4, %v3356_v39 }
 0x13a   : > { %v365_v3 = vrot.slane %v363_v2, 1  ;;  %v366_v4 = vrot.slane %v363_v2, 2  ;;  %v367_v5 = vrot.slane %v363_v2, 3  ;;  %380 = vst.msk [vmem:[%s3621_s11] sm:$0x1] %vm379_vm10, %v363_v2  ;;  %v368_v6 = vrot.slane %v363_v2, 4 }
 0x13b   : > { %v369_v7 = vrot.slane %v363_v2, 5  ;;  %v370_v8 = vrot.slane %v363_v2, 6  ;;  %v509_v9 = vpop.f32.mrf.mxu2  ;;  %v371_v17 = vrot.slane %v363_v2, 7 }
 0x13c   : > { %381 = vst.msk [vmem:[%s3621_s11 + $0x20] sm:$0x1] %vm379_vm10, %v365_v3 }
 0x13d   : > { %382 = vst.msk [vmem:[%s3621_s11 + $0x40] sm:$0x1] %vm379_vm10, %v366_v4  ;;  %v326_v14 = vpop.f32.mrf.mxu1 }
 0x13e   : > { %383 = vst.msk [vmem:[%s3621_s11 + $0x60] sm:$0x1] %vm379_vm10, %v367_v5  ;;  %v356_v18 = vadd.f32 %v355_v55, %v326_v14  ;;  %v2534_v55 = vrot.slane %v2527_v47, 7 }
 0x13f   : > { %384 = vst.msk [vmem:[%s3621_s11 + $0x80] sm:$0x1] %vm379_vm10, %v368_v6 }
 0x140   : > { %385 = vst.msk [vmem:[%s3621_s11 + $0xa0] sm:$0x1] %vm379_vm10, %v369_v7  ;;  %v388_v22 = vadd.f32 %v3610_v61, %v356_v18  ;;  %2917 = vmatmul.msk.f32.gmra.mxu2 %vm254_vm4, %v3365_v40  ;;  %v2535_v63 = vsel %vm246_vm0, %v2534_v55, %v2526_v45 }
 0x141   : > { %386 = vst.msk [vmem:[%s3621_s11 + $0xc0] sm:$0x1] %vm379_vm10, %v370_v8  ;;  %v2537_v2 = vsel %vm249_vm1, %v2536_v58, %v2535_v63 }
 0x142   : > { %387 = vst.msk [vmem:[%s3621_s11 + $0xe0] sm:$0x1] %vm379_vm10, %v371_v17  ;;  %v390_v25 = vrot.slane %v388_v22, 1  ;;  %v391_v26 = vrot.slane %v388_v22, 2  ;;  %v392_v27 = vrot.slane %v388_v22, 3  ;;  %v393_v28 = vrot.slane %v388_v22, 4  ;;  %v1200_v17 = vpop.f32.mrf.mxu0 }
 0x143   : > { %404 = vst.msk [vmem:[%s3621_s11 + $0x1] sm:$0x1] %vm379_vm10, %v388_v22  ;;  %v512_v29 = vpop.f32.mrf.mxu2  ;;  %v394_v32 = vrot.slane %v388_v22, 5  ;;  %v395_v33 = vrot.slane %v388_v22, 6  ;;  %v396_v35 = vrot.slane %v388_v22, 7  ;;  %v2539_v3 = vsel %vm252_vm2, %v2538_v59, %v2537_v2 }
 0x144   : > { %405 = vst.msk [vmem:[%s3621_s11 + $0x21] sm:$0x1] %vm379_vm10, %v390_v25 }
 0x145   : > { %406 = vst.msk [vmem:[%s3621_s11 + $0x41] sm:$0x1] %vm379_vm10, %v391_v26  ;;  %v480_v34 = vpop.f32.mrf.mxu1 }
 0x146   : > { %407 = vst.msk [vmem:[%s3621_s11 + $0x61] sm:$0x1] %vm379_vm10, %v392_v27  ;;  %v510_v41 = vadd.f32 %v509_v9, %v480_v34 }
 0x147   : > { %408 = vst.msk [vmem:[%s3621_s11 + $0x81] sm:$0x1] %vm379_vm10, %v393_v28 }
 0x148   : > { %409 = vst.msk [vmem:[%s3621_s11 + $0xa1] sm:$0x1] %vm379_vm10, %v394_v32  ;;  %v515_v43 = vadd.f32 %v510_v41, %v3610_v61  ;;  %2940 = vmatmul.msk.f32.vlgmr.msra.gmra.mxu2 %vm254_vm4, %v3314_v11 }
 0x149   : > { %410 = vst.msk [vmem:[%s3621_s11 + $0xc1] sm:$0x1] %vm379_vm10, %v395_v33  ;;  %2991 = vmatpush.msk.msra.mxu2 %vm267_vm3, %v2539_v3 }
 0x14a   : > { %411 = vst.msk [vmem:[%s3621_s11 + $0xe1] sm:$0x1] %vm379_vm10, %v396_v35  ;;  %v517_v50 = vrot.slane %v515_v43, 1  ;;  %v518_v51 = vrot.slane %v515_v43, 2  ;;  %v519_v52 = vrot.slane %v515_v43, 3  ;;  %v520_v53 = vrot.slane %v515_v43, 4  ;;  %v1203_v18 = vpop.f32.mrf.mxu0 }
 0x14b   : > { %531 = vst.msk [vmem:[%s3621_s11 + $0x2] sm:$0x1] %vm379_vm10, %v515_v43  ;;  %v747_v54 = vpop.f32.mrf.mxu2  ;;  %v521_v57 = vrot.slane %v515_v43, 5  ;;  %v522_v60 = vrot.slane %v515_v43, 6  ;;  %v523_v0 = vrot.slane %v515_v43, 7 }
 0x14c   : > { %532 = vst.msk [vmem:[%s3621_s11 + $0x22] sm:$0x1] %vm379_vm10, %v517_v50  ;;  %2846 = vmatmul.msk.f32.vlgmr.msrb.gmra.mxu1 %vm299_vm9, %v747_v54 }
 0x14d   : > { %533 = vst.msk [vmem:[%s3621_s11 + $0x42] sm:$0x1] %vm379_vm10, %v518_v51  ;;  %v483_v62 = vpop.f32.mrf.mxu1  ;;  %2870 = vmatpush.msk.msrb.mxu1 %vm3342_vm5, %v3196_v38 }
 0x14e   : > { %534 = vst.msk [vmem:[%s3621_s11 + $0x62] sm:$0x1] %vm379_vm10, %v519_v52  ;;  %v513_v1 = vadd.f32 %v512_v29, %v483_v62 }
 0x14f   : > { %535 = vst.msk [vmem:[%s3621_s11 + $0x82] sm:$0x1] %vm379_vm10, %v520_v53  ;;  %2871 = vmatpush.msk.msrb.mxu1 %vm3379_vm6, %v3196_v38 }
 0x150   : > { %536 = vst.msk [vmem:[%s3621_s11 + $0xa2] sm:$0x1] %vm379_vm10, %v521_v57  ;;  %v539_v4 = vadd.f32 %v513_v1, %v3610_v61  ;;  %2941 = vmatmul.msk.f32.gmra.mxu2 %vm254_vm4, %v3340_v36 }
 0x151   : > { %537 = vst.msk [vmem:[%s3621_s11 + $0xc2] sm:$0x1] %vm379_vm10, %v522_v60 }
 0x152   : > { %538 = vst.msk [vmem:[%s3621_s11 + $0xe2] sm:$0x1] %vm379_vm10, %v523_v0  ;;  %v541_v5 = vrot.slane %v539_v4, 1  ;;  %v542_v6 = vrot.slane %v539_v4, 2  ;;  %v543_v7 = vrot.slane %v539_v4, 3  ;;  %v544_v8 = vrot.slane %v539_v4, 4  ;;  %v1206_v20 = vpop.f32.mrf.mxu0 }
 0x153   : > { %555 = vst.msk [vmem:[%s3621_s11 + $0x3] sm:$0x1] %vm379_vm10, %v539_v4  ;;  %v750_v9 = vpop.f32.mrf.mxu2  ;;  %v545_v13 = vrot.slane %v539_v4, 5  ;;  %v546_v14 = vrot.slane %v539_v4, 6  ;;  %v547_v15 = vrot.slane %v539_v4, 7 }
 0x154   : > { %556 = vst.msk [vmem:[%s3621_s11 + $0x23] sm:$0x1] %vm379_vm10, %v541_v5  ;;  %2847 = vmatmul.msk.f32.gmra.mxu1 %vm299_vm9, %v750_v9 }
 0x155   : > { %557 = vst.msk [vmem:[%s3621_s11 + $0x43] sm:$0x1] %vm379_vm10, %v542_v6  ;;  %v660_v29 = vpop.f32.mrf.mxu1 }
 0x156   : > { %558 = vst.msk [vmem:[%s3621_s11 + $0x63] sm:$0x1] %vm379_vm10, %v543_v7 }
 0x157   : > { %559 = vst.msk [vmem:[%s3621_s11 + $0x83] sm:$0x1] %vm379_vm10, %v544_v8 }
 0x158   : > { %560 = vst.msk [vmem:[%s3621_s11 + $0xa3] sm:$0x1] %vm379_vm10, %v545_v13  ;;  %2942 = vmatmul.msk.f32.gmra.mxu2 %vm254_vm4, %v3356_v39 }
 0x159   : > { %561 = vst.msk [vmem:[%s3621_s11 + $0xc3] sm:$0x1] %vm379_vm10, %v546_v14 }
 0x15a   : > { %562 = vst.msk [vmem:[%s3621_s11 + $0xe3] sm:$0x1] %vm379_vm10, %v547_v15  ;;  %v1209_v22 = vpop.f32.mrf.mxu0 }
 0x15b   : > { %v753_v16 = vpop.f32.mrf.mxu2 }
 0x15c   : > { %2842 = vmatmul.msk.f32.vlgmr.msra.gmra.mxu3 %vm299_vm9, %v753_v16  ;;  %2859 = vmatmul.msk.f32.vlgmr.msra.gmra.mxu1 %vm299_vm9, %v3625_v10 }
 0x15d   : > { %2866 = vmatpush.msk.msra.mxu3 %vm3392_vm7, %v3196_v38  ;;  %2883 = vmatpush.msk.msra.mxu1 %vm3342_vm5, %v3196_v38 }
 0x15f   : > { %2867 = vmatpush.msk.msra.mxu3 %vm3402_vm8, %v3196_v38  ;;  %2884 = vmatpush.msk.msra.mxu1 %vm3379_vm6, %v3196_v38 }
 0x160   : > { %2943 = vmatmul.msk.f32.gmra.mxu2 %vm254_vm4, %v3365_v40 }
 0x162   : > { %v1502_v24 = vpop.f32.mrf.mxu0 }
 0x163   : > { %v756_v10 = vpop.f32.mrf.mxu2 }
 0x164   : > { %2843 = vmatmul.msk.f32.gmra.mxu3 %vm299_vm9, %v756_v10  ;;  %2860 = vmatmul.msk.f32.gmra.mxu1 %vm299_vm9, %v3655_v31  ;;  %v631_v31 = vpop.f32.mrf.mxu3 }
 0x165   : > { %v661_v32 = vadd.f32 %v660_v29, %v631_v31 }
 0x168   : > { %2966 = vmatmul.msk.f32.vlgmr.msrb.gmra.mxu2 %vm254_vm4, %v3314_v11 }
 0x16a   : > { %v1505_v26 = vpop.f32.mrf.mxu0 }
 0x16b   : > { %v1049_v19 = vpop.f32.mrf.mxu2 }
 0x16c   : > { %2855 = vmatmul.msk.f32.vlgmr.msrb.gmra.mxu3 %vm299_vm9, %v3683_v56  ;;  %2872 = vmatmul.msk.f32.vlgmr.msrb.gmra.mxu1 %vm299_vm9, %v1049_v19  ;;  %v634_v50 = vpop.f32.mrf.mxu3 }
 0x16d   : > { %2879 = vmatpush.msk.msrb.mxu3 %vm3392_vm7, %v3196_v38  ;;  %2896 = vmatpush.msk.msrb.mxu1 %vm3342_vm5, %v3196_v38 }
 0x16f   : > { %2880 = vmatpush.msk.msrb.mxu3 %vm3402_vm8, %v3196_v38  ;;  %2897 = vmatpush.msk.msrb.mxu1 %vm3379_vm6, %v3196_v38 }
 0x170   : > { %2967 = vmatmul.msk.f32.gmra.mxu2 %vm254_vm4, %v3340_v36 }
 0x172   : > { %v1508_v28 = vpop.f32.mrf.mxu0 }
 0x173   : > { %v1052_v21 = vpop.f32.mrf.mxu2 }
 0x174   : > { %2856 = vmatmul.msk.f32.gmra.mxu3 %vm299_vm9, %v907_v12  ;;  %2873 = vmatmul.msk.f32.gmra.mxu1 %vm299_vm9, %v1052_v21 }
 0x178   : > { %2968 = vmatmul.msk.f32.gmra.mxu2 %vm254_vm4, %v3356_v39 }
 0x17a   : > { %v1511_v30 = vpop.f32.mrf.mxu0 }
 0x17b   : > { %v1055_v23 = vpop.f32.mrf.mxu2 }
 0x17c   : > { %2868 = vmatmul.msk.f32.vlgmr.msra.gmra.mxu3 %vm299_vm9, %v1055_v23  ;;  %2885 = vmatmul.msk.f32.vlgmr.msra.gmra.mxu1 %vm299_vm9, %v1200_v17 }
 0x17d   : > { %2892 = vmatpush.msk.msra.mxu3 %vm3392_vm7, %v3196_v38  ;;  %2909 = vmatpush.msk.msra.mxu1 %vm3342_vm5, %v3196_v38 }
 0x17f   : > { %2893 = vmatpush.msk.msra.mxu3 %vm3402_vm8, %v3196_v38  ;;  %2910 = vmatpush.msk.msra.mxu1 %vm3379_vm6, %v3196_v38 }
 0x180   : > { %2969 = vmatmul.msk.f32.gmra.mxu2 %vm254_vm4, %v3365_v40 }
 0x182   : > { %v1804_v49 = vpop.f32.mrf.mxu0 }
 0x183   : > { %v1058_v25 = vpop.f32.mrf.mxu2 }
 0x184   : > { %2869 = vmatmul.msk.f32.gmra.mxu3 %vm299_vm9, %v1058_v25  ;;  %2886 = vmatmul.msk.f32.gmra.mxu1 %vm299_vm9, %v1203_v18 }
 0x188   : > { %2992 = vmatmul.msk.f32.vlgmr.msra.gmra.mxu2 %vm254_vm4, %v3314_v11 }
 0x18a   : > { %v1807_v58 = vpop.f32.mrf.mxu0 }
 0x18b   : > { %v1351_v27 = vpop.f32.mrf.mxu2 }
 0x18c   : > { %2881 = vmatmul.msk.f32.vlgmr.msrb.gmra.mxu3 %vm299_vm9, %v1206_v20  ;;  %2898 = vmatmul.msk.f32.vlgmr.msrb.gmra.mxu1 %vm299_vm9, %v1351_v27 }
 0x18d   : > { %2905 = vmatpush.msk.msrb.mxu3 %vm3392_vm7, %v3196_v38  ;;  %2922 = vmatpush.msk.msrb.mxu1 %vm3342_vm5, %v3196_v38 }
 0x18f   : > { %2906 = vmatpush.msk.msrb.mxu3 %vm3402_vm8, %v3196_v38  ;;  %2923 = vmatpush.msk.msrb.mxu1 %vm3379_vm6, %v3196_v38 }
 0x190   : > { %2993 = vmatmul.msk.f32.gmra.mxu2 %vm254_vm4, %v3340_v36  ;;  %v666_v36 = vadd.f32 %v661_v32, %v3610_v61 }
 0x192   : > { %v669_v34 = vrot.slane %v666_v36, 2  ;;  %v670_v35 = vrot.slane %v666_v36, 3  ;;  %682 = vst.msk [vmem:[%s3621_s11 + $0x4] sm:$0x1] %vm379_vm10, %v666_v36  ;;  %v671_v41 = vrot.slane %v666_v36, 4  ;;  %v672_v43 = vrot.slane %v666_v36, 5  ;;  %v1810_v0 = vpop.f32.mrf.mxu0 }
 0x193   : > { %v1354_v11 = vpop.f32.mrf.mxu2  ;;  %v673_v45 = vrot.slane %v666_v36, 6  ;;  %v674_v47 = vrot.slane %v666_v36, 7 }
 0x194   : > { %2882 = vmatmul.msk.f32.gmra.mxu3 %vm299_vm9, %v1209_v22  ;;  %2899 = vmatmul.msk.f32.gmra.mxu1 %vm299_vm9, %v1354_v11  ;;  %684 = vst.msk [vmem:[%s3621_s11 + $0x44] sm:$0x1] %vm379_vm10, %v669_v34 }
 0x195   : > { %685 = vst.msk [vmem:[%s3621_s11 + $0x64] sm:$0x1] %vm379_vm10, %v670_v35 }
 0x196   : > { %686 = vst.msk [vmem:[%s3621_s11 + $0x84] sm:$0x1] %vm379_vm10, %v671_v41 }
 0x197   : > { %687 = vst.msk [vmem:[%s3621_s11 + $0xa4] sm:$0x1] %vm379_vm10, %v672_v43 }
 0x198   : > { %2994 = vmatmul.msk.f32.gmra.mxu2 %vm254_vm4, %v3356_v39  ;;  %v668_v39 = vrot.slane %v666_v36, 1  ;;  %688 = vst.msk [vmem:[%s3621_s11 + $0xc4] sm:$0x1] %vm379_vm10, %v673_v45 }
 0x199   : > { %689 = vst.msk [vmem:[%s3621_s11 + $0xe4] sm:$0x1] %vm379_vm10, %v674_v47 }
 0x19a   : > { %683 = vst.msk [vmem:[%s3621_s11 + $0x24] sm:$0x1] %vm379_vm10, %v668_v39  ;;  %v1813_v2 = vpop.f32.mrf.mxu0 }
 0x19b   : > { %v1357_v33 = vpop.f32.mrf.mxu2 }
 0x19c   : > { %2894 = vmatmul.msk.f32.vlgmr.msra.gmra.mxu3 %vm299_vm9, %v1357_v33  ;;  %2911 = vmatmul.msk.f32.vlgmr.msra.gmra.mxu1 %vm299_vm9, %v1502_v24 }
 0x19d   : > { %2918 = vmatpush.msk.msra.mxu3 %vm3392_vm7, %v3196_v38  ;;  %2935 = vmatpush.msk.msra.mxu1 %vm3342_vm5, %v3196_v38 }
 0x19f   : > { %2919 = vmatpush.msk.msra.mxu3 %vm3402_vm8, %v3196_v38  ;;  %2936 = vmatpush.msk.msra.mxu1 %vm3379_vm6, %v3196_v38 }
 0x1a0   : > { %2995 = vmatmul.msk.f32.gmra.mxu2 %vm254_vm4, %v3365_v40  ;;  %v663_v40 = vpop.f32.mrf.mxu1 }
 0x1a1   : > { %v664_v51 = vadd.f32 %v663_v40, %v634_v50 }
 0x1a2   : > { %v2106_v6 = vpop.f32.mrf.mxu0 }
 0x1a3   : > { %v1360_v48 = vpop.f32.mrf.mxu2  ;;  %v690_v52 = vadd.f32 %v664_v51, %v3610_v61 }
 0x1a4   : > { %2895 = vmatmul.msk.f32.gmra.mxu3 %vm299_vm9, %v1360_v48  ;;  %2912 = vmatmul.msk.f32.gmra.mxu1 %vm299_vm9, %v1505_v26 }
 0x1a5   : > { %v692_v54 = vrot.slane %v690_v52, 1  ;;  %v693_v55 = vrot.slane %v690_v52, 2  ;;  %v694_v56 = vrot.slane %v690_v52, 3  ;;  %706 = vst.msk [vmem:[%s3621_s11 + $0x5] sm:$0x1] %vm379_vm10, %v690_v52  ;;  %v695_v57 = vrot.slane %v690_v52, 4 }
 0x1a6   : > { %v696_v59 = vrot.slane %v690_v52, 5  ;;  %v697_v60 = vrot.slane %v690_v52, 6  ;;  %v698_v62 = vrot.slane %v690_v52, 7 }
 0x1a7   : > { %707 = vst.msk [vmem:[%s3621_s11 + $0x25] sm:$0x1] %vm379_vm10, %v692_v54 }
 0x1a8   : > { %708 = vst.msk [vmem:[%s3621_s11 + $0x45] sm:$0x1] %vm379_vm10, %v693_v55 }
 0x1a9   : > { %709 = vst.msk [vmem:[%s3621_s11 + $0x65] sm:$0x1] %vm379_vm10, %v694_v56 }
 0x1aa   : > { %710 = vst.msk [vmem:[%s3621_s11 + $0x85] sm:$0x1] %vm379_vm10, %v695_v57  ;;  %v2109_v9 = vpop.f32.mrf.mxu0 }
 0x1ab   : > { %v1653_v53 = vpop.f32.mrf.mxu2  ;;  %711 = vst.msk [vmem:[%s3621_s11 + $0xa5] sm:$0x1] %vm379_vm10, %v696_v59 }
 0x1ac   : > { %2907 = vmatmul.msk.f32.vlgmr.msrb.gmra.mxu3 %vm299_vm9, %v1508_v28  ;;  %2924 = vmatmul.msk.f32.vlgmr.msrb.gmra.mxu1 %vm299_vm9, %v1653_v53  ;;  %712 = vst.msk [vmem:[%s3621_s11 + $0xc5] sm:$0x1] %vm379_vm10, %v697_v60 }
 0x1ad   : > { %2931 = vmatpush.msk.msrb.mxu3 %vm3392_vm7, %v3196_v38  ;;  %2948 = vmatpush.msk.msrb.mxu1 %vm3342_vm5, %v3196_v38  ;;  %713 = vst.msk [vmem:[%s3621_s11 + $0xe5] sm:$0x1] %vm379_vm10, %v698_v62 }
 0x1af   : > { %2932 = vmatpush.msk.msrb.mxu3 %vm3402_vm8, %v3196_v38  ;;  %2949 = vmatpush.msk.msrb.mxu1 %vm3379_vm6, %v3196_v38 }
 0x1b2   : > { %v2112_v15 = vpop.f32.mrf.mxu0 }
 0x1b3   : > { %v1656_v63 = vpop.f32.mrf.mxu2 }
 0x1b4   : > { %2908 = vmatmul.msk.f32.gmra.mxu3 %vm299_vm9, %v1511_v30  ;;  %2925 = vmatmul.msk.f32.gmra.mxu1 %vm299_vm9, %v1656_v63 }
 0x1ba   : > { %v2115_v11 = vpop.f32.mrf.mxu0 }
 0x1bb   : > { %v1659_v1 = vpop.f32.mrf.mxu2 }
 0x1bc   : > { %2920 = vmatmul.msk.f32.vlgmr.msra.gmra.mxu3 %vm299_vm9, %v1659_v1  ;;  %2937 = vmatmul.msk.f32.vlgmr.msra.gmra.mxu1 %vm299_vm9, %v1804_v49 }
 0x1bd   : > { %2944 = vmatpush.msk.msra.mxu3 %vm3392_vm7, %v3196_v38  ;;  %2961 = vmatpush.msk.msra.mxu1 %vm3342_vm5, %v3196_v38 }
 0x1bf   : > { %2945 = vmatpush.msk.msra.mxu3 %vm3402_vm8, %v3196_v38  ;;  %2962 = vmatpush.msk.msra.mxu1 %vm3379_vm6, %v3196_v38 }
 0x1c2   : > { %v2408_v42 = vpop.f32.mrf.mxu0 }
 0x1c3   : > { %v1662_v3 = vpop.f32.mrf.mxu2 }
 0x1c4   : > { %2921 = vmatmul.msk.f32.gmra.mxu3 %vm299_vm9, %v1662_v3  ;;  %2938 = vmatmul.msk.f32.gmra.mxu1 %vm299_vm9, %v1807_v58 }
 0x1c9   : > { %v811_v4 = vpop.f32.mrf.mxu1 }
 0x1cb   : > { %v1955_v5 = vpop.f32.mrf.mxu2 }
 0x1cc   : > { %2933 = vmatmul.msk.f32.vlgmr.msrb.gmra.mxu3 %vm299_vm9, %v1810_v0  ;;  %2950 = vmatmul.msk.f32.vlgmr.msrb.gmra.mxu1 %vm299_vm9, %v1955_v5  ;;  %v2411_v0 = vpop.f32.mrf.mxu0 }
 0x1cd   : > { %2957 = vmatpush.msk.msrb.mxu3 %vm3392_vm7, %v3196_v38  ;;  %2974 = vmatpush.msk.msrb.mxu1 %vm3342_vm5, %v3196_v38 }
 0x1cf   : > { %2958 = vmatpush.msk.msrb.mxu3 %vm3402_vm8, %v3196_v38  ;;  %2975 = vmatpush.msk.msrb.mxu1 %vm3379_vm6, %v3196_v38 }
 0x1d1   : > { %v814_v7 = vpop.f32.mrf.mxu1 }
 0x1d3   : > { %v1958_v8 = vpop.f32.mrf.mxu2 }
 0x1d4   : > { %2934 = vmatmul.msk.f32.gmra.mxu3 %vm299_vm9, %v1813_v2  ;;  %2951 = vmatmul.msk.f32.gmra.mxu1 %vm299_vm9, %v1958_v8 }
 0x1d9   : > { %v962_v12 = vpop.f32.mrf.mxu1 }
 0x1db   : > { %v1961_v13 = vpop.f32.mrf.mxu2 }
 0x1dc   : > { %2946 = vmatmul.msk.f32.vlgmr.msra.gmra.mxu3 %vm299_vm9, %v1961_v13  ;;  %2963 = vmatmul.msk.f32.vlgmr.msra.gmra.mxu1 %vm299_vm9, %v2106_v6 }
 0x1dd   : > { %2970 = vmatpush.msk.msra.mxu3 %vm3392_vm7, %v3196_v38  ;;  %2987 = vmatpush.msk.msra.mxu1 %vm3342_vm5, %v3196_v38 }
 0x1df   : > { %v782_v14 = vpop.f32.mrf.mxu3  ;;  %2971 = vmatpush.msk.msra.mxu3 %vm3402_vm8, %v3196_v38  ;;  %2988 = vmatpush.msk.msra.mxu1 %vm3379_vm6, %v3196_v38 }
 0x1e0   : > { %v812_v16 = vadd.f32 %v811_v4, %v782_v14 }
 0x1e1   : > { %v3937_v17 = vpop.f32.mrf.mxu1 }
 0x1e2   : > { %v817_v10 = vadd.f32 %v812_v16, %v3610_v61 }
 0x1e3   : > { %v1964_v18 = vpop.f32.mrf.mxu2 }
 0x1e4   : > { %v819_v19 = vrot.slane %v817_v10, 1  ;;  %v820_v20 = vrot.slane %v817_v10, 2  ;;  %v821_v21 = vrot.slane %v817_v10, 3  ;;  %833 = vst.msk [vmem:[%s3621_s11 + $0x6] sm:$0x1] %vm379_vm10, %v817_v10  ;;  %2947 = vmatmul.msk.f32.gmra.mxu3 %vm299_vm9, %v1964_v18  ;;  %2964 = vmatmul.msk.f32.gmra.mxu1 %vm299_vm9, %v2109_v9  ;;  %v822_v22 = vrot.slane %v817_v10, 4 }
 0x1e5   : > { %v823_v23 = vrot.slane %v817_v10, 5  ;;  %v824_v24 = vrot.slane %v817_v10, 6  ;;  %v825_v26 = vrot.slane %v817_v10, 7 }
 0x1e6   : > { %834 = vst.msk [vmem:[%s3621_s11 + $0x26] sm:$0x1] %vm379_vm10, %v819_v19 }
 0x1e7   : > { %835 = vst.msk [vmem:[%s3621_s11 + $0x46] sm:$0x1] %vm379_vm10, %v820_v20  ;;  %v785_v25 = vpop.f32.mrf.mxu3 }
 0x1e8   : > { %836 = vst.msk [vmem:[%s3621_s11 + $0x66] sm:$0x1] %vm379_vm10, %v821_v21  ;;  %v815_v27 = vadd.f32 %v814_v7, %v785_v25 }
 0x1e9   : > { %837 = vst.msk [vmem:[%s3621_s11 + $0x86] sm:$0x1] %vm379_vm10, %v822_v22  ;;  %v3952_v28 = vpop.f32.mrf.mxu1 }
 0x1ea   : > { %838 = vst.msk [vmem:[%s3621_s11 + $0xa6] sm:$0x1] %vm379_vm10, %v823_v23  ;;  %v841_v29 = vadd.f32 %v815_v27, %v3610_v61 }
 0x1eb   : > { %839 = vst.msk [vmem:[%s3621_s11 + $0xc6] sm:$0x1] %vm379_vm10, %v824_v24  ;;  %v2257_v30 = vpop.f32.mrf.mxu2 }
 0x1ec   : > { %840 = vst.msk [vmem:[%s3621_s11 + $0xe6] sm:$0x1] %vm379_vm10, %v825_v26  ;;  %v843_v31 = vrot.slane %v841_v29, 1  ;;  %v844_v32 = vrot.slane %v841_v29, 2  ;;  %v845_v33 = vrot.slane %v841_v29, 3  ;;  %2959 = vmatmul.msk.f32.vlgmr.msrb.gmra.mxu3 %vm299_vm9, %v2112_v15  ;;  %2976 = vmatmul.msk.f32.vlgmr.msrb.gmra.mxu1 %vm299_vm9, %v2257_v30  ;;  %v846_v36 = vrot.slane %v841_v29, 4  ;;  %v2414_v15 = vpop.f32.mrf.mxu0 }
 0x1ed   : > { %857 = vst.msk [vmem:[%s3621_s11 + $0x7] sm:$0x1] %vm379_vm10, %v841_v29  ;;  %2983 = vmatpush.msk.msrb.mxu3 %vm3392_vm7, %v3196_v38  ;;  %3000 = vmatpush.msk.msrb.mxu1 %vm3342_vm5, %v3196_v38  ;;  %v847_v39 = vrot.slane %v841_v29, 5  ;;  %v848_v34 = vrot.slane %v841_v29, 6  ;;  %v849_v41 = vrot.slane %v841_v29, 7 }
 0x1ee   : > { %858 = vst.msk [vmem:[%s3621_s11 + $0x27] sm:$0x1] %vm379_vm10, %v843_v31 }
 0x1ef   : > { %859 = vst.msk [vmem:[%s3621_s11 + $0x47] sm:$0x1] %vm379_vm10, %v844_v32  ;;  %v933_v35 = vpop.f32.mrf.mxu3  ;;  %2984 = vmatpush.msk.msrb.mxu3 %vm3402_vm8, %v3196_v38  ;;  %3001 = vmatpush.msk.msrb.mxu1 %vm3379_vm6, %v3196_v38 }
 0x1f0   : > { %860 = vst.msk [vmem:[%s3621_s11 + $0x67] sm:$0x1] %vm379_vm10, %v845_v33  ;;  %v963_v37 = vadd.f32 %v962_v12, %v933_v35 }
 0x1f1   : > { %861 = vst.msk [vmem:[%s3621_s11 + $0x87] sm:$0x1] %vm379_vm10, %v846_v36  ;;  %v3985_v43 = vpop.f32.mrf.mxu1 }
 0x1f2   : > { %862 = vst.msk [vmem:[%s3621_s11 + $0xa7] sm:$0x1] %vm379_vm10, %v847_v39  ;;  %v968_v45 = vadd.f32 %v963_v37, %v3610_v61 }
 0x1f3   : > { %863 = vst.msk [vmem:[%s3621_s11 + $0xc7] sm:$0x1] %vm379_vm10, %v848_v34  ;;  %v2260_v47 = vpop.f32.mrf.mxu2 }
 0x1f4   : > { %864 = vst.msk [vmem:[%s3621_s11 + $0xe7] sm:$0x1] %vm379_vm10, %v849_v41  ;;  %v970_v48 = vrot.slane %v968_v45, 1  ;;  %v971_v49 = vrot.slane %v968_v45, 2  ;;  %v972_v40 = vrot.slane %v968_v45, 3  ;;  %2960 = vmatmul.msk.f32.gmra.mxu3 %vm299_vm9, %v2115_v11  ;;  %2977 = vmatmul.msk.f32.gmra.mxu1 %vm299_vm9, %v2260_v47  ;;  %v973_v50 = vrot.slane %v968_v45, 4  ;;  %v2417_v29 = vpop.f32.mrf.mxu0 }
 0x1f5   : > { %984 = vst.msk [vmem:[%s3621_s11 + $0x8] sm:$0x1] %vm379_vm10, %v968_v45  ;;  %v974_v51 = vrot.slane %v968_v45, 5  ;;  %v975_v52 = vrot.slane %v968_v45, 6  ;;  %v976_v54 = vrot.slane %v968_v45, 7 }
 0x1f6   : > { %985 = vst.msk [vmem:[%s3621_s11 + $0x28] sm:$0x1] %vm379_vm10, %v970_v48 }
 0x1f7   : > { %986 = vst.msk [vmem:[%s3621_s11 + $0x48] sm:$0x1] %vm379_vm10, %v971_v49  ;;  %v936_v53 = vpop.f32.mrf.mxu3 }
 0x1f8   : > { %987 = vst.msk [vmem:[%s3621_s11 + $0x68] sm:$0x1] %vm379_vm10, %v972_v40  ;;  %v966_v55 = vadd.f32 %v3937_v17, %v936_v53 }
 0x1f9   : > { %988 = vst.msk [vmem:[%s3621_s11 + $0x88] sm:$0x1] %vm379_vm10, %v973_v50  ;;  %v4007_v56 = vpop.f32.mrf.mxu1 }
 0x1fa   : > { %989 = vst.msk [vmem:[%s3621_s11 + $0xa8] sm:$0x1] %vm379_vm10, %v974_v51  ;;  %v992_v57 = vadd.f32 %v966_v55, %v3610_v61 }
 0x1fb   : > { %990 = vst.msk [vmem:[%s3621_s11 + $0xc8] sm:$0x1] %vm379_vm10, %v975_v52  ;;  %v2263_v58 = vpop.f32.mrf.mxu2 }
 0x1fc   : > { %991 = vst.msk [vmem:[%s3621_s11 + $0xe8] sm:$0x1] %vm379_vm10, %v976_v54  ;;  %v994_v59 = vrot.slane %v992_v57, 1  ;;  %v995_v60 = vrot.slane %v992_v57, 2  ;;  %v996_v62 = vrot.slane %v992_v57, 3  ;;  %2972 = vmatmul.msk.f32.vlgmr.msra.gmra.mxu3 %vm299_vm9, %v2263_v58  ;;  %2989 = vmatmul.msk.f32.vlgmr.msra.gmra.mxu1 %vm299_vm9, %v2408_v42  ;;  %v997_v63 = vrot.slane %v992_v57, 4 }
 0x1fd   : > { %1008 = vst.msk [vmem:[%s3621_s11 + $0x9] sm:$0x1] %vm379_vm10, %v992_v57  ;;  %2996 = vmatpush.msk.msra.mxu3 %vm3392_vm7, %v3196_v38  ;;  %v998_v1 = vrot.slane %v992_v57, 5  ;;  %v999_v2 = vrot.slane %v992_v57, 6  ;;  %v1000_v4 = vrot.slane %v992_v57, 7 }
 0x1fe   : > { %1009 = vst.msk [vmem:[%s3621_s11 + $0x29] sm:$0x1] %vm379_vm10, %v994_v59 }
 0x1ff   : > { %1010 = vst.msk [vmem:[%s3621_s11 + $0x49] sm:$0x1] %vm379_vm10, %v995_v60  ;;  %v1084_v3 = vpop.f32.mrf.mxu3  ;;  %2997 = vmatpush.msk.msra.mxu3 %vm3402_vm8, %v3196_v38 }
 0x200   : > { %1011 = vst.msk [vmem:[%s3621_s11 + $0x69] sm:$0x1] %vm379_vm10, %v996_v62  ;;  %v1114_v5 = vadd.f32 %v3952_v28, %v1084_v3 }
 0x201   : > { %1012 = vst.msk [vmem:[%s3621_s11 + $0x89] sm:$0x1] %vm379_vm10, %v997_v63  ;;  %v4035_v44 = vpop.f32.mrf.mxu1 }
 0x202   : > { %1013 = vst.msk [vmem:[%s3621_s11 + $0xa9] sm:$0x1] %vm379_vm10, %v998_v1  ;;  %v1119_v6 = vadd.f32 %v1114_v5, %v3610_v61 }
 0x203   : > { %1014 = vst.msk [vmem:[%s3621_s11 + $0xc9] sm:$0x1] %vm379_vm10, %v999_v2  ;;  %v2266_v46 = vpop.f32.mrf.mxu2 }
 0x204   : > { %1015 = vst.msk [vmem:[%s3621_s11 + $0xe9] sm:$0x1] %vm379_vm10, %v1000_v4  ;;  %v1121_v38 = vrot.slane %v1119_v6, 1  ;;  %v1122_v7 = vrot.slane %v1119_v6, 2  ;;  %v1123_v8 = vrot.slane %v1119_v6, 3  ;;  %2973 = vmatmul.msk.f32.gmra.mxu3 %vm299_vm9, %v2266_v46  ;;  %2990 = vmatmul.msk.f32.gmra.mxu1 %vm299_vm9, %v2411_v0  ;;  %v1124_v9 = vrot.slane %v1119_v6, 4 }
 0x205   : > { %1135 = vst.msk [vmem:[%s3621_s11 + $0xa] sm:$0x1] %vm379_vm10, %v1119_v6  ;;  %v1125_v12 = vrot.slane %v1119_v6, 5  ;;  %v1126_v13 = vrot.slane %v1119_v6, 6  ;;  %v1127_v16 = vrot.slane %v1119_v6, 7 }
 0x206   : > { %1136 = vst.msk [vmem:[%s3621_s11 + $0x2a] sm:$0x1] %vm379_vm10, %v1121_v38 }
 0x207   : > { %1137 = vst.msk [vmem:[%s3621_s11 + $0x4a] sm:$0x1] %vm379_vm10, %v1122_v7  ;;  %v1087_v14 = vpop.f32.mrf.mxu3 }
 0x208   : > { %1138 = vst.msk [vmem:[%s3621_s11 + $0x6a] sm:$0x1] %vm379_vm10, %v1123_v8  ;;  %v1117_v17 = vadd.f32 %v3985_v43, %v1087_v14 }
 0x209   : > { %1139 = vst.msk [vmem:[%s3621_s11 + $0x8a] sm:$0x1] %vm379_vm10, %v1124_v9  ;;  %v4057_v10 = vpop.f32.mrf.mxu1 }
 0x20a   : > { %1140 = vst.msk [vmem:[%s3621_s11 + $0xaa] sm:$0x1] %vm379_vm10, %v1125_v12  ;;  %v1143_v18 = vadd.f32 %v1117_v17, %v3610_v61 }
 0x20b   : > { %1141 = vst.msk [vmem:[%s3621_s11 + $0xca] sm:$0x1] %vm379_vm10, %v1126_v13  ;;  %v2559_v19 = vpop.f32.mrf.mxu2 }
 0x20c   : > { %1142 = vst.msk [vmem:[%s3621_s11 + $0xea] sm:$0x1] %vm379_vm10, %v1127_v16  ;;  %v1145_v20 = vrot.slane %v1143_v18, 1  ;;  %v1146_v21 = vrot.slane %v1143_v18, 2  ;;  %v1147_v22 = vrot.slane %v1143_v18, 3  ;;  %2985 = vmatmul.msk.f32.vlgmr.msrb.gmra.mxu3 %vm299_vm9, %v2414_v15  ;;  %3002 = vmatmul.msk.f32.vlgmr.msrb.gmra.mxu1 %vm299_vm9, %v2559_v19  ;;  %v1148_v23 = vrot.slane %v1143_v18, 4 }
 0x20d   : > { %1159 = vst.msk [vmem:[%s3621_s11 + $0xb] sm:$0x1] %vm379_vm10, %v1143_v18  ;;  %v1149_v24 = vrot.slane %v1143_v18, 5  ;;  %v1150_v25 = vrot.slane %v1143_v18, 6  ;;  %v1151_v27 = vrot.slane %v1143_v18, 7 }
 0x20e   : > { %1160 = vst.msk [vmem:[%s3621_s11 + $0x2b] sm:$0x1] %vm379_vm10, %v1145_v20 }
 0x20f   : > { %1161 = vst.msk [vmem:[%s3621_s11 + $0x4b] sm:$0x1] %vm379_vm10, %v1146_v21  ;;  %v1235_v26 = vpop.f32.mrf.mxu3 }
 0x210   : > { %1162 = vst.msk [vmem:[%s3621_s11 + $0x6b] sm:$0x1] %vm379_vm10, %v1147_v22  ;;  %v1265_v28 = vadd.f32 %v4007_v56, %v1235_v26 }
 0x211   : > { %1163 = vst.msk [vmem:[%s3621_s11 + $0x8b] sm:$0x1] %vm379_vm10, %v1148_v23  ;;  %v4079_v11 = vpop.f32.mrf.mxu1 }
 0x212   : > { %1164 = vst.msk [vmem:[%s3621_s11 + $0xab] sm:$0x1] %vm379_vm10, %v1149_v24  ;;  %v1270_v30 = vadd.f32 %v1265_v28, %v3610_v61 }
 0x213   : > { %1165 = vst.msk [vmem:[%s3621_s11 + $0xcb] sm:$0x1] %vm379_vm10, %v1150_v25  ;;  %v2562_v31 = vpop.f32.mrf.mxu2 }
 0x214   : > { %1166 = vst.msk [vmem:[%s3621_s11 + $0xeb] sm:$0x1] %vm379_vm10, %v1151_v27  ;;  %v1272_v32 = vrot.slane %v1270_v30, 1  ;;  %v1273_v33 = vrot.slane %v1270_v30, 2  ;;  %v1274_v36 = vrot.slane %v1270_v30, 3  ;;  %2986 = vmatmul.msk.f32.gmra.mxu3 %vm299_vm9, %v2417_v29  ;;  %3003 = vmatmul.msk.f32.gmra.mxu1 %vm299_vm9, %v2562_v31  ;;  %v1275_v39 = vrot.slane %v1270_v30, 4 }
 0x215   : > { %1286 = vst.msk [vmem:[%s3621_s11 + $0xc] sm:$0x1] %vm379_vm10, %v1270_v30  ;;  %v1276_v34 = vrot.slane %v1270_v30, 5  ;;  %v1277_v35 = vrot.slane %v1270_v30, 6  ;;  %v1278_v37 = vrot.slane %v1270_v30, 7 }
 0x216   : > { %1287 = vst.msk [vmem:[%s3621_s11 + $0x2c] sm:$0x1] %vm379_vm10, %v1272_v32 }
 0x217   : > { %1288 = vst.msk [vmem:[%s3621_s11 + $0x4c] sm:$0x1] %vm379_vm10, %v1273_v33  ;;  %v1238_v41 = vpop.f32.mrf.mxu3 }
 0x218   : > { %1289 = vst.msk [vmem:[%s3621_s11 + $0x6c] sm:$0x1] %vm379_vm10, %v1274_v36  ;;  %v1268_v43 = vadd.f32 %v4035_v44, %v1238_v41 }
 0x219   : > { %1290 = vst.msk [vmem:[%s3621_s11 + $0x8c] sm:$0x1] %vm379_vm10, %v1275_v39  ;;  %v1566_v45 = vpop.f32.mrf.mxu1 }
 0x21a   : > { %1291 = vst.msk [vmem:[%s3621_s11 + $0xac] sm:$0x1] %vm379_vm10, %v1276_v34  ;;  %v1294_v47 = vadd.f32 %v1268_v43, %v3610_v61 }
 0x21b   : > { %1292 = vst.msk [vmem:[%s3621_s11 + $0xcc] sm:$0x1] %vm379_vm10, %v1277_v35  ;;  %v2565_v42 = vpop.f32.mrf.mxu2 }
 0x21c   : > { %1293 = vst.msk [vmem:[%s3621_s11 + $0xec] sm:$0x1] %vm379_vm10, %v1278_v37  ;;  %v1296_v48 = vrot.slane %v1294_v47, 1  ;;  %v1297_v49 = vrot.slane %v1294_v47, 2  ;;  %v1298_v40 = vrot.slane %v1294_v47, 3  ;;  %2998 = vmatmul.msk.f32.vlgmr.msra.gmra.mxu3 %vm299_vm9, %v2565_v42  ;;  %v1299_v50 = vrot.slane %v1294_v47, 4 }
 0x21d   : > { %1310 = vst.msk [vmem:[%s3621_s11 + $0xd] sm:$0x1] %vm379_vm10, %v1294_v47  ;;  %v1300_v51 = vrot.slane %v1294_v47, 5  ;;  %v1301_v52 = vrot.slane %v1294_v47, 6  ;;  %v1302_v54 = vrot.slane %v1294_v47, 7 }
 0x21e   : > { %1311 = vst.msk [vmem:[%s3621_s11 + $0x2d] sm:$0x1] %vm379_vm10, %v1296_v48 }
 0x21f   : > { %1312 = vst.msk [vmem:[%s3621_s11 + $0x4d] sm:$0x1] %vm379_vm10, %v1297_v49  ;;  %v1386_v53 = vpop.f32.mrf.mxu3 }
 0x220   : > { %1313 = vst.msk [vmem:[%s3621_s11 + $0x6d] sm:$0x1] %vm379_vm10, %v1298_v40  ;;  %v1416_v55 = vadd.f32 %v4057_v10, %v1386_v53 }
 0x221   : > { %1314 = vst.msk [vmem:[%s3621_s11 + $0x8d] sm:$0x1] %vm379_vm10, %v1299_v50  ;;  %v1569_v56 = vpop.f32.mrf.mxu1 }
 0x222   : > { %1315 = vst.msk [vmem:[%s3621_s11 + $0xad] sm:$0x1] %vm379_vm10, %v1300_v51  ;;  %v1421_v57 = vadd.f32 %v1416_v55, %v3610_v61 }
 0x223   : > { %1316 = vst.msk [vmem:[%s3621_s11 + $0xcd] sm:$0x1] %vm379_vm10, %v1301_v52  ;;  %v2568_v58 = vpop.f32.mrf.mxu2 }
 0x224   : > { %1317 = vst.msk [vmem:[%s3621_s11 + $0xed] sm:$0x1] %vm379_vm10, %v1302_v54  ;;  %v1423_v59 = vrot.slane %v1421_v57, 1  ;;  %v1424_v60 = vrot.slane %v1421_v57, 2  ;;  %v1425_v62 = vrot.slane %v1421_v57, 3  ;;  %2999 = vmatmul.msk.f32.gmra.mxu3 %vm299_vm9, %v2568_v58  ;;  %v1426_v63 = vrot.slane %v1421_v57, 4 }
 0x225   : > { %1437 = vst.msk [vmem:[%s3621_s11 + $0xe] sm:$0x1] %vm379_vm10, %v1421_v57  ;;  %v1427_v0 = vrot.slane %v1421_v57, 5  ;;  %v1428_v1 = vrot.slane %v1421_v57, 6  ;;  %v1429_v3 = vrot.slane %v1421_v57, 7 }
 0x226   : > { %1438 = vst.msk [vmem:[%s3621_s11 + $0x2e] sm:$0x1] %vm379_vm10, %v1423_v59 }
 0x227   : > { %1439 = vst.msk [vmem:[%s3621_s11 + $0x4e] sm:$0x1] %vm379_vm10, %v1424_v60  ;;  %v1389_v2 = vpop.f32.mrf.mxu3 }
 0x228   : > { %1440 = vst.msk [vmem:[%s3621_s11 + $0x6e] sm:$0x1] %vm379_vm10, %v1425_v62  ;;  %v1419_v4 = vadd.f32 %v4079_v11, %v1389_v2 }
 0x229   : > { %1441 = vst.msk [vmem:[%s3621_s11 + $0x8e] sm:$0x1] %vm379_vm10, %v1426_v63  ;;  %v1717_v5 = vpop.f32.mrf.mxu1 }
 0x22a   : > { %1442 = vst.msk [vmem:[%s3621_s11 + $0xae] sm:$0x1] %vm379_vm10, %v1427_v0  ;;  %v1445_v44 = vadd.f32 %v1419_v4, %v3610_v61 }
 0x22b   : > { %1443 = vst.msk [vmem:[%s3621_s11 + $0xce] sm:$0x1] %vm379_vm10, %v1428_v1 }
 0x22c   : > { %1444 = vst.msk [vmem:[%s3621_s11 + $0xee] sm:$0x1] %vm379_vm10, %v1429_v3  ;;  %v1447_v6 = vrot.slane %v1445_v44, 1  ;;  %v1448_v46 = vrot.slane %v1445_v44, 2  ;;  %v1449_v38 = vrot.slane %v1445_v44, 3  ;;  %v1450_v7 = vrot.slane %v1445_v44, 4 }
 0x22d   : > { %1461 = vst.msk [vmem:[%s3621_s11 + $0xf] sm:$0x1] %vm379_vm10, %v1445_v44  ;;  %v1451_v8 = vrot.slane %v1445_v44, 5  ;;  %v1452_v9 = vrot.slane %v1445_v44, 6  ;;  %v1453_v13 = vrot.slane %v1445_v44, 7 }
 0x22e   : > { %1462 = vst.msk [vmem:[%s3621_s11 + $0x2f] sm:$0x1] %vm379_vm10, %v1447_v6 }
 0x22f   : > { %1463 = vst.msk [vmem:[%s3621_s11 + $0x4f] sm:$0x1] %vm379_vm10, %v1448_v46  ;;  %v1537_v12 = vpop.f32.mrf.mxu3 }
 0x230   : > { %1464 = vst.msk [vmem:[%s3621_s11 + $0x6f] sm:$0x1] %vm379_vm10, %v1449_v38  ;;  %v1567_v14 = vadd.f32 %v1566_v45, %v1537_v12 }
 0x231   : > { %1465 = vst.msk [vmem:[%s3621_s11 + $0x8f] sm:$0x1] %vm379_vm10, %v1450_v7  ;;  %v1720_v15 = vpop.f32.mrf.mxu1 }
 0x232   : > { %1466 = vst.msk [vmem:[%s3621_s11 + $0xaf] sm:$0x1] %vm379_vm10, %v1451_v8  ;;  %v1572_v16 = vadd.f32 %v1567_v14, %v3610_v61 }
 0x233   : > { %1467 = vst.msk [vmem:[%s3621_s11 + $0xcf] sm:$0x1] %vm379_vm10, %v1452_v9 }
 0x234   : > { %1468 = vst.msk [vmem:[%s3621_s11 + $0xef] sm:$0x1] %vm379_vm10, %v1453_v13  ;;  %v1574_v17 = vrot.slane %v1572_v16, 1  ;;  %v1575_v10 = vrot.slane %v1572_v16, 2  ;;  %v1576_v18 = vrot.slane %v1572_v16, 3  ;;  %v1577_v19 = vrot.slane %v1572_v16, 4 }
 0x235   : > { %1588 = vst.msk [vmem:[%s3621_s11 + $0x10] sm:$0x1] %vm379_vm10, %v1572_v16  ;;  %v1578_v20 = vrot.slane %v1572_v16, 5  ;;  %v1579_v21 = vrot.slane %v1572_v16, 6  ;;  %v1580_v23 = vrot.slane %v1572_v16, 7 }
 0x236   : > { %1589 = vst.msk [vmem:[%s3621_s11 + $0x30] sm:$0x1] %vm379_vm10, %v1574_v17 }
 0x237   : > { %1590 = vst.msk [vmem:[%s3621_s11 + $0x50] sm:$0x1] %vm379_vm10, %v1575_v10  ;;  %v1540_v22 = vpop.f32.mrf.mxu3 }
 0x238   : > { %1591 = vst.msk [vmem:[%s3621_s11 + $0x70] sm:$0x1] %vm379_vm10, %v1576_v18  ;;  %v1570_v24 = vadd.f32 %v1569_v56, %v1540_v22 }
 0x239   : > { %1592 = vst.msk [vmem:[%s3621_s11 + $0x90] sm:$0x1] %vm379_vm10, %v1577_v19  ;;  %v1868_v25 = vpop.f32.mrf.mxu1 }
 0x23a   : > { %1593 = vst.msk [vmem:[%s3621_s11 + $0xb0] sm:$0x1] %vm379_vm10, %v1578_v20  ;;  %v1596_v26 = vadd.f32 %v1570_v24, %v3610_v61 }
 0x23b   : > { %1594 = vst.msk [vmem:[%s3621_s11 + $0xd0] sm:$0x1] %vm379_vm10, %v1579_v21 }
 0x23c   : > { %1595 = vst.msk [vmem:[%s3621_s11 + $0xf0] sm:$0x1] %vm379_vm10, %v1580_v23  ;;  %v1598_v27 = vrot.slane %v1596_v26, 1  ;;  %v1599_v28 = vrot.slane %v1596_v26, 2  ;;  %v1600_v11 = vrot.slane %v1596_v26, 3  ;;  %v1601_v29 = vrot.slane %v1596_v26, 4 }
 0x23d   : > { %1612 = vst.msk [vmem:[%s3621_s11 + $0x11] sm:$0x1] %vm379_vm10, %v1596_v26  ;;  %v1602_v30 = vrot.slane %v1596_v26, 5  ;;  %v1603_v31 = vrot.slane %v1596_v26, 6  ;;  %v1604_v33 = vrot.slane %v1596_v26, 7 }
 0x23e   : > { %1613 = vst.msk [vmem:[%s3621_s11 + $0x31] sm:$0x1] %vm379_vm10, %v1598_v27 }
 0x23f   : > { %1614 = vst.msk [vmem:[%s3621_s11 + $0x51] sm:$0x1] %vm379_vm10, %v1599_v28  ;;  %v1688_v32 = vpop.f32.mrf.mxu3 }
 0x240   : > { %1615 = vst.msk [vmem:[%s3621_s11 + $0x71] sm:$0x1] %vm379_vm10, %v1600_v11  ;;  %v1718_v36 = vadd.f32 %v1717_v5, %v1688_v32 }
 0x241   : > { %1616 = vst.msk [vmem:[%s3621_s11 + $0x91] sm:$0x1] %vm379_vm10, %v1601_v29  ;;  %v1871_v34 = vpop.f32.mrf.mxu1 }
 0x242   : > { %1617 = vst.msk [vmem:[%s3621_s11 + $0xb1] sm:$0x1] %vm379_vm10, %v1602_v30  ;;  %v1723_v39 = vadd.f32 %v1718_v36, %v3610_v61 }
 0x243   : > { %1618 = vst.msk [vmem:[%s3621_s11 + $0xd1] sm:$0x1] %vm379_vm10, %v1603_v31 }
 0x244   : > { %1619 = vst.msk [vmem:[%s3621_s11 + $0xf1] sm:$0x1] %vm379_vm10, %v1604_v33  ;;  %v1725_v35 = vrot.slane %v1723_v39, 1  ;;  %v1726_v41 = vrot.slane %v1723_v39, 2  ;;  %v1727_v37 = vrot.slane %v1723_v39, 3  ;;  %v1728_v43 = vrot.slane %v1723_v39, 4 }
 0x245   : > { %1739 = vst.msk [vmem:[%s3621_s11 + $0x12] sm:$0x1] %vm379_vm10, %v1723_v39  ;;  %v1729_v45 = vrot.slane %v1723_v39, 5  ;;  %v1730_v47 = vrot.slane %v1723_v39, 6  ;;  %v1731_v48 = vrot.slane %v1723_v39, 7 }
 0x246   : > { %1740 = vst.msk [vmem:[%s3621_s11 + $0x32] sm:$0x1] %vm379_vm10, %v1725_v35 }
 0x247   : > { %1741 = vst.msk [vmem:[%s3621_s11 + $0x52] sm:$0x1] %vm379_vm10, %v1726_v41  ;;  %v1691_v42 = vpop.f32.mrf.mxu3 }
 0x248   : > { %1742 = vst.msk [vmem:[%s3621_s11 + $0x72] sm:$0x1] %vm379_vm10, %v1727_v37  ;;  %v1721_v49 = vadd.f32 %v1720_v15, %v1691_v42 }
 0x249   : > { %1743 = vst.msk [vmem:[%s3621_s11 + $0x92] sm:$0x1] %vm379_vm10, %v1728_v43  ;;  %v2019_v54 = vpop.f32.mrf.mxu1 }
 0x24a   : > { %1744 = vst.msk [vmem:[%s3621_s11 + $0xb2] sm:$0x1] %vm379_vm10, %v1729_v45  ;;  %v1747_v40 = vadd.f32 %v1721_v49, %v3610_v61 }
 0x24b   : > { %1745 = vst.msk [vmem:[%s3621_s11 + $0xd2] sm:$0x1] %vm379_vm10, %v1730_v47 }
 0x24c   : > { %1746 = vst.msk [vmem:[%s3621_s11 + $0xf2] sm:$0x1] %vm379_vm10, %v1731_v48  ;;  %v1749_v50 = vrot.slane %v1747_v40, 1  ;;  %v1750_v51 = vrot.slane %v1747_v40, 2  ;;  %v1751_v52 = vrot.slane %v1747_v40, 3  ;;  %v1752_v53 = vrot.slane %v1747_v40, 4 }
 0x24d   : > { %1763 = vst.msk [vmem:[%s3621_s11 + $0x13] sm:$0x1] %vm379_vm10, %v1747_v40  ;;  %v1753_v55 = vrot.slane %v1747_v40, 5  ;;  %v1754_v56 = vrot.slane %v1747_v40, 6  ;;  %v1755_v58 = vrot.slane %v1747_v40, 7 }
 0x24e   : > { %1764 = vst.msk [vmem:[%s3621_s11 + $0x33] sm:$0x1] %vm379_vm10, %v1749_v50 }
 0x24f   : > { %1765 = vst.msk [vmem:[%s3621_s11 + $0x53] sm:$0x1] %vm379_vm10, %v1750_v51  ;;  %v1839_v57 = vpop.f32.mrf.mxu3 }
 0x250   : > { %1766 = vst.msk [vmem:[%s3621_s11 + $0x73] sm:$0x1] %vm379_vm10, %v1751_v52  ;;  %v1869_v59 = vadd.f32 %v1868_v25, %v1839_v57 }
 0x251   : > { %1767 = vst.msk [vmem:[%s3621_s11 + $0x93] sm:$0x1] %vm379_vm10, %v1752_v53  ;;  %v2022_v4 = vpop.f32.mrf.mxu1 }
 0x252   : > { %1768 = vst.msk [vmem:[%s3621_s11 + $0xb3] sm:$0x1] %vm379_vm10, %v1753_v55  ;;  %v1874_v60 = vadd.f32 %v1869_v59, %v3610_v61 }
 0x253   : > { %1769 = vst.msk [vmem:[%s3621_s11 + $0xd3] sm:$0x1] %vm379_vm10, %v1754_v56 }
 0x254   : > { %1770 = vst.msk [vmem:[%s3621_s11 + $0xf3] sm:$0x1] %vm379_vm10, %v1755_v58  ;;  %v1876_v62 = vrot.slane %v1874_v60, 1  ;;  %v1877_v63 = vrot.slane %v1874_v60, 2  ;;  %v1878_v0 = vrot.slane %v1874_v60, 3  ;;  %v1879_v1 = vrot.slane %v1874_v60, 4 }
 0x255   : > { %1890 = vst.msk [vmem:[%s3621_s11 + $0x14] sm:$0x1] %vm379_vm10, %v1874_v60  ;;  %v1880_v2 = vrot.slane %v1874_v60, 5  ;;  %v1881_v3 = vrot.slane %v1874_v60, 6  ;;  %v1882_v44 = vrot.slane %v1874_v60, 7 }
 0x256   : > { %1891 = vst.msk [vmem:[%s3621_s11 + $0x34] sm:$0x1] %vm379_vm10, %v1876_v62 }
 0x257   : > { %1892 = vst.msk [vmem:[%s3621_s11 + $0x54] sm:$0x1] %vm379_vm10, %v1877_v63  ;;  %v1842_v5 = vpop.f32.mrf.mxu3 }
 0x258   : > { %1893 = vst.msk [vmem:[%s3621_s11 + $0x74] sm:$0x1] %vm379_vm10, %v1878_v0  ;;  %v1872_v6 = vadd.f32 %v1871_v34, %v1842_v5 }
 0x259   : > { %1894 = vst.msk [vmem:[%s3621_s11 + $0x94] sm:$0x1] %vm379_vm10, %v1879_v1  ;;  %v2170_v17 = vpop.f32.mrf.mxu1 }
 0x25a   : > { %1895 = vst.msk [vmem:[%s3621_s11 + $0xb4] sm:$0x1] %vm379_vm10, %v1880_v2  ;;  %v1898_v46 = vadd.f32 %v1872_v6, %v3610_v61 }
 0x25b   : > { %1896 = vst.msk [vmem:[%s3621_s11 + $0xd4] sm:$0x1] %vm379_vm10, %v1881_v3 }
 0x25c   : > { %1897 = vst.msk [vmem:[%s3621_s11 + $0xf4] sm:$0x1] %vm379_vm10, %v1882_v44  ;;  %v1900_v38 = vrot.slane %v1898_v46, 1  ;;  %v1901_v7 = vrot.slane %v1898_v46, 2  ;;  %v1902_v8 = vrot.slane %v1898_v46, 3  ;;  %v1903_v9 = vrot.slane %v1898_v46, 4 }
 0x25d   : > { %1914 = vst.msk [vmem:[%s3621_s11 + $0x15] sm:$0x1] %vm379_vm10, %v1898_v46  ;;  %v1904_v12 = vrot.slane %v1898_v46, 5  ;;  %v1905_v13 = vrot.slane %v1898_v46, 6  ;;  %v1906_v15 = vrot.slane %v1898_v46, 7 }
 0x25e   : > { %1915 = vst.msk [vmem:[%s3621_s11 + $0x35] sm:$0x1] %vm379_vm10, %v1900_v38 }
 0x25f   : > { %1916 = vst.msk [vmem:[%s3621_s11 + $0x55] sm:$0x1] %vm379_vm10, %v1901_v7  ;;  %v1990_v14 = vpop.f32.mrf.mxu3 }
 0x260   : > { %1917 = vst.msk [vmem:[%s3621_s11 + $0x75] sm:$0x1] %vm379_vm10, %v1902_v8  ;;  %v2020_v16 = vadd.f32 %v2019_v54, %v1990_v14 }
 0x261   : > { %1918 = vst.msk [vmem:[%s3621_s11 + $0x95] sm:$0x1] %vm379_vm10, %v1903_v9  ;;  %v2173_v28 = vpop.f32.mrf.mxu1 }
 0x262   : > { %1919 = vst.msk [vmem:[%s3621_s11 + $0xb5] sm:$0x1] %vm379_vm10, %v1904_v12  ;;  %v2025_v10 = vadd.f32 %v2020_v16, %v3610_v61 }
 0x263   : > { %1920 = vst.msk [vmem:[%s3621_s11 + $0xd5] sm:$0x1] %vm379_vm10, %v1905_v13 }
 0x264   : > { %1921 = vst.msk [vmem:[%s3621_s11 + $0xf5] sm:$0x1] %vm379_vm10, %v1906_v15  ;;  %v2027_v18 = vrot.slane %v2025_v10, 1  ;;  %v2028_v19 = vrot.slane %v2025_v10, 2  ;;  %v2029_v20 = vrot.slane %v2025_v10, 3  ;;  %v2030_v21 = vrot.slane %v2025_v10, 4 }
 0x265   : > { %2041 = vst.msk [vmem:[%s3621_s11 + $0x16] sm:$0x1] %vm379_vm10, %v2025_v10  ;;  %v2031_v22 = vrot.slane %v2025_v10, 5  ;;  %v2032_v23 = vrot.slane %v2025_v10, 6  ;;  %v2033_v25 = vrot.slane %v2025_v10, 7 }
 0x266   : > { %2042 = vst.msk [vmem:[%s3621_s11 + $0x36] sm:$0x1] %vm379_vm10, %v2027_v18 }
 0x267   : > { %2043 = vst.msk [vmem:[%s3621_s11 + $0x56] sm:$0x1] %vm379_vm10, %v2028_v19  ;;  %v1993_v24 = vpop.f32.mrf.mxu3 }
 0x268   : > { %2044 = vst.msk [vmem:[%s3621_s11 + $0x76] sm:$0x1] %vm379_vm10, %v2029_v20  ;;  %v2023_v26 = vadd.f32 %v2022_v4, %v1993_v24 }
 0x269   : > { %2045 = vst.msk [vmem:[%s3621_s11 + $0x96] sm:$0x1] %vm379_vm10, %v2030_v21  ;;  %v2321_v45 = vpop.f32.mrf.mxu1 }
 0x26a   : > { %2046 = vst.msk [vmem:[%s3621_s11 + $0xb6] sm:$0x1] %vm379_vm10, %v2031_v22  ;;  %v2049_v27 = vadd.f32 %v2023_v26, %v3610_v61 }
 0x26b   : > { %2047 = vst.msk [vmem:[%s3621_s11 + $0xd6] sm:$0x1] %vm379_vm10, %v2032_v23 }
 0x26c   : > { %2048 = vst.msk [vmem:[%s3621_s11 + $0xf6] sm:$0x1] %vm379_vm10, %v2033_v25  ;;  %v2051_v11 = vrot.slane %v2049_v27, 1  ;;  %v2052_v29 = vrot.slane %v2049_v27, 2  ;;  %v2053_v30 = vrot.slane %v2049_v27, 3  ;;  %v2054_v31 = vrot.slane %v2049_v27, 4 }
 0x26d   : > { %2065 = vst.msk [vmem:[%s3621_s11 + $0x17] sm:$0x1] %vm379_vm10, %v2049_v27  ;;  %v2055_v32 = vrot.slane %v2049_v27, 5  ;;  %v2056_v33 = vrot.slane %v2049_v27, 6  ;;  %v2057_v39 = vrot.slane %v2049_v27, 7 }
 0x26e   : > { %2066 = vst.msk [vmem:[%s3621_s11 + $0x37] sm:$0x1] %vm379_vm10, %v2051_v11 }
 0x26f   : > { %2067 = vst.msk [vmem:[%s3621_s11 + $0x57] sm:$0x1] %vm379_vm10, %v2052_v29  ;;  %v2141_v36 = vpop.f32.mrf.mxu3 }
 0x270   : > { %2068 = vst.msk [vmem:[%s3621_s11 + $0x77] sm:$0x1] %vm379_vm10, %v2053_v30  ;;  %v2171_v34 = vadd.f32 %v2170_v17, %v2141_v36 }
 0x271   : > { %2069 = vst.msk [vmem:[%s3621_s11 + $0x97] sm:$0x1] %vm379_vm10, %v2054_v31  ;;  %v2324_v57 = vpop.f32.mrf.mxu1 }
 0x272   : > { %2070 = vst.msk [vmem:[%s3621_s11 + $0xb7] sm:$0x1] %vm379_vm10, %v2055_v32  ;;  %v2176_v35 = vadd.f32 %v2171_v34, %v3610_v61 }
 0x273   : > { %2071 = vst.msk [vmem:[%s3621_s11 + $0xd7] sm:$0x1] %vm379_vm10, %v2056_v33 }
 0x274   : > { %2072 = vst.msk [vmem:[%s3621_s11 + $0xf7] sm:$0x1] %vm379_vm10, %v2057_v39  ;;  %v2178_v41 = vrot.slane %v2176_v35, 1  ;;  %v2179_v37 = vrot.slane %v2176_v35, 2  ;;  %v2180_v43 = vrot.slane %v2176_v35, 3  ;;  %v2181_v47 = vrot.slane %v2176_v35, 4 }
 0x275   : > { %2192 = vst.msk [vmem:[%s3621_s11 + $0x18] sm:$0x1] %vm379_vm10, %v2176_v35  ;;  %v2182_v42 = vrot.slane %v2176_v35, 5  ;;  %v2183_v48 = vrot.slane %v2176_v35, 6  ;;  %v2184_v40 = vrot.slane %v2176_v35, 7 }
 0x276   : > { %2193 = vst.msk [vmem:[%s3621_s11 + $0x38] sm:$0x1] %vm379_vm10, %v2178_v41 }
 0x277   : > { %2194 = vst.msk [vmem:[%s3621_s11 + $0x58] sm:$0x1] %vm379_vm10, %v2179_v37  ;;  %v2144_v49 = vpop.f32.mrf.mxu3 }
 0x278   : > { %2195 = vst.msk [vmem:[%s3621_s11 + $0x78] sm:$0x1] %vm379_vm10, %v2180_v43  ;;  %v2174_v50 = vadd.f32 %v2173_v28, %v2144_v49 }
 0x279   : > { %2196 = vst.msk [vmem:[%s3621_s11 + $0x98] sm:$0x1] %vm379_vm10, %v2181_v47  ;;  %v2472_v38 = vpop.f32.mrf.mxu1 }
 0x27a   : > { %2197 = vst.msk [vmem:[%s3621_s11 + $0xb8] sm:$0x1] %vm379_vm10, %v2182_v42  ;;  %v2200_v51 = vadd.f32 %v2174_v50, %v3610_v61 }
 0x27b   : > { %2198 = vst.msk [vmem:[%s3621_s11 + $0xd8] sm:$0x1] %vm379_vm10, %v2183_v48 }
 0x27c   : > { %2199 = vst.msk [vmem:[%s3621_s11 + $0xf8] sm:$0x1] %vm379_vm10, %v2184_v40  ;;  %v2202_v52 = vrot.slane %v2200_v51, 1  ;;  %v2203_v53 = vrot.slane %v2200_v51, 2  ;;  %v2204_v54 = vrot.slane %v2200_v51, 3  ;;  %v2205_v55 = vrot.slane %v2200_v51, 4 }
 0x27d   : > { %2216 = vst.msk [vmem:[%s3621_s11 + $0x19] sm:$0x1] %vm379_vm10, %v2200_v51  ;;  %v2206_v56 = vrot.slane %v2200_v51, 5  ;;  %v2207_v58 = vrot.slane %v2200_v51, 6  ;;  %v2208_v60 = vrot.slane %v2200_v51, 7 }
 0x27e   : > { %2217 = vst.msk [vmem:[%s3621_s11 + $0x39] sm:$0x1] %vm379_vm10, %v2202_v52 }
 0x27f   : > { %2218 = vst.msk [vmem:[%s3621_s11 + $0x59] sm:$0x1] %vm379_vm10, %v2203_v53  ;;  %v2292_v59 = vpop.f32.mrf.mxu3 }
 0x280   : > { %2219 = vst.msk [vmem:[%s3621_s11 + $0x79] sm:$0x1] %vm379_vm10, %v2204_v54  ;;  %v2322_v62 = vadd.f32 %v2321_v45, %v2292_v59 }
 0x281   : > { %2220 = vst.msk [vmem:[%s3621_s11 + $0x99] sm:$0x1] %vm379_vm10, %v2205_v55  ;;  %v2475_v19 = vpop.f32.mrf.mxu1 }
 0x282   : > { %2221 = vst.msk [vmem:[%s3621_s11 + $0xb9] sm:$0x1] %vm379_vm10, %v2206_v56  ;;  %v2327_v63 = vadd.f32 %v2322_v62, %v3610_v61 }
 0x283   : > { %2222 = vst.msk [vmem:[%s3621_s11 + $0xd9] sm:$0x1] %vm379_vm10, %v2207_v58 }
 0x284   : > { %2223 = vst.msk [vmem:[%s3621_s11 + $0xf9] sm:$0x1] %vm379_vm10, %v2208_v60  ;;  %v2329_v0 = vrot.slane %v2327_v63, 1  ;;  %v2330_v1 = vrot.slane %v2327_v63, 2  ;;  %v2331_v2 = vrot.slane %v2327_v63, 3  ;;  %v2332_v3 = vrot.slane %v2327_v63, 4 }
 0x285   : > { %2343 = vst.msk [vmem:[%s3621_s11 + $0x1a] sm:$0x1] %vm379_vm10, %v2327_v63  ;;  %v2333_v4 = vrot.slane %v2327_v63, 5  ;;  %v2334_v5 = vrot.slane %v2327_v63, 6  ;;  %v2335_v6 = vrot.slane %v2327_v63, 7 }
 0x286   : > { %2344 = vst.msk [vmem:[%s3621_s11 + $0x3a] sm:$0x1] %vm379_vm10, %v2329_v0 }
 0x287   : > { %2345 = vst.msk [vmem:[%s3621_s11 + $0x5a] sm:$0x1] %vm379_vm10, %v2330_v1  ;;  %v2295_v44 = vpop.f32.mrf.mxu3 }
 0x288   : > { %2346 = vst.msk [vmem:[%s3621_s11 + $0x7a] sm:$0x1] %vm379_vm10, %v2331_v2  ;;  %v2325_v46 = vadd.f32 %v2324_v57, %v2295_v44 }
 0x289   : > { %2347 = vst.msk [vmem:[%s3621_s11 + $0x9a] sm:$0x1] %vm379_vm10, %v2332_v3  ;;  %v2623_v32 = vpop.f32.mrf.mxu1 }
 0x28a   : > { %2348 = vst.msk [vmem:[%s3621_s11 + $0xba] sm:$0x1] %vm379_vm10, %v2333_v4  ;;  %v2351_v7 = vadd.f32 %v2325_v46, %v3610_v61 }
 0x28b   : > { %2349 = vst.msk [vmem:[%s3621_s11 + $0xda] sm:$0x1] %vm379_vm10, %v2334_v5 }
 0x28c   : > { %2350 = vst.msk [vmem:[%s3621_s11 + $0xfa] sm:$0x1] %vm379_vm10, %v2335_v6  ;;  %v2353_v8 = vrot.slane %v2351_v7, 1  ;;  %v2354_v9 = vrot.slane %v2351_v7, 2  ;;  %v2355_v12 = vrot.slane %v2351_v7, 3  ;;  %v2356_v13 = vrot.slane %v2351_v7, 4 }
 0x28d   : > { %2367 = vst.msk [vmem:[%s3621_s11 + $0x1b] sm:$0x1] %vm379_vm10, %v2351_v7  ;;  %v2357_v14 = vrot.slane %v2351_v7, 5  ;;  %v2358_v15 = vrot.slane %v2351_v7, 6  ;;  %v2359_v17 = vrot.slane %v2351_v7, 7 }
 0x28e   : > { %2368 = vst.msk [vmem:[%s3621_s11 + $0x3b] sm:$0x1] %vm379_vm10, %v2353_v8 }
 0x28f   : > { %2369 = vst.msk [vmem:[%s3621_s11 + $0x5b] sm:$0x1] %vm379_vm10, %v2354_v9  ;;  %v2443_v16 = vpop.f32.mrf.mxu3 }
 0x290   : > { %2370 = vst.msk [vmem:[%s3621_s11 + $0x7b] sm:$0x1] %vm379_vm10, %v2355_v12  ;;  %v2473_v10 = vadd.f32 %v2472_v38, %v2443_v16 }
 0x291   : > { %2371 = vst.msk [vmem:[%s3621_s11 + $0x9b] sm:$0x1] %vm379_vm10, %v2356_v13  ;;  %v2626_v49 = vpop.f32.mrf.mxu1 }
 0x292   : > { %2372 = vst.msk [vmem:[%s3621_s11 + $0xbb] sm:$0x1] %vm379_vm10, %v2357_v14  ;;  %v2478_v18 = vadd.f32 %v2473_v10, %v3610_v61 }
 0x293   : > { %2373 = vst.msk [vmem:[%s3621_s11 + $0xdb] sm:$0x1] %vm379_vm10, %v2358_v15 }
 0x294   : > { %2374 = vst.msk [vmem:[%s3621_s11 + $0xfb] sm:$0x1] %vm379_vm10, %v2359_v17  ;;  %v2480_v20 = vrot.slane %v2478_v18, 1  ;;  %v2481_v21 = vrot.slane %v2478_v18, 2  ;;  %v2482_v22 = vrot.slane %v2478_v18, 3  ;;  %v2483_v23 = vrot.slane %v2478_v18, 4 }
 0x295   : > { %2494 = vst.msk [vmem:[%s3621_s11 + $0x1c] sm:$0x1] %vm379_vm10, %v2478_v18  ;;  %v2484_v24 = vrot.slane %v2478_v18, 5  ;;  %v2485_v25 = vrot.slane %v2478_v18, 6  ;;  %v2486_v27 = vrot.slane %v2478_v18, 7 }
 0x296   : > { %2495 = vst.msk [vmem:[%s3621_s11 + $0x3c] sm:$0x1] %vm379_vm10, %v2480_v20 }
 0x297   : > { %2496 = vst.msk [vmem:[%s3621_s11 + $0x5c] sm:$0x1] %vm379_vm10, %v2481_v21  ;;  %v2446_v26 = vpop.f32.mrf.mxu3 }
 0x298   : > { %2497 = vst.msk [vmem:[%s3621_s11 + $0x7c] sm:$0x1] %vm379_vm10, %v2482_v22  ;;  %v2476_v28 = vadd.f32 %v2475_v19, %v2446_v26 }
 0x299   : > { %2498 = vst.msk [vmem:[%s3621_s11 + $0x9c] sm:$0x1] %vm379_vm10, %v2483_v23 }
 0x29a   : > { %2499 = vst.msk [vmem:[%s3621_s11 + $0xbc] sm:$0x1] %vm379_vm10, %v2484_v24  ;;  %v2502_v11 = vadd.f32 %v2476_v28, %v3610_v61 }
 0x29b   : > { %2500 = vst.msk [vmem:[%s3621_s11 + $0xdc] sm:$0x1] %vm379_vm10, %v2485_v25 }
 0x29c   : > { %2501 = vst.msk [vmem:[%s3621_s11 + $0xfc] sm:$0x1] %vm379_vm10, %v2486_v27  ;;  %v2504_v29 = vrot.slane %v2502_v11, 1  ;;  %v2505_v30 = vrot.slane %v2502_v11, 2  ;;  %v2506_v31 = vrot.slane %v2502_v11, 3  ;;  %v2507_v33 = vrot.slane %v2502_v11, 4 }
 0x29d   : > { %2518 = vst.msk [vmem:[%s3621_s11 + $0x1d] sm:$0x1] %vm379_vm10, %v2502_v11  ;;  %v2508_v36 = vrot.slane %v2502_v11, 5  ;;  %v2509_v39 = vrot.slane %v2502_v11, 6  ;;  %v2510_v35 = vrot.slane %v2502_v11, 7 }
 0x29e   : > { %2519 = vst.msk [vmem:[%s3621_s11 + $0x3d] sm:$0x1] %vm379_vm10, %v2504_v29 }
 0x29f   : > { %2520 = vst.msk [vmem:[%s3621_s11 + $0x5d] sm:$0x1] %vm379_vm10, %v2505_v30  ;;  %v2594_v34 = vpop.f32.mrf.mxu3 }
 0x2a0   : > { %2521 = vst.msk [vmem:[%s3621_s11 + $0x7d] sm:$0x1] %vm379_vm10, %v2506_v31  ;;  %v2624_v41 = vadd.f32 %v2623_v32, %v2594_v34 }
 0x2a1   : > { %2522 = vst.msk [vmem:[%s3621_s11 + $0x9d] sm:$0x1] %vm379_vm10, %v2507_v33 }
 0x2a2   : > { %2523 = vst.msk [vmem:[%s3621_s11 + $0xbd] sm:$0x1] %vm379_vm10, %v2508_v36  ;;  %v2629_v37 = vadd.f32 %v2624_v41, %v3610_v61 }
 0x2a3   : > { %2524 = vst.msk [vmem:[%s3621_s11 + $0xdd] sm:$0x1] %vm379_vm10, %v2509_v39 }
 0x2a4   : > { %2525 = vst.msk [vmem:[%s3621_s11 + $0xfd] sm:$0x1] %vm379_vm10, %v2510_v35  ;;  %v2631_v43 = vrot.slane %v2629_v37, 1  ;;  %v2632_v45 = vrot.slane %v2629_v37, 2  ;;  %v2633_v47 = vrot.slane %v2629_v37, 3  ;;  %v2634_v42 = vrot.slane %v2629_v37, 4 }
 0x2a5   : > { %2645 = vst.msk [vmem:[%s3621_s11 + $0x1e] sm:$0x1] %vm379_vm10, %v2629_v37  ;;  %v2635_v48 = vrot.slane %v2629_v37, 5  ;;  %v2636_v40 = vrot.slane %v2629_v37, 6  ;;  %v2637_v51 = vrot.slane %v2629_v37, 7 }
 0x2a6   : > { %2646 = vst.msk [vmem:[%s3621_s11 + $0x3e] sm:$0x1] %vm379_vm10, %v2631_v43 }
 0x2a7   : > { %2647 = vst.msk [vmem:[%s3621_s11 + $0x5e] sm:$0x1] %vm379_vm10, %v2632_v45  ;;  %v2597_v50 = vpop.f32.mrf.mxu3 }
 0x2a8   : > { %2648 = vst.msk [vmem:[%s3621_s11 + $0x7e] sm:$0x1] %vm379_vm10, %v2633_v47  ;;  %v2627_v52 = vadd.f32 %v2626_v49, %v2597_v50 }
 0x2a9   : > { %2649 = vst.msk [vmem:[%s3621_s11 + $0x9e] sm:$0x1] %vm379_vm10, %v2634_v42 }
 0x2aa   : > { %2650 = vst.msk [vmem:[%s3621_s11 + $0xbe] sm:$0x1] %vm379_vm10, %v2635_v48  ;;  %v2653_v53 = vadd.f32 %v2627_v52, %v3610_v61 }
 0x2ab   : > { %2651 = vst.msk [vmem:[%s3621_s11 + $0xde] sm:$0x1] %vm379_vm10, %v2636_v40 }
 0x2ac   : > { %2652 = vst.msk [vmem:[%s3621_s11 + $0xfe] sm:$0x1] %vm379_vm10, %v2637_v51  ;;  %v2655_v54 = vrot.slane %v2653_v53, 1  ;;  %v2656_v55 = vrot.slane %v2653_v53, 2  ;;  %v2657_v56 = vrot.slane %v2653_v53, 3  ;;  %v2658_v57 = vrot.slane %v2653_v53, 4 }
 0x2ad   : > { %2669 = vst.msk [vmem:[%s3621_s11 + $0x1f] sm:$0x1] %vm379_vm10, %v2653_v53  ;;  %v2659_v61 = vrot.slane %v2653_v53, 5  ;;  %v2660_v58 = vrot.slane %v2653_v53, 6  ;;  %v2661_v59 = vrot.slane %v2653_v53, 7 }
 0x2ae   : > { %2670 = vst.msk [vmem:[%s3621_s11 + $0x3f] sm:$0x1] %vm379_vm10, %v2655_v54 }
 0x2af   : > { %2671 = vst.msk [vmem:[%s3621_s11 + $0x5f] sm:$0x1] %vm379_vm10, %v2656_v55 }
 0x2b0   : > { %2672 = vst.msk [vmem:[%s3621_s11 + $0x7f] sm:$0x1] %vm379_vm10, %v2657_v56 }
 0x2b1   : > { %2673 = vst.msk [vmem:[%s3621_s11 + $0x9f] sm:$0x1] %vm379_vm10, %v2658_v57 }
 0x2b2   : > { %2674 = vst.msk [vmem:[%s3621_s11 + $0xbf] sm:$0x1] %vm379_vm10, %v2659_v61 }
 0x2b3   : > { %2675 = vst.msk [vmem:[%s3621_s11 + $0xdf] sm:$0x1] %vm379_vm10, %v2660_v58 }
 0x2b4   : > { %2676 = vst.msk [vmem:[%s3621_s11 + $0xff] sm:$0x1] %vm379_vm10, %v2661_v59 }
 0x2b5   : > { %3137 = shalt.err (!%p3134_p13)
}
 0x2b6   : > { %s3198_s19 = smov 128   ;;  %s3199_s9 = smov 8  }
 0x2b7   : > { %3013 = dma.vmem_to_hbm [thread:$0]  (%p3271_p9), %s2693_s15, 4096, %s2695_s22, %s2678_s24, %s3198_s19, %s3198_s19, %s3199_s9  }
 0x2b8 PF: > { %s2709_s10 = sand.u32 1, %s3172_s12   ;;  %p3020_p0 = pnand %p2785_p12, %p3278_p11 }
 0x2b9   : > { %s2710_s11 = scalar_lea.sflag [#allocation4], %s2709_s10 }
 0x2ba   : > { %p3021_p1 = pneg %p3020_p0 }
 0x2bc   : > { %3167 = dma.done.wait (%p3021_p1), %s2710_s11, 4096  }
 0x2bd   : > { %3169 = vsyncadd (%p3021_p1), %s2710_s11, 4294963200  ;;  %s19_s17 = sadd.s32 1, %s3192_s17   ;;  %s4489_s12 = smov %s3176_s13 }
 0x2be   : > { %p16_p2 = scmp.ge.s32.totalorder %s19_s17, 4   ;;  %s4490_s13 = smov %s3180_s14 }
 0x2bf   : > { %s4491_s14 = smov %s3276_s26  ;;  %s4492_s15 = smov %s3188_s16 }
 0x2c0   : > { %s4493_s16 = smov %s4495_s20  ;;  %18 = sbr.rel (!%p16_p2) target bundleno = 6 (0x6), region = 77 }
 0x2c5   :  { %2716 = vsyncpa [#allocation3], 1 }
 0x2c6   :  { %2718 = vsyncpa [#allocation3 + $0x1], 1 }
 0x2c7   :  { %2719 = vsyncpa [#allocation4], 1 }
 0x2c8   :  { %2721 = vsyncpa [#allocation4 + $0x1], 1 }

</bundles_post_ra>
